<compile_context>
chip_gen: v7x
topology: tpu7x:2x2x1
jax: 0.10.0
libtpu: 0.0.40
codegen_flags: <defaults>
</compile_context>

<pallas_src>
import functools

import jax
import jax.numpy as jnp
from jax.experimental import pallas as pl
from jax.experimental.pallas import tpu as pltpu


def _relu_dwconv_kernel(x_ref, w_ref, o_ref, *, C):
    """Fused ReLU + 3x3 stride-2 depthwise conv on space-to-depth input.

    x_ref: (2, 2, Hh, Wh*C)  parity planes of the *unpadded* input:
           x_ref[ph, pw, hh, wh*C + c] = x[c, 2*hh + ph, 2*wh + pw]
    w_ref: (9, Wo*C)         per-tap weight rows, lane-periodic with period C
    o_ref: (Ho, Wo*C)        o_ref[ho, wo*C + c] = out[c, ho, wo]
    """
    Ho, WoC = o_ref.shape

    def tap(kh, kw, first):
        # Output (ho, wo) reads input pixel (2*ho + kh - 1, 2*wo + kw - 1).
        ph = 0 if kh == 1 else 1          # row parity of 2*ho + kh - 1
        pw = 0 if kw == 1 else 1          # col parity of 2*wo + kw - 1
        h0 = 1 if kh == 0 else 0          # first valid output row (top pad)
        w0 = 1 if kw == 0 else 0          # first valid output col (left pad)
        nr = Ho - h0
        nl = WoC - w0 * C
        # ReLU per tap: only one small patch (+ accumulator window) is live.
        patch = jnp.maximum(x_ref[ph, pw, pl.ds(0, nr), pl.ds(0, nl)], 0.0)
        # Weight row is periodic in C, so the same lane window works for every
        # shifted tap.
        wrow = w_ref[pl.ds(kh * 3 + kw, 1), pl.ds(0, nl)]        # (1, nl)
        term = patch * wrow
        dst = (pl.ds(h0, nr), pl.ds(w0 * C, nl))
        if first:
            o_ref[dst] = term             # full-coverage tap -> no zero init
        else:
            o_ref[dst] = o_ref[dst] + term

    # (kh, kw) = (1, 1) covers the whole output window: use it to initialize.
    tap(1, 1, first=True)
    for kh in range(3):
        for kw in range(3):
            if (kh, kw) != (1, 1):
                tap(kh, kw, first=False)


@jax.jit
def relu_dwconv2d(x_nchw, weight):
    """ReLU + depthwise Conv2d(C, C, k=3, stride=2, pad=1, groups=C, no bias).

    x_nchw: (1, C, H, W) float32, weight: (C, 1, 3, 3) float32.
    Requires N == 1 and even H, W (true for this ShuffleNet fragment).
    Returns (1, C, H//2, W//2) float32 (PyTorch NCHW semantics).
    """
    n, c, h, w = x_nchw.shape
    assert n == 1 and h % 2 == 0 and w % 2 == 0
    hh, wh = h // 2, w // 2
    ho, wo = hh, wh

    # ---- glue: ONE real transpose (space-to-depth, channels-last, no pad) --
    x_s2d = (x_nchw.reshape(c, hh, 2, wh, 2)
             .transpose(2, 4, 1, 3, 0)           # (ph, pw, hh, wh, c)
             .reshape(2, 2, hh, wh * c))
    # Tiny per-tap weight rows, tiled so lane j carries channel j % c.
    wt = jnp.tile(weight.reshape(c, 9).T, (1, wo))           # (9, wo*c)

    kernel = functools.partial(_relu_dwconv_kernel, C=c)
    out_flat = pl.pallas_call(
        kernel,
        out_shape=jax.ShapeDtypeStruct((ho, wo * c), x_nchw.dtype),
        grid=(1,),
        in_specs=[
            pl.BlockSpec((2, 2, hh, wh * c), lambda i: (0, 0, 0, 0)),
            pl.BlockSpec((9, wo * c), lambda i: (0, 0)),
        ],
        out_specs=pl.BlockSpec((ho, wo * c), lambda i: (0, 0)),
        compiler_params=pltpu.CompilerParams(
            dimension_semantics=("arbitrary",)),
    )(x_s2d, wt)

    # ---- glue: ONE real transpose back to NCHW ------------------------------
    return out_flat.reshape(ho, wo, c).transpose(2, 0, 1)[None]


def _reference(x_nchw, weight):
    """Pure-JAX reference (mirrors torch ReLU + grouped Conv2d)."""
    xr = jnp.maximum(x_nchw, 0.0)
    return jax.lax.conv_general_dilated(
        xr, weight,
        window_strides=(2, 2),
        padding=((1, 1), (1, 1)),
        dimension_numbers=("NCHW", "OIHW", "NCHW"),
        feature_group_count=x_nchw.shape[1],
        precision=jax.lax.Precision.HIGHEST,
    )


if __name__ == "__main__":
    key = jax.random.PRNGKey(0)
    kx, kw_ = jax.random.split(key)

    # Module spec shape: (1, 24, 56, 56); channels fixed at 24 by the conv.
    x = jax.random.normal(kx, (1, 24, 56, 56), dtype=jnp.float32)
    weight = 0.1 * jax.random.normal(kw_, (24, 1, 3, 3), dtype=jnp.float32)

    out = jax.block_until_ready(relu_dwconv2d(x, weight))
    ref = jax.block_until_ready(_reference(x, weight))

    assert out.shape == (1, 24, 28, 28), out.shape
    assert jnp.allclose(out, ref, atol=1e-5, rtol=1e-5), "mismatch vs reference"

    print("KERNEL_OK")
</pallas_src>

<mosaic_0001>
module attributes {stable_mosaic.version = 11 : i64} {
  func.func @_relu_dwconv_kernel(%arg0: i32, %arg1: memref<2x2x28x672xf32, #tpu.memory_space<vmem>>, %arg2: memref<9x672xf32, #tpu.memory_space<vmem>>, %arg3: memref<28x672xf32, #tpu.memory_space<vmem>>) attributes {dimension_semantics = [#tpu.dimension_semantics<arbitrary>], iteration_bounds = array<i64: 1>, scalar_prefetch = 0 : i64, scratch_operands = 0 : i64, tpu.core_type = #tpu.core_type<tc>, window_params = [{pipeline_mode = #tpu.pipeline_mode<synchronous>, transform_indices = @transform_0, window_bounds = array<i64: 2, 2, 28, 672>}, {pipeline_mode = #tpu.pipeline_mode<synchronous>, transform_indices = @transform_1, window_bounds = array<i64: 9, 672>}, {pipeline_mode = #tpu.pipeline_mode<synchronous>, transform_indices = @transform_2, window_bounds = array<i64: 28, 672>}]} {
    %c0 = arith.constant 0 : index
    %c0_0 = arith.constant 0 : index
    %c0_1 = arith.constant 0 : index
    %c0_2 = arith.constant 0 : index
    %0 = vector.load %arg1[%c0, %c0_0, %c0_1, %c0_2] : memref<2x2x28x672xf32, #tpu.memory_space<vmem>>, vector<1x1x28x672xf32>
    %1 = vector.shape_cast %0 : vector<1x1x28x672xf32> to vector<28x672xf32>
    %cst = arith.constant 0.000000e+00 : f32
    %2 = vector.broadcast %cst : f32 to vector<28x672xf32>
    %3 = arith.maximumf %1, %2 : vector<28x672xf32>
    %c4 = arith.constant 4 : index
    %c0_3 = arith.constant 0 : index
    %4 = vector.load %arg2[%c4, %c0_3] : memref<9x672xf32, #tpu.memory_space<vmem>>, vector<1x672xf32>
    %5 = vector.broadcast %4 : vector<1x672xf32> to vector<28x672xf32>
    %6 = arith.mulf %3, %5 : vector<28x672xf32>
    %c0_4 = arith.constant 0 : index
    %c0_5 = arith.constant 0 : index
    %7 = vector.load %arg3[%c0_4, %c0_5] : memref<28x672xf32, #tpu.memory_space<vmem>>, vector<28x672xf32>
    tpu.vector_store %arg3[%c0_4, %c0_5], %6 {strides = array<i32>} : memref<28x672xf32, #tpu.memory_space<vmem>>, vector<28x672xf32>,
    %c1 = arith.constant 1 : index
    %c1_6 = arith.constant 1 : index
    %c0_7 = arith.constant 0 : index
    %c0_8 = arith.constant 0 : index
    %8 = vector.load %arg1[%c1, %c1_6, %c0_7, %c0_8] : memref<2x2x28x672xf32, #tpu.memory_space<vmem>>, vector<1x1x27x648xf32>
    %9 = vector.shape_cast %8 : vector<1x1x27x648xf32> to vector<27x648xf32>
    %cst_9 = arith.constant 0.000000e+00 : f32
    %10 = vector.broadcast %cst_9 : f32 to vector<27x648xf32>
    %11 = arith.maximumf %9, %10 : vector<27x648xf32>
    %c0_10 = arith.constant 0 : index
    %c0_11 = arith.constant 0 : index
    %12 = vector.load %arg2[%c0_10, %c0_11] : memref<9x672xf32, #tpu.memory_space<vmem>>, vector<1x648xf32>
    %13 = vector.broadcast %12 : vector<1x648xf32> to vector<27x648xf32>
    %14 = arith.mulf %11, %13 : vector<27x648xf32>
    %c1_12 = arith.constant 1 : index
    %c24 = arith.constant 24 : index
    %15 = vector.load %arg3[%c1_12, %c24] : memref<28x672xf32, #tpu.memory_space<vmem>>, vector<27x648xf32>
    %16 = arith.addf %15, %14 : vector<27x648xf32>
    %c1_13 = arith.constant 1 : index
    %c24_14 = arith.constant 24 : index
    %17 = vector.load %arg3[%c1_13, %c24_14] : memref<28x672xf32, #tpu.memory_space<vmem>>, vector<27x648xf32>
    tpu.vector_store %arg3[%c1_13, %c24_14], %16 {strides = array<i32>} : memref<28x672xf32, #tpu.memory_space<vmem>>, vector<27x648xf32>,
    %c1_15 = arith.constant 1 : index
    %c0_16 = arith.constant 0 : index
    %c0_17 = arith.constant 0 : index
    %c0_18 = arith.constant 0 : index
    %18 = vector.load %arg1[%c1_15, %c0_16, %c0_17, %c0_18] : memref<2x2x28x672xf32, #tpu.memory_space<vmem>>, vector<1x1x27x672xf32>
    %19 = vector.shape_cast %18 : vector<1x1x27x672xf32> to vector<27x672xf32>
    %cst_19 = arith.constant 0.000000e+00 : f32
    %20 = vector.broadcast %cst_19 : f32 to vector<27x672xf32>
    %21 = arith.maximumf %19, %20 : vector<27x672xf32>
    %c1_20 = arith.constant 1 : index
    %c0_21 = arith.constant 0 : index
    %22 = vector.load %arg2[%c1_20, %c0_21] : memref<9x672xf32, #tpu.memory_space<vmem>>, vector<1x672xf32>
    %23 = vector.broadcast %22 : vector<1x672xf32> to vector<27x672xf32>
    %24 = arith.mulf %21, %23 : vector<27x672xf32>
    %c1_22 = arith.constant 1 : index
    %c0_23 = arith.constant 0 : index
    %25 = vector.load %arg3[%c1_22, %c0_23] : memref<28x672xf32, #tpu.memory_space<vmem>>, vector<27x672xf32>
    %26 = arith.addf %25, %24 : vector<27x672xf32>
    %c1_24 = arith.constant 1 : index
    %c0_25 = arith.constant 0 : index
    %27 = vector.load %arg3[%c1_24, %c0_25] : memref<28x672xf32, #tpu.memory_space<vmem>>, vector<27x672xf32>
    tpu.vector_store %arg3[%c1_24, %c0_25], %26 {strides = array<i32>} : memref<28x672xf32, #tpu.memory_space<vmem>>, vector<27x672xf32>,
    %c1_26 = arith.constant 1 : index
    %c1_27 = arith.constant 1 : index
    %c0_28 = arith.constant 0 : index
    %c0_29 = arith.constant 0 : index
    %28 = vector.load %arg1[%c1_26, %c1_27, %c0_28, %c0_29] : memref<2x2x28x672xf32, #tpu.memory_space<vmem>>, vector<1x1x27x672xf32>
    %29 = vector.shape_cast %28 : vector<1x1x27x672xf32> to vector<27x672xf32>
    %cst_30 = arith.constant 0.000000e+00 : f32
    %30 = vector.broadcast %cst_30 : f32 to vector<27x672xf32>
    %31 = arith.maximumf %29, %30 : vector<27x672xf32>
    %c2 = arith.constant 2 : index
    %c0_31 = arith.constant 0 : index
    %32 = vector.load %arg2[%c2, %c0_31] : memref<9x672xf32, #tpu.memory_space<vmem>>, vector<1x672xf32>
    %33 = vector.broadcast %32 : vector<1x672xf32> to vector<27x672xf32>
    %34 = arith.mulf %31, %33 : vector<27x672xf32>
    %c1_32 = arith.constant 1 : index
    %c0_33 = arith.constant 0 : index
    %35 = vector.load %arg3[%c1_32, %c0_33] : memref<28x672xf32, #tpu.memory_space<vmem>>, vector<27x672xf32>
    %36 = arith.addf %35, %34 : vector<27x672xf32>
    %c1_34 = arith.constant 1 : index
    %c0_35 = arith.constant 0 : index
    %37 = vector.load %arg3[%c1_34, %c0_35] : memref<28x672xf32, #tpu.memory_space<vmem>>, vector<27x672xf32>
    tpu.vector_store %arg3[%c1_34, %c0_35], %36 {strides = array<i32>} : memref<28x672xf32, #tpu.memory_space<vmem>>, vector<27x672xf32>,
    %c0_36 = arith.constant 0 : index
    %c1_37 = arith.constant 1 : index
    %c0_38 = arith.constant 0 : index
    %c0_39 = arith.constant 0 : index
    %38 = vector.load %arg1[%c0_36, %c1_37, %c0_38, %c0_39] : memref<2x2x28x672xf32, #tpu.memory_space<vmem>>, vector<1x1x28x648xf32>
    %39 = vector.shape_cast %38 : vector<1x1x28x648xf32> to vector<28x648xf32>
    %cst_40 = arith.constant 0.000000e+00 : f32
    %40 = vector.broadcast %cst_40 : f32 to vector<28x648xf32>
    %41 = arith.maximumf %39, %40 : vector<28x648xf32>
    %c3 = arith.constant 3 : index
    %c0_41 = arith.constant 0 : index
    %42 = vector.load %arg2[%c3, %c0_41] : memref<9x672xf32, #tpu.memory_space<vmem>>, vector<1x648xf32>
    %43 = vector.broadcast %42 : vector<1x648xf32> to vector<28x648xf32>
    %44 = arith.mulf %41, %43 : vector<28x648xf32>
    %c0_42 = arith.constant 0 : index
    %c24_43 = arith.constant 24 : index
    %45 = vector.load %arg3[%c0_42, %c24_43] : memref<28x672xf32, #tpu.memory_space<vmem>>, vector<28x648xf32>
    %46 = arith.addf %45, %44 : vector<28x648xf32>
    %c0_44 = arith.constant 0 : index
    %c24_45 = arith.constant 24 : index
    %47 = vector.load %arg3[%c0_44, %c24_45] : memref<28x672xf32, #tpu.memory_space<vmem>>, vector<28x648xf32>
    tpu.vector_store %arg3[%c0_44, %c24_45], %46 {strides = array<i32>} : memref<28x672xf32, #tpu.memory_space<vmem>>, vector<28x648xf32>,
    %c0_46 = arith.constant 0 : index
    %c1_47 = arith.constant 1 : index
    %c0_48 = arith.constant 0 : index
    %c0_49 = arith.constant 0 : index
    %48 = vector.load %arg1[%c0_46, %c1_47, %c0_48, %c0_49] : memref<2x2x28x672xf32, #tpu.memory_space<vmem>>, vector<1x1x28x672xf32>
    %49 = vector.shape_cast %48 : vector<1x1x28x672xf32> to vector<28x672xf32>
    %cst_50 = arith.constant 0.000000e+00 : f32
    %50 = vector.broadcast %cst_50 : f32 to vector<28x672xf32>
    %51 = arith.maximumf %49, %50 : vector<28x672xf32>
    %c5 = arith.constant 5 : index
    %c0_51 = arith.constant 0 : index
    %52 = vector.load %arg2[%c5, %c0_51] : memref<9x672xf32, #tpu.memory_space<vmem>>, vector<1x672xf32>
    %53 = vector.broadcast %52 : vector<1x672xf32> to vector<28x672xf32>
    %54 = arith.mulf %51, %53 : vector<28x672xf32>
    %c0_52 = arith.constant 0 : index
    %c0_53 = arith.constant 0 : index
    %55 = vector.load %arg3[%c0_52, %c0_53] : memref<28x672xf32, #tpu.memory_space<vmem>>, vector<28x672xf32>
    %56 = arith.addf %55, %54 : vector<28x672xf32>
    %c0_54 = arith.constant 0 : index
    %c0_55 = arith.constant 0 : index
    %57 = vector.load %arg3[%c0_54, %c0_55] : memref<28x672xf32, #tpu.memory_space<vmem>>, vector<28x672xf32>
    tpu.vector_store %arg3[%c0_54, %c0_55], %56 {strides = array<i32>} : memref<28x672xf32, #tpu.memory_space<vmem>>, vector<28x672xf32>,
    %c1_56 = arith.constant 1 : index
    %c1_57 = arith.constant 1 : index
    %c0_58 = arith.constant 0 : index
    %c0_59 = arith.constant 0 : index
    %58 = vector.load %arg1[%c1_56, %c1_57, %c0_58, %c0_59] : memref<2x2x28x672xf32, #tpu.memory_space<vmem>>, vector<1x1x28x648xf32>
    %59 = vector.shape_cast %58 : vector<1x1x28x648xf32> to vector<28x648xf32>
    %cst_60 = arith.constant 0.000000e+00 : f32
    %60 = vector.broadcast %cst_60 : f32 to vector<28x648xf32>
    %61 = arith.maximumf %59, %60 : vector<28x648xf32>
    %c6 = arith.constant 6 : index
    %c0_61 = arith.constant 0 : index
    %62 = vector.load %arg2[%c6, %c0_61] : memref<9x672xf32, #tpu.memory_space<vmem>>, vector<1x648xf32>
    %63 = vector.broadcast %62 : vector<1x648xf32> to vector<28x648xf32>
    %64 = arith.mulf %61, %63 : vector<28x648xf32>
    %c0_62 = arith.constant 0 : index
    %c24_63 = arith.constant 24 : index
    %65 = vector.load %arg3[%c0_62, %c24_63] : memref<28x672xf32, #tpu.memory_space<vmem>>, vector<28x648xf32>
    %66 = arith.addf %65, %64 : vector<28x648xf32>
    %c0_64 = arith.constant 0 : index
    %c24_65 = arith.constant 24 : index
    %67 = vector.load %arg3[%c0_64, %c24_65] : memref<28x672xf32, #tpu.memory_space<vmem>>, vector<28x648xf32>
    tpu.vector_store %arg3[%c0_64, %c24_65], %66 {strides = array<i32>} : memref<28x672xf32, #tpu.memory_space<vmem>>, vector<28x648xf32>,
    %c1_66 = arith.constant 1 : index
    %c0_67 = arith.constant 0 : index
    %c0_68 = arith.constant 0 : index
    %c0_69 = arith.constant 0 : index
    %68 = vector.load %arg1[%c1_66, %c0_67, %c0_68, %c0_69] : memref<2x2x28x672xf32, #tpu.memory_space<vmem>>, vector<1x1x28x672xf32>
    %69 = vector.shape_cast %68 : vector<1x1x28x672xf32> to vector<28x672xf32>
    %cst_70 = arith.constant 0.000000e+00 : f32
    %70 = vector.broadcast %cst_70 : f32 to vector<28x672xf32>
    %71 = arith.maximumf %69, %70 : vector<28x672xf32>
    %c7 = arith.constant 7 : index
    %c0_71 = arith.constant 0 : index
    %72 = vector.load %arg2[%c7, %c0_71] : memref<9x672xf32, #tpu.memory_space<vmem>>, vector<1x672xf32>
    %73 = vector.broadcast %72 : vector<1x672xf32> to vector<28x672xf32>
    %74 = arith.mulf %71, %73 : vector<28x672xf32>
    %c0_72 = arith.constant 0 : index
    %c0_73 = arith.constant 0 : index
    %75 = vector.load %arg3[%c0_72, %c0_73] : memref<28x672xf32, #tpu.memory_space<vmem>>, vector<28x672xf32>
    %76 = arith.addf %75, %74 : vector<28x672xf32>
    %c0_74 = arith.constant 0 : index
    %c0_75 = arith.constant 0 : index
    %77 = vector.load %arg3[%c0_74, %c0_75] : memref<28x672xf32, #tpu.memory_space<vmem>>, vector<28x672xf32>
    tpu.vector_store %arg3[%c0_74, %c0_75], %76 {strides = array<i32>} : memref<28x672xf32, #tpu.memory_space<vmem>>, vector<28x672xf32>,
    %c1_76 = arith.constant 1 : index
    %c1_77 = arith.constant 1 : index
    %c0_78 = arith.constant 0 : index
    %c0_79 = arith.constant 0 : index
    %78 = vector.load %arg1[%c1_76, %c1_77, %c0_78, %c0_79] : memref<2x2x28x672xf32, #tpu.memory_space<vmem>>, vector<1x1x28x672xf32>
    %79 = vector.shape_cast %78 : vector<1x1x28x672xf32> to vector<28x672xf32>
    %cst_80 = arith.constant 0.000000e+00 : f32
    %80 = vector.broadcast %cst_80 : f32 to vector<28x672xf32>
    %81 = arith.maximumf %79, %80 : vector<28x672xf32>
    %c8 = arith.constant 8 : index
    %c0_81 = arith.constant 0 : index
    %82 = vector.load %arg2[%c8, %c0_81] : memref<9x672xf32, #tpu.memory_space<vmem>>, vector<1x672xf32>
    %83 = vector.broadcast %82 : vector<1x672xf32> to vector<28x672xf32>
    %84 = arith.mulf %81, %83 : vector<28x672xf32>
    %c0_82 = arith.constant 0 : index
    %c0_83 = arith.constant 0 : index
    %85 = vector.load %arg3[%c0_82, %c0_83] : memref<28x672xf32, #tpu.memory_space<vmem>>, vector<28x672xf32>
    %86 = arith.addf %85, %84 : vector<28x672xf32>
    %c0_84 = arith.constant 0 : index
    %c0_85 = arith.constant 0 : index
    %87 = vector.load %arg3[%c0_84, %c0_85] : memref<28x672xf32, #tpu.memory_space<vmem>>, vector<28x672xf32>
    tpu.vector_store %arg3[%c0_84, %c0_85], %86 {strides = array<i32>} : memref<28x672xf32, #tpu.memory_space<vmem>>, vector<28x672xf32>,
    return
  }
  func.func @transform_0(%arg0: i32) -> (i32, i32, i32, i32) {
    %c0_i32 = arith.constant 0 : i32
    %c0_i32_0 = arith.constant 0 : i32
    %c0_i32_1 = arith.constant 0 : i32
    %c0_i32_2 = arith.constant 0 : i32
    %c0_i32_3 = arith.constant 0 : i32
    return %c0_i32, %c0_i32_0, %c0_i32_1, %c0_i32_2 : i32, i32, i32, i32
  }
  func.func @transform_1(%arg0: i32) -> (i32, i32) {
    %c0_i32 = arith.constant 0 : i32
    %c0_i32_0 = arith.constant 0 : i32
    %c0_i32_1 = arith.constant 0 : i32
    return %c0_i32, %c0_i32_0 : i32, i32
  }
  func.func @transform_2(%arg0: i32) -> (i32, i32) {
    %c0_i32 = arith.constant 0 : i32
    %c0_i32_0 = arith.constant 0 : i32
    %c0_i32_1 = arith.constant 0 : i32
    return %c0_i32, %c0_i32_0 : i32, i32
  }
}

</mosaic_0001>

<bundles_post_ra>
// kernel: tile.9
= control target key start
LH: loop header
LB: loop body
LE: loop exit
PB: predicated region body
PF: predicated region fallthrough
CT: control target
= control target key end

     0   :  { %vm61_vm0 = vcmask 1041409   ;;  %s196_s6 = smov 3  ;;  %vm204_vm1 = vcmask 64512   ;;  %vm65_vm2 = vcmask 1042434   ;;  %vm69_vm3 = vcmask 1043459   ;;  %s162_s13 = smov 3  ;;  %s2852_s0 = inlined_call_operand.vmem [shape: f32[9,28,24], index: 0, kind: input, shape index: {}]   ;;  %s2853_s1 = inlined_call_operand.vmem [shape: f32[9,672], index: 1, kind: output, shape index: {}]  }
   0x1   :  { %v1296_v0 = vld [vmem:[%s2852_s0 + $0x115] ss:$-16 sm:%s196_s6]   ;;  %vm73_vm4 = vcmask 1044484   ;;  %vm77_vm5 = vcmask 1045509   ;;  %vm81_vm6 = vcmask 1046534   ;;  %vm85_vm7 = vcmask 1047559  }
   0x2   :  { %v1297_v1 = vld [vmem:[%s2852_s0 + $0xd5] sm:$0x1]   ;;  %s215_s20 = smov 3  ;;  %s1584_s21 = smov 120   ;;  %v1302_v29 = vld [vmem:[%s2852_s0 + $0x38] sm:$0x4]  }
   0x3   :  { %v1298_v2 = vld [vmem:[%s2852_s0 + $0xf4] sm:$0x2]   ;;  %v1301_v28 = vld [vmem:[%s2852_s0 + $0x10a] ss:$-240 sm:%s215_s20]   ;;  %v1270_v40 = vld [vmem:[%s2852_s0 + $0x5] sm:$0x1]  }
   0x4   :  { %v203_v3 = vsel %vm61_vm0, %v1298_v2, %v1297_v1  ;;  %v1288_v4 = vld [vmem:[%s2852_s0 + $0x13] sm:$0x4]   ;;  %v1303_v30 = vld [vmem:[%s2852_s0 + $0x57] sm:$0x8]   ;;  %v220_v33 = vsel %vm65_vm2, %v1302_v29, %v1301_v28  ;;  %s1704_s5 = smov 3  ;;  %s1585_s2 = smov 112  }
   0x5   :  { %v205_v5 = vsel %vm204_vm1, %v203_v3, %v1296_v0  ;;  %v1287_v6 = vld [vmem:[%s2852_s0 + $0x115] ss:$-16 sm:%s162_s13]   ;;  %v1304_v34 = vld [vmem:[%s2852_s0 + $0x76] sm:$0x10]   ;;  %v224_v38 = vsel %vm69_vm3, %v1303_v30, %v220_v33  ;;  %v1323_v29 = vld [vmem:[%s2852_s0 + $0x85] sm:$0x20]  }
   0x6   :  { %v1289_v7 = vld [vmem:[%s2852_s0 + $0x32] sm:$0x8]   ;;  %206 = vrot.lane.b32.xlu0 %v205_v5, %s1584_s21  ;;  %v167_v8 = vsel %vm65_vm2, %v1288_v4, %v1287_v6  ;;  %v1305_v35 = vld [vmem:[%s2852_s0 + $0x95] sm:$0x20]   ;;  %v228_v42 = vsel %vm73_vm4, %v1304_v34, %v224_v38  ;;  %v1271_v43 = vld [vmem:[%s2852_s0 + $0x24] sm:$0x2]  }
   0x7   :  { %v1290_v9 = vld [vmem:[%s2852_s0 + $0x51] sm:$0x10]   ;;  %v171_v12 = vsel %vm69_vm3, %v1289_v7, %v167_v8  ;;  %v1306_v36 = vld [vmem:[%s2852_s0 + $0xb4] sm:$0x40]   ;;  %v1272_v44 = vld [vmem:[%s2852_s0 + $0x43] sm:$0x4]   ;;  %v232_v47 = vsel %vm77_vm5, %v1305_v35, %v228_v42  ;;  %v97_v48 = vsel %vm61_vm0, %v1271_v43, %v1270_v40 }
   0x8   :  { %v1291_v10 = vld [vmem:[%s2852_s0 + $0x70] sm:$0x20]   ;;  %v175_v16 = vsel %vm73_vm4, %v1290_v9, %v171_v12  ;;  %v1307_v39 = vld [vmem:[%s2852_s0 + $0xd3] sm:$0x80]   ;;  %v1273_v45 = vld [vmem:[%s2852_s0 + $0x62] sm:$0x8]   ;;  %v236_v52 = vsel %vm81_vm6, %v1306_v36, %v232_v47  ;;  %v101_v53 = vsel %vm65_vm2, %v1272_v44, %v97_v48 }
   0x9   :  { %v1292_v11 = vld [vmem:[%s2852_s0 + $0x8f] sm:$0x40]   ;;  %v179_v21 = vsel %vm77_vm5, %v1291_v10, %v175_v16  ;;  %v1274_v49 = vld [vmem:[%s2852_s0 + $0x81] sm:$0x10]   ;;  %v240_v57 = vsel %vm85_vm7, %v1307_v39, %v236_v52  ;;  %v105_v58 = vsel %vm69_vm3, %v1273_v45, %v101_v53  ;;  %v1310_v6 = vld [vmem:[%s2852_s0 + $0x1a] sm:$0x1]  }
   0xa   :  { %v1293_v13 = vld [vmem:[%s2852_s0 + $0xae] sm:$0x80]   ;;  %v183_v26 = vsel %vm81_vm6, %v1292_v11, %v179_v21  ;;  %v1275_v50 = vld [vmem:[%s2852_s0 + $0xa0] sm:$0x20]   ;;  %v109_v63 = vsel %vm73_vm4, %v1274_v49, %v105_v58  ;;  %v1311_v7 = vld [vmem:[%s2852_s0 + $0x39] sm:$0x2]  }
   0xb   :  { %v1261_v14 = vld [vmem:[%s2852_s0 + $0x15] sm:$0x1]   ;;  %v187_v31 = vsel %vm85_vm7, %v1293_v13, %v183_v26  ;;  %v1276_v51 = vld [vmem:[%s2852_s0 + $0xbf] sm:$0x40]   ;;  %v113_v4 = vsel %vm77_vm5, %v1275_v50, %v109_v63  ;;  %v1312_v8 = vld [vmem:[%s2852_s0 + $0x58] sm:$0x4]   ;;  %v253_v11 = vsel %vm61_vm0, %v1311_v7, %v1310_v6 }
   0xc   :  { %v1262_v15 = vld [vmem:[%s2852_s0 + $0x34] sm:$0x2]   ;;  %188 = vrot.lane.b32.xlu1 %v187_v31, %s1584_s21  ;;  %v1277_v54 = vld [vmem:[%s2852_s0 + $0xde] sm:$0x80]   ;;  %v117_v9 = vsel %vm81_vm6, %v1276_v51, %v113_v4  ;;  %v1313_v12 = vld [vmem:[%s2852_s0 + $0x77] sm:$0x8]  }
   0xd   :  { %v62_v17 = vsel %vm61_vm0, %v1262_v15, %v1261_v14  ;;  %v1263_v18 = vld [vmem:[%s2852_s0 + $0x53] sm:$0x4]   ;;  %v1278_v55 = vld [vmem:[%s2852_s0 + $0x5] sm:$0x1]   ;;  %v1314_v13 = vld [vmem:[%s2852_s0 + $0x96] sm:$0x10]   ;;  %v121_v15 = vsel %vm85_vm7, %v1277_v54, %v117_v9 }
   0xe   :  { %v1264_v19 = vld [vmem:[%s2852_s0 + $0x72] sm:$0x8]   ;;  %v66_v22 = vsel %vm65_vm2, %v1263_v18, %v62_v17  ;;  %v1279_v56 = vld [vmem:[%s2852_s0 + $0x24] sm:$0x2]   ;;  %v1315_v14 = vld [vmem:[%s2852_s0 + $0xb5] sm:$0x20]   ;;  %v257_v17 = vsel %vm65_vm2, %v1312_v8, %v253_v11 }
   0xf   :  { %v1265_v20 = vld [vmem:[%s2852_s0 + $0x91] sm:$0x10]   ;;  %v70_v27 = vsel %vm69_vm3, %v1264_v19, %v66_v22  ;;  %v131_v59 = vsel %vm61_vm0, %v1279_v56, %v1278_v55  ;;  %v1280_v60 = vld [vmem:[%s2852_s0 + $0x43] sm:$0x4]   ;;  %v1316_v18 = vld [vmem:[%s2852_s0 + $0xd4] sm:$0x40]   ;;  %v261_v22 = vsel %vm69_vm3, %v1313_v12, %v257_v17 }
  0x10   :  { %v1266_v23 = vld [vmem:[%s2852_s0 + $0xb0] sm:$0x20]   ;;  %v74_v32 = vsel %vm73_vm4, %v1265_v20, %v70_v27  ;;  %v1281_v61 = vld [vmem:[%s2852_s0 + $0x62] sm:$0x8]   ;;  %241 = vrot.lane.b32.xlu1 %v240_v57, %s1585_s2  ;;  %v135_v0 = vsel %vm65_vm2, %v1280_v60, %v131_v59  ;;  %v1317_v19 = vld [vmem:[%s2852_s0 + $0xf3] sm:$0x80]   ;;  %v265_v27 = vsel %vm73_vm4, %v1314_v13, %v261_v22 }
  0x11   :  { %v1267_v24 = vld [vmem:[%s2852_s0 + $0xcf] sm:$0x40]   ;;  %v78_v37 = vsel %vm77_vm5, %v1266_v23, %v74_v32  ;;  %v1282_v62 = vld [vmem:[%s2852_s0 + $0x81] sm:$0x10]   ;;  %v139_v5 = vsel %vm69_vm3, %v1281_v61, %v135_v0  ;;  %v1319_v20 = vld [vmem:[%s2852_s0 + $0xfa] ss:$-240 sm:%s1704_s5]   ;;  %v269_v32 = vsel %vm77_vm5, %v1315_v14, %v265_v27 }
  0x12   :  { %v1268_v25 = vld [vmem:[%s2852_s0 + $0xee] sm:$0x80]   ;;  %v82_v41 = vsel %vm81_vm6, %v1267_v24, %v78_v37  ;;  %v1283_v1 = vld [vmem:[%s2852_s0 + $0xa0] sm:$0x20]   ;;  %v143_v10 = vsel %vm73_vm4, %v1282_v62, %v139_v5  ;;  %v1320_v23 = vld [vmem:[%s2852_s0 + $0x28] sm:$0x4]   ;;  %v273_v37 = vsel %vm81_vm6, %v1316_v18, %v269_v32 }
  0x13   :  { %v86_v46 = vsel %vm85_vm7, %v1268_v25, %v82_v41  ;;  %v1284_v2 = vld [vmem:[%s2852_s0 + $0xbf] sm:$0x40]   ;;  %v147_v16 = vsel %vm77_vm5, %v1283_v1, %v143_v10  ;;  %v1321_v24 = vld [vmem:[%s2852_s0 + $0x47] sm:$0x8]   ;;  %v289_v28 = vsel %vm65_vm2, %v1320_v23, %v1319_v20  ;;  %v277_v43 = vsel %vm85_vm7, %v1317_v19, %v273_v37  ;;  %s353_s5 = smov 3  ;;  %s356_s3 = smov 3 }
  0x14   :  { %87 = vrot.lane.b32.xlu0 %v86_v46, %s1584_s21  ;;  %v1285_v3 = vld [vmem:[%s2852_s0 + $0xde] sm:$0x80]   ;;  %v151_v21 = vsel %vm81_vm6, %v1284_v2, %v147_v16  ;;  %v1322_v25 = vld [vmem:[%s2852_s0 + $0x66] sm:$0x10]   ;;  %v293_v33 = vsel %vm69_vm3, %v1321_v24, %v289_v28  ;;  %vm89_vm8 = vcmask 130048   ;;  %s447_s12 = smov 3 }
  0x15   :  { %v155_v26 = vsel %vm85_vm7, %v1285_v3, %v151_v21  ;;  %v1324_v30 = vld [vmem:[%s2852_s0 + $0xa4] sm:$0x40]   ;;  %v297_v38 = vsel %vm73_vm4, %v1322_v25, %v293_v33  ;;  %v1341_v51 = vld [vmem:[%s2852_s0 + $0x10f] sm:$0x1]   ;;  %v1353_v5 = vld [vmem:[%s2852_s0 + $0x4] sm:$0x1]  }
  0x16   :  { %v1325_v31 = vld [vmem:[%s2852_s0 + $0xc3] sm:$0x80]   ;;  %156 = vrot.lane.b32.xlu1 %v155_v26, %s1584_s21  ;;  %v301_v44 = vsel %vm77_vm5, %v1323_v29, %v297_v38  ;;  %v1342_v55 = vld [vmem:[%s2852_s0 + $0xe] sm:$0x2]   ;;  %v1354_v6 = vld [vmem:[%s2852_s0 + $0x23] sm:$0x2]  }
  0x17   :  { %v1328_v34 = vld [vmem:[%s2852_s0 + $0xa] sm:$0x1]   ;;  %v305_v48 = vsel %vm81_vm6, %v1324_v30, %v301_v44  ;;  %v1343_v56 = vld [vmem:[%s2852_s0 + $0x2d] sm:$0x4]   ;;  %v373_v58 = vsel %vm61_vm0, %v1342_v55, %v1341_v51  ;;  %v1355_v7 = vld [vmem:[%s2852_s0 + $0x42] sm:$0x4]   ;;  %v417_v10 = vsel %vm61_vm0, %v1354_v6, %v1353_v5 }
  0x18   :  { %122 = vrot.lane.b32.xlu0 %v121_v15, %s1584_s21  ;;  %v1329_v35 = vld [vmem:[%s2852_s0 + $0x29] sm:$0x2]   ;;  %v309_v52 = vsel %vm85_vm7, %v1325_v31, %v305_v48  ;;  %v1344_v59 = vld [vmem:[%s2852_s0 + $0x4c] sm:$0x8]   ;;  %v377_v63 = vsel %vm65_vm2, %v1343_v56, %v373_v58  ;;  %v1356_v11 = vld [vmem:[%s2852_s0 + $0x61] sm:$0x8]   ;;  %v421_v15 = vsel %vm65_vm2, %v1355_v7, %v417_v10 }
  0x19   :  { %v1330_v36 = vld [vmem:[%s2852_s0 + $0x48] sm:$0x4]   ;;  %v322_v39 = vsel %vm61_vm0, %v1329_v35, %v1328_v34  ;;  %v1345_v60 = vld [vmem:[%s2852_s0 + $0x6b] sm:$0x10]   ;;  %v381_v4 = vsel %vm69_vm3, %v1344_v59, %v377_v63  ;;  %v1357_v12 = vld [vmem:[%s2852_s0 + $0x80] sm:$0x10]   ;;  %v425_v19 = vsel %vm69_vm3, %v1356_v11, %v421_v15 }
  0x1a   :  { %v1331_v40 = vld [vmem:[%s2852_s0 + $0x67] sm:$0x8]   ;;  %v326_v45 = vsel %vm65_vm2, %v1330_v36, %v322_v39  ;;  %310 = vrot.lane.b32.xlu1 %v309_v52, %s1585_s2  ;;  %v1346_v0 = vld [vmem:[%s2852_s0 + $0x8a] sm:$0x20]   ;;  %v385_v8 = vsel %vm73_vm4, %v1345_v60, %v381_v4  ;;  %v1358_v13 = vld [vmem:[%s2852_s0 + $0x9f] sm:$0x20]   ;;  %v429_v24 = vsel %vm73_vm4, %v1357_v12, %v425_v19 }
  0x1b   :  { %v1332_v41 = vld [vmem:[%s2852_s0 + $0x86] sm:$0x10]   ;;  %v330_v49 = vsel %vm69_vm3, %v1331_v40, %v326_v45  ;;  %v1347_v1 = vld [vmem:[%s2852_s0 + $0xa9] sm:$0x40]   ;;  %v389_v14 = vsel %vm77_vm5, %v1346_v0, %v385_v8  ;;  %v1359_v16 = vld [vmem:[%s2852_s0 + $0xbe] sm:$0x40]   ;;  %v433_v28 = vsel %vm77_vm5, %v1358_v13, %v429_v24 }
  0x1c   :  { %v1333_v42 = vld [vmem:[%s2852_s0 + $0xa5] sm:$0x20]   ;;  %278 = vrot.lane.b32.xlu0 %v277_v43, %s1585_s2  ;;  %v334_v53 = vsel %vm73_vm4, %v1332_v41, %v330_v49  ;;  %v1348_v2 = vld [vmem:[%s2852_s0 + $0xc8] sm:$0x80]   ;;  %v1360_v17 = vld [vmem:[%s2852_s0 + $0xdd] sm:$0x80]   ;;  %v393_v18 = vsel %vm81_vm6, %v1347_v1, %v389_v14  ;;  %v437_v33 = vsel %vm81_vm6, %v1359_v16, %v433_v28 }
  0x1d   :  { %v1334_v46 = vld [vmem:[%s2852_s0 + $0xc4] sm:$0x40]   ;;  %v338_v57 = vsel %vm77_vm5, %v1333_v42, %v334_v53  ;;  %v1351_v9 = vld [vmem:[%s2852_s0 + $0xef] sm:$0x1]   ;;  %v1361_v20 = vld [vmem:[%s2852_s0 + $0x114] ss:$-16 sm:%s447_s12]   ;;  %v397_v23 = vsel %vm85_vm7, %v1348_v2, %v393_v18  ;;  %v441_v38 = vsel %vm85_vm7, %v1360_v17, %v437_v33 }
  0x1e   :  { %v1335_v47 = vld [vmem:[%s2852_s0 + $0xe3] sm:$0x80]   ;;  %v342_v61 = vsel %vm81_vm6, %v1334_v46, %v338_v57  ;;  %v1362_v21 = vld [vmem:[%s2852_s0 + $0x12] sm:$0x4]   ;;  %s1586_s23 = smov 104   ;;  %s1587_s18 = smov 96  }
  0x1f   :  { %v1337_v50 = vld [vmem:[%s2852_s0 + $0xea] ss:$48 sm:%s353_s5]   ;;  %v346_v3 = vsel %vm85_vm7, %v1335_v47, %v342_v61  ;;  %v1363_v22 = vld [vmem:[%s2852_s0 + $0x31] sm:$0x8]   ;;  %v452_v25 = vsel %vm65_vm2, %v1362_v21, %v1361_v20  ;;  %v1373_v35 = vld [vmem:[%s2852_s0 + $0x19] sm:$0x1]  }
  0x20   :  { %v1338_v54 = vld [vmem:[%s2852_s0 + $0x11a] ss:$-16 sm:%s356_s3]   ;;  %347 = vrot.lane.b32.xlu0 %v346_v3, %s1585_s2  ;;  %v1364_v26 = vld [vmem:[%s2852_s0 + $0x50] sm:$0x10]   ;;  %v456_v29 = vsel %vm69_vm3, %v1363_v22, %v452_v25  ;;  %s562_s29 = smov 3  ;;  %s1588_s19 = smov 88  }
  0x21   :  { %v359_v62 = vsel %vm89_vm8, %v1338_v54, %v1337_v50  ;;  %v1365_v27 = vld [vmem:[%s2852_s0 + $0x6f] sm:$0x20]   ;;  %v460_v34 = vsel %vm73_vm4, %v1364_v26, %v456_v29  ;;  %v1374_v36 = vld [vmem:[%s2852_s0 + $0x38] sm:$0x2]   ;;  %v1382_v51 = vld [vmem:[%s2852_s0 + $0x9] sm:$0x1]  }
  0x22   :  { %360 = vrot.lane.b32.xlu1 %v359_v62, %s1585_s2  ;;  %v1366_v30 = vld [vmem:[%s2852_s0 + $0x8e] sm:$0x40]   ;;  %v1375_v37 = vld [vmem:[%s2852_s0 + $0x57] sm:$0x4]   ;;  %v464_v39 = vsel %vm77_vm5, %v1365_v27, %v460_v34  ;;  %v496_v41 = vsel %vm61_vm0, %v1374_v36, %v1373_v35  ;;  %v1383_v52 = vld [vmem:[%s2852_s0 + $0x28] sm:$0x2]  }
  0x23   :  { %v1367_v31 = vld [vmem:[%s2852_s0 + $0xad] sm:$0x80]   ;;  %v1376_v42 = vld [vmem:[%s2852_s0 + $0x76] sm:$0x8]   ;;  %v468_v44 = vsel %vm81_vm6, %v1366_v30, %v464_v39  ;;  %v500_v45 = vsel %vm65_vm2, %v1375_v37, %v496_v41  ;;  %v1384_v53 = vld [vmem:[%s2852_s0 + $0x47] sm:$0x4]   ;;  %v531_v56 = vsel %vm61_vm0, %v1383_v52, %v1382_v51 }
  0x24   :  { %398 = vrot.lane.b32.xlu0 %v397_v23, %s1586_s23  ;;  %v1370_v32 = vld [vmem:[%s2852_s0 + $0xd4] sm:$0x1]   ;;  %v1377_v43 = vld [vmem:[%s2852_s0 + $0x95] sm:$0x10]   ;;  %v472_v49 = vsel %vm85_vm7, %v1367_v31, %v468_v44  ;;  %v504_v50 = vsel %vm69_vm3, %v1376_v42, %v500_v45  ;;  %v1385_v57 = vld [vmem:[%s2852_s0 + $0x66] sm:$0x8]   ;;  %v535_v60 = vsel %vm65_vm2, %v1384_v53, %v531_v56 }
  0x25   :  { %v1371_v40 = vld [vmem:[%s2852_s0 + $0xf3] sm:$0x2]   ;;  %v1378_v46 = vld [vmem:[%s2852_s0 + $0xb4] sm:$0x20]   ;;  %v508_v55 = vsel %vm73_vm4, %v1377_v43, %v504_v50  ;;  %v1386_v58 = vld [vmem:[%s2852_s0 + $0x85] sm:$0x10]   ;;  %v539_v0 = vsel %vm69_vm3, %v1385_v57, %v535_v60 }
  0x26   :  { %407 = vrot.lane.b32.xlu1 %v1351_v9, %s1586_s23  ;;  %v1379_v47 = vld [vmem:[%s2852_s0 + $0xd3] sm:$0x40]   ;;  %v485_v54 = vsel %vm61_vm0, %v1371_v40, %v1370_v32  ;;  %v512_v59 = vsel %vm77_vm5, %v1378_v46, %v508_v55  ;;  %v1387_v61 = vld [vmem:[%s2852_s0 + $0xa4] sm:$0x20]   ;;  %v1393_v1 = vld [vmem:[%s2852_s0 + $0x10e] sm:$0x1]   ;;  %v543_v5 = vsel %vm73_vm4, %v1386_v58, %v539_v0 }
  0x27   :  { %v1380_v48 = vld [vmem:[%s2852_s0 + $0xf2] sm:$0x80]   ;;  %v1388_v62 = vld [vmem:[%s2852_s0 + $0xc3] sm:$0x40]   ;;  %v516_v63 = vsel %vm81_vm6, %v1379_v47, %v512_v59  ;;  %v1394_v2 = vld [vmem:[%s2852_s0 + $0xd] sm:$0x2]   ;;  %v547_v11 = vsel %vm77_vm5, %v1387_v61, %v543_v5 }
  0x28   :  { %442 = vrot.lane.b32.xlu0 %v441_v38, %s1587_s18  ;;  %v1395_v3 = vld [vmem:[%s2852_s0 + $0x2c] sm:$0x4]   ;;  %v520_v4 = vsel %vm85_vm7, %v1380_v48, %v516_v63  ;;  %v1389_v6 = vld [vmem:[%s2852_s0 + $0xe2] sm:$0x80]   ;;  %v574_v8 = vsel %vm61_vm0, %v1394_v2, %v1393_v1  ;;  %v551_v16 = vsel %vm81_vm6, %v1388_v62, %v547_v11  ;;  %v1405_v18 = vld [vmem:[%s2852_s0 + $0x3] sm:$0x1]  }
  0x29   :  { %v1391_v7 = vld [vmem:[%s2852_s0 + $0x119] ss:$-16 sm:%s562_s29]   ;;  %v1396_v9 = vld [vmem:[%s2852_s0 + $0x4b] sm:$0x8]   ;;  %v578_v12 = vsel %vm65_vm2, %v1395_v3, %v574_v8  ;;  %v1406_v19 = vld [vmem:[%s2852_s0 + $0x22] sm:$0x2]   ;;  %v555_v20 = vsel %vm85_vm7, %v1389_v6, %v551_v16 }
  0x2a   :  { %473 = vrot.lane.b32.xlu1 %v472_v49, %s1587_s18  ;;  %v1397_v10 = vld [vmem:[%s2852_s0 + $0x6a] sm:$0x10]   ;;  %v582_v17 = vsel %vm69_vm3, %v1396_v9, %v578_v12  ;;  %v618_v22 = vsel %vm61_vm0, %v1406_v19, %v1405_v18  ;;  %v1407_v23 = vld [vmem:[%s2852_s0 + $0x41] sm:$0x4]   ;;  %s648_s13 = smov 3  ;;  %s1589_s30 = smov 80  }
  0x2b   :  { %v1398_v13 = vld [vmem:[%s2852_s0 + $0x89] sm:$0x20]   ;;  %v586_v21 = vsel %vm73_vm4, %v1397_v10, %v582_v17  ;;  %v1408_v24 = vld [vmem:[%s2852_s0 + $0x60] sm:$0x8]   ;;  %v622_v28 = vsel %vm65_vm2, %v1407_v23, %v618_v22  ;;  %v1414_v33 = vld [vmem:[%s2852_s0 + $0x11] sm:$0x4]  }
  0x2c   :  { %486 = vrot.lane.b32.xlu0 %v485_v54, %s1587_s18  ;;  %v1399_v14 = vld [vmem:[%s2852_s0 + $0xa8] sm:$0x40]   ;;  %v1409_v25 = vld [vmem:[%s2852_s0 + $0x7f] sm:$0x10]   ;;  %v590_v26 = vsel %vm77_vm5, %v1398_v13, %v586_v21  ;;  %v626_v32 = vsel %vm69_vm3, %v1408_v24, %v622_v28  ;;  %v1415_v34 = vld [vmem:[%s2852_s0 + $0x30] sm:$0x8]  }
  0x2d   :  { %v1400_v15 = vld [vmem:[%s2852_s0 + $0xc7] sm:$0x80]   ;;  %v1410_v29 = vld [vmem:[%s2852_s0 + $0x9e] sm:$0x20]   ;;  %v594_v31 = vsel %vm81_vm6, %v1399_v14, %v590_v26  ;;  %v630_v36 = vsel %vm73_vm4, %v1409_v25, %v626_v32  ;;  %v1416_v39 = vld [vmem:[%s2852_s0 + $0x4f] sm:$0x10]  }
  0x2e   :  { %521 = vrot.lane.b32.xlu1 %v520_v4, %s1588_s19  ;;  %v1403_v27 = vld [vmem:[%s2852_s0 + $0xee] sm:$0x1]   ;;  %v1411_v30 = vld [vmem:[%s2852_s0 + $0xbd] sm:$0x40]   ;;  %v598_v35 = vsel %vm85_vm7, %v1400_v15, %v594_v31  ;;  %v634_v40 = vsel %vm77_vm5, %v1410_v29, %v630_v36  ;;  %v1417_v42 = vld [vmem:[%s2852_s0 + $0x6e] sm:$0x20]  }
  0x2f   :  { %v1412_v37 = vld [vmem:[%s2852_s0 + $0xdc] sm:$0x80]   ;;  %v1418_v43 = vld [vmem:[%s2852_s0 + $0x8d] sm:$0x40]   ;;  %v638_v45 = vsel %vm81_vm6, %v1411_v30, %v634_v40  ;;  %v1425_v48 = vld [vmem:[%s2852_s0 + $0x18] sm:$0x1]  }
  0x30   :  { %556 = vrot.lane.b32.xlu0 %v555_v20, %s1588_s19  ;;  %v1413_v38 = vld [vmem:[%s2852_s0 + $0x113] ss:$-16 sm:%s648_s13]   ;;  %v1426_v49 = vld [vmem:[%s2852_s0 + $0x37] sm:$0x2]   ;;  %v642_v50 = vsel %vm85_vm7, %v1412_v37, %v638_v45  ;;  %s1590_s27 = smov 72   ;;  %s763_s9 = smov 3 }
  0x31   :  { %v653_v41 = vsel %vm65_vm2, %v1414_v33, %v1413_v38  ;;  %v1419_v44 = vld [vmem:[%s2852_s0 + $0xac] sm:$0x80]   ;;  %v697_v52 = vsel %vm61_vm0, %v1426_v49, %v1425_v48  ;;  %v1427_v53 = vld [vmem:[%s2852_s0 + $0x56] sm:$0x4]   ;;  %v1434_v63 = vld [vmem:[%s2852_s0 + $0x8] sm:$0x1]  }
  0x32   :  { %564 = vrot.lane.b32.xlu1 %v1391_v7, %s1588_s19  ;;  %v657_v46 = vsel %vm69_vm3, %v1415_v34, %v653_v41  ;;  %v1422_v47 = vld [vmem:[%s2852_s0 + $0xd3] sm:$0x1]   ;;  %v1428_v54 = vld [vmem:[%s2852_s0 + $0x75] sm:$0x8]   ;;  %v701_v58 = vsel %vm65_vm2, %v1427_v53, %v697_v52  ;;  %v1435_v0 = vld [vmem:[%s2852_s0 + $0x27] sm:$0x2]  }
  0x33   :  { %v661_v51 = vsel %vm73_vm4, %v1416_v39, %v657_v46  ;;  %v1429_v55 = vld [vmem:[%s2852_s0 + $0x94] sm:$0x10]   ;;  %v1423_v57 = vld [vmem:[%s2852_s0 + $0xf2] sm:$0x2]   ;;  %v705_v62 = vsel %vm69_vm3, %v1428_v54, %v701_v58  ;;  %v1436_v1 = vld [vmem:[%s2852_s0 + $0x46] sm:$0x4]   ;;  %v732_v5 = vsel %vm61_vm0, %v1435_v0, %v1434_v63 }
  0x34   :  { %599 = vrot.lane.b32.xlu0 %v598_v35, %s1589_s30  ;;  %v665_v56 = vsel %vm77_vm5, %v1417_v42, %v661_v51  ;;  %v1430_v59 = vld [vmem:[%s2852_s0 + $0xb3] sm:$0x20]   ;;  %v709_v3 = vsel %vm73_vm4, %v1429_v55, %v705_v62  ;;  %v1437_v6 = vld [vmem:[%s2852_s0 + $0x65] sm:$0x8]   ;;  %v686_v8 = vsel %vm61_vm0, %v1423_v57, %v1422_v47  ;;  %v736_v10 = vsel %vm65_vm2, %v1436_v1, %v732_v5  ;;  %v1445_v16 = vld [vmem:[%s2852_s0 + $0x10d] sm:$0x1]  }
  0x35   :  { %v1431_v60 = vld [vmem:[%s2852_s0 + $0xd2] sm:$0x40]   ;;  %v669_v61 = vsel %vm81_vm6, %v1418_v43, %v665_v56  ;;  %v1438_v7 = vld [vmem:[%s2852_s0 + $0x84] sm:$0x10]   ;;  %v713_v9 = vsel %vm77_vm5, %v1430_v59, %v709_v3  ;;  %v740_v14 = vsel %vm69_vm3, %v1437_v6, %v736_v10  ;;  %v1446_v17 = vld [vmem:[%s2852_s0 + $0xc] sm:$0x2]  }
  0x36   :  { %608 = vrot.lane.b32.xlu1 %v1403_v27, %s1589_s30  ;;  %v673_v2 = vsel %vm85_vm7, %v1419_v44, %v669_v61  ;;  %v1432_v4 = vld [vmem:[%s2852_s0 + $0xf1] sm:$0x80]   ;;  %v1439_v11 = vld [vmem:[%s2852_s0 + $0xa3] sm:$0x20]   ;;  %v717_v13 = vsel %vm81_vm6, %v1431_v60, %v713_v9  ;;  %v744_v19 = vsel %vm73_vm4, %v1438_v7, %v740_v14  ;;  %v775_v20 = vsel %vm61_vm0, %v1446_v17, %v1445_v16  ;;  %v1447_v21 = vld [vmem:[%s2852_s0 + $0x2b] sm:$0x4]  }
  0x37   :  { %v1440_v12 = vld [vmem:[%s2852_s0 + $0xc2] sm:$0x40]   ;;  %v721_v18 = vsel %vm85_vm7, %v1432_v4, %v717_v13  ;;  %v1448_v22 = vld [vmem:[%s2852_s0 + $0x4a] sm:$0x8]   ;;  %v748_v24 = vsel %vm77_vm5, %v1439_v11, %v744_v19  ;;  %v779_v26 = vsel %vm65_vm2, %v1447_v21, %v775_v20  ;;  %s1591_s28 = smov 64   ;;  %s849_s17 = smov 3 }
  0x38   :  { %643 = vrot.lane.b32.xlu0 %v642_v50, %s1590_s27  ;;  %v1441_v15 = vld [vmem:[%s2852_s0 + $0xe1] sm:$0x80]   ;;  %v1449_v23 = vld [vmem:[%s2852_s0 + $0x69] sm:$0x10]   ;;  %v752_v29 = vsel %vm81_vm6, %v1440_v12, %v748_v24  ;;  %v783_v30 = vsel %vm69_vm3, %v1448_v22, %v779_v26  ;;  %v1457_v32 = vld [vmem:[%s2852_s0 + $0x2] sm:$0x1]  }
  0x39   :  { %v1443_v25 = vld [vmem:[%s2852_s0 + $0x118] ss:$-16 sm:%s763_s9]   ;;  %v1450_v27 = vld [vmem:[%s2852_s0 + $0x88] sm:$0x20]   ;;  %v1458_v33 = vld [vmem:[%s2852_s0 + $0x21] sm:$0x2]   ;;  %v756_v34 = vsel %vm85_vm7, %v1441_v15, %v752_v29  ;;  %v787_v35 = vsel %vm73_vm4, %v1449_v23, %v783_v30 }
  0x3a   :  { %674 = vrot.lane.b32.xlu1 %v673_v2, %s1590_s27  ;;  %v1451_v28 = vld [vmem:[%s2852_s0 + $0xa7] sm:$0x40]   ;;  %v819_v36 = vsel %vm61_vm0, %v1458_v33, %v1457_v32  ;;  %v1459_v37 = vld [vmem:[%s2852_s0 + $0x40] sm:$0x4]   ;;  %v791_v40 = vsel %vm77_vm5, %v1450_v27, %v787_v35  ;;  %v1466_v47 = vld [vmem:[%s2852_s0 + $0x10] sm:$0x4]  }
  0x3b   :  { %v1452_v31 = vld [vmem:[%s2852_s0 + $0xc6] sm:$0x80]   ;;  %v1460_v38 = vld [vmem:[%s2852_s0 + $0x5f] sm:$0x8]   ;;  %v823_v41 = vsel %vm65_vm2, %v1459_v37, %v819_v36  ;;  %v795_v44 = vsel %vm81_vm6, %v1451_v28, %v791_v40  ;;  %v1467_v48 = vld [vmem:[%s2852_s0 + $0x2f] sm:$0x8]  }
  0x3c   :  { %687 = vrot.lane.b32.xlu0 %v686_v8, %s1590_s27  ;;  %v1461_v39 = vld [vmem:[%s2852_s0 + $0x7e] sm:$0x10]   ;;  %v1455_v45 = vld [vmem:[%s2852_s0 + $0xed] sm:$0x1]   ;;  %v827_v46 = vsel %vm69_vm3, %v1460_v38, %v823_v41  ;;  %v799_v49 = vsel %vm85_vm7, %v1452_v31, %v795_v44  ;;  %v1468_v52 = vld [vmem:[%s2852_s0 + $0x4e] sm:$0x10]  }
  0x3d   :  { %v1462_v42 = vld [vmem:[%s2852_s0 + $0x9d] sm:$0x20]   ;;  %v831_v50 = vsel %vm73_vm4, %v1461_v39, %v827_v46  ;;  %v1469_v56 = vld [vmem:[%s2852_s0 + $0x6d] sm:$0x20]   ;;  %v1477_v61 = vld [vmem:[%s2852_s0 + $0x17] sm:$0x1]  }
  0x3e   :  { %722 = vrot.lane.b32.xlu1 %v721_v18, %s1591_s28  ;;  %v1463_v43 = vld [vmem:[%s2852_s0 + $0xbc] sm:$0x40]   ;;  %v835_v53 = vsel %vm77_vm5, %v1462_v42, %v831_v50  ;;  %v1470_v59 = vld [vmem:[%s2852_s0 + $0x8c] sm:$0x40]   ;;  %s1592_s2 = smov 56   ;;  %s1593_s7 = smov 48  }
  0x3f   :  { %v1465_v51 = vld [vmem:[%s2852_s0 + $0x112] ss:$-16 sm:%s849_s17]   ;;  %v839_v57 = vsel %vm81_vm6, %v1463_v43, %v835_v53  ;;  %v1478_v0 = vld [vmem:[%s2852_s0 + $0x36] sm:$0x2]   ;;  %v1486_v12 = vld [vmem:[%s2852_s0 + $0x7] sm:$0x1]  }
  0x40   :  { %757 = vrot.lane.b32.xlu0 %v756_v34, %s1591_s28  ;;  %v1464_v54 = vld [vmem:[%s2852_s0 + $0xdb] sm:$0x80]   ;;  %v854_v55 = vsel %vm65_vm2, %v1466_v47, %v1465_v51  ;;  %v1471_v60 = vld [vmem:[%s2852_s0 + $0xab] sm:$0x80]   ;;  %v1479_v1 = vld [vmem:[%s2852_s0 + $0x55] sm:$0x4]   ;;  %v898_v6 = vsel %vm61_vm0, %v1478_v0, %v1477_v61 }
  0x41   :  { %v858_v58 = vsel %vm69_vm3, %v1467_v48, %v854_v55  ;;  %v1474_v63 = vld [vmem:[%s2852_s0 + $0xd2] sm:$0x1]   ;;  %v1480_v2 = vld [vmem:[%s2852_s0 + $0x74] sm:$0x8]   ;;  %v843_v3 = vsel %vm85_vm7, %v1464_v54, %v839_v57  ;;  %v902_v10 = vsel %vm65_vm2, %v1479_v1, %v898_v6  ;;  %v1487_v13 = vld [vmem:[%s2852_s0 + $0x26] sm:$0x2]  }
  0x42   :  { %765 = vrot.lane.b32.xlu1 %v1443_v25, %s1591_s28  ;;  %v862_v62 = vsel %vm73_vm4, %v1468_v52, %v858_v58  ;;  %v1475_v5 = vld [vmem:[%s2852_s0 + $0xf1] sm:$0x2]   ;;  %v1481_v7 = vld [vmem:[%s2852_s0 + $0x93] sm:$0x10]   ;;  %v906_v15 = vsel %vm69_vm3, %v1480_v2, %v902_v10  ;;  %v933_v16 = vsel %vm61_vm0, %v1487_v13, %v1486_v12  ;;  %v1488_v17 = vld [vmem:[%s2852_s0 + $0x45] sm:$0x4]  }
  0x43   :  { %v866_v4 = vsel %vm77_vm5, %v1469_v56, %v862_v62  ;;  %v1482_v8 = vld [vmem:[%s2852_s0 + $0xb2] sm:$0x20]   ;;  %v1489_v18 = vld [vmem:[%s2852_s0 + $0x64] sm:$0x8]   ;;  %v910_v20 = vsel %vm73_vm4, %v1481_v7, %v906_v15  ;;  %v937_v22 = vsel %vm65_vm2, %v1488_v17, %v933_v16  ;;  %s964_s11 = smov 3  ;;  %v887_v24 = vsel %vm61_vm0, %v1475_v5, %v1474_v63  ;;  %s1594_s6 = smov 40  }
  0x44   :  { %800 = vrot.lane.b32.xlu0 %v799_v49, %s1592_s2  ;;  %v870_v9 = vsel %vm81_vm6, %v1470_v59, %v866_v4  ;;  %v1483_v11 = vld [vmem:[%s2852_s0 + $0xd1] sm:$0x40]   ;;  %v1490_v19 = vld [vmem:[%s2852_s0 + $0x83] sm:$0x10]   ;;  %v914_v25 = vsel %vm77_vm5, %v1482_v8, %v910_v20  ;;  %v941_v26 = vsel %vm69_vm3, %v1489_v18, %v937_v22  ;;  %v1497_v29 = vld [vmem:[%s2852_s0 + $0x10c] sm:$0x1]  }
  0x45   :  { %v874_v14 = vsel %vm85_vm7, %v1471_v60, %v870_v9  ;;  %v1484_v21 = vld [vmem:[%s2852_s0 + $0xf0] sm:$0x80]   ;;  %v1491_v23 = vld [vmem:[%s2852_s0 + $0xa2] sm:$0x20]   ;;  %v918_v30 = vsel %vm81_vm6, %v1483_v11, %v914_v25  ;;  %v945_v31 = vsel %vm73_vm4, %v1490_v19, %v941_v26  ;;  %v1498_v32 = vld [vmem:[%s2852_s0 + $0xb] sm:$0x2]  }
  0x46   :  { %809 = vrot.lane.b32.xlu1 %v1455_v45, %s1592_s2  ;;  %v1492_v27 = vld [vmem:[%s2852_s0 + $0xc1] sm:$0x40]   ;;  %v1499_v33 = vld [vmem:[%s2852_s0 + $0x2a] sm:$0x4]   ;;  %v922_v35 = vsel %vm85_vm7, %v1484_v21, %v918_v30  ;;  %v949_v36 = vsel %vm77_vm5, %v1491_v23, %v945_v31  ;;  %v976_v37 = vsel %vm61_vm0, %v1498_v32, %v1497_v29  ;;  %v1509_v44 = vld [vmem:[%s2852_s0 + $0x1] sm:$0x1]  }
  0x47   :  { %v1493_v28 = vld [vmem:[%s2852_s0 + $0xe0] sm:$0x80]   ;;  %v1500_v34 = vld [vmem:[%s2852_s0 + $0x49] sm:$0x8]   ;;  %v953_v39 = vsel %vm81_vm6, %v1492_v27, %v949_v36  ;;  %v980_v41 = vsel %vm65_vm2, %v1499_v33, %v976_v37  ;;  %v1510_v47 = vld [vmem:[%s2852_s0 + $0x20] sm:$0x2]  }
  0x48   :  { %844 = vrot.lane.b32.xlu0 %v843_v3, %s1593_s7  ;;  %v1501_v38 = vld [vmem:[%s2852_s0 + $0x68] sm:$0x10]   ;;  %v1495_v40 = vld [vmem:[%s2852_s0 + $0x117] ss:$-16 sm:%s964_s11]   ;;  %v957_v45 = vsel %vm85_vm7, %v1493_v28, %v953_v39  ;;  %v984_v46 = vsel %vm69_vm3, %v1500_v34, %v980_v41  ;;  %v1020_v52 = vsel %vm61_vm0, %v1510_v47, %v1509_v44  ;;  %s1050_s19 = smov 3  ;;  %s2454_s10 = smov 3 }
  0x49   :  { %v1502_v42 = vld [vmem:[%s2852_s0 + $0x87] sm:$0x20]   ;;  %v1511_v48 = vld [vmem:[%s2852_s0 + $0x3f] sm:$0x4]   ;;  %v988_v50 = vsel %vm73_vm4, %v1501_v38, %v984_v46  ;;  %v1518_v58 = vld [vmem:[%s2852_s0 + $0xf] sm:$0x4]  }
  0x4a   :  { %875 = vrot.lane.b32.xlu1 %v874_v14, %s1593_s7  ;;  %v1503_v43 = vld [vmem:[%s2852_s0 + $0xa6] sm:$0x40]   ;;  %v1512_v49 = vld [vmem:[%s2852_s0 + $0x5e] sm:$0x8]   ;;  %v992_v55 = vsel %vm77_vm5, %v1502_v42, %v988_v50  ;;  %v1024_v56 = vsel %vm65_vm2, %v1511_v48, %v1020_v52  ;;  %v1519_v63 = vld [vmem:[%s2852_s0 + $0x2e] sm:$0x8]  }
  0x4b   :  { %v1504_v51 = vld [vmem:[%s2852_s0 + $0xc5] sm:$0x80]   ;;  %v1513_v53 = vld [vmem:[%s2852_s0 + $0x7d] sm:$0x10]   ;;  %v996_v59 = vsel %vm81_vm6, %v1503_v43, %v992_v55  ;;  %v1028_v61 = vsel %vm69_vm3, %v1512_v49, %v1024_v56  ;;  %v1520_v4 = vld [vmem:[%s2852_s0 + $0x4d] sm:$0x10]  }
  0x4c   :  { %888 = vrot.lane.b32.xlu0 %v887_v24, %s1593_s7  ;;  %v1514_v54 = vld [vmem:[%s2852_s0 + $0x9c] sm:$0x20]   ;;  %v1507_v60 = vld [vmem:[%s2852_s0 + $0xec] sm:$0x1]   ;;  %v1000_v0 = vsel %vm85_vm7, %v1504_v51, %v996_v59  ;;  %v1032_v1 = vsel %vm73_vm4, %v1513_v53, %v1028_v61  ;;  %v1521_v5 = vld [vmem:[%s2852_s0 + $0x6c] sm:$0x20]  }
  0x4d   :  { %v1515_v57 = vld [vmem:[%s2852_s0 + $0xbb] sm:$0x40]   ;;  %v1036_v6 = vsel %vm77_vm5, %v1514_v54, %v1032_v1  ;;  %v1522_v8 = vld [vmem:[%s2852_s0 + $0x8b] sm:$0x40]   ;;  %v1529_v12 = vld [vmem:[%s2852_s0 + $0x16] sm:$0x1]  }
  0x4e   :  { %923 = vrot.lane.b32.xlu1 %v922_v35, %s1594_s6  ;;  %v1517_v62 = vld [vmem:[%s2852_s0 + $0x111] ss:$-16 sm:%s1050_s19]   ;;  %v1040_v10 = vsel %vm81_vm6, %v1515_v57, %v1036_v6  ;;  %v1530_v13 = vld [vmem:[%s2852_s0 + $0x35] sm:$0x2]   ;;  %s1595_s16 = smov 32   ;;  %s1596_s15 = smov 24  }
  0x4f   :  { %v1516_v2 = vld [vmem:[%s2852_s0 + $0xda] sm:$0x80]   ;;  %v1055_v3 = vsel %vm65_vm2, %v1518_v58, %v1517_v62  ;;  %v1523_v9 = vld [vmem:[%s2852_s0 + $0xaa] sm:$0x80]   ;;  %v1531_v14 = vld [vmem:[%s2852_s0 + $0x54] sm:$0x4]   ;;  %v1099_v18 = vsel %vm61_vm0, %v1530_v13, %v1529_v12 }
  0x50   :  { %958 = vrot.lane.b32.xlu0 %v957_v45, %s1594_s6  ;;  %v1059_v7 = vsel %vm69_vm3, %v1519_v63, %v1055_v3  ;;  %v1526_v16 = vld [vmem:[%s2852_s0 + $0xd1] sm:$0x1]   ;;  %v1532_v19 = vld [vmem:[%s2852_s0 + $0x73] sm:$0x8]   ;;  %v1044_v21 = vsel %vm85_vm7, %v1516_v2, %v1040_v10  ;;  %v1103_v23 = vsel %vm65_vm2, %v1531_v14, %v1099_v18  ;;  %v1538_v26 = vld [vmem:[%s2852_s0 + $0x6] sm:$0x1]  }
  0x51   :  { %v1063_v11 = vsel %vm73_vm4, %v1520_v4, %v1059_v7  ;;  %v1527_v17 = vld [vmem:[%s2852_s0 + $0xf0] sm:$0x2]   ;;  %v1533_v20 = vld [vmem:[%s2852_s0 + $0x92] sm:$0x10]   ;;  %v1107_v28 = vsel %vm69_vm3, %v1532_v19, %v1103_v23  ;;  %v1539_v29 = vld [vmem:[%s2852_s0 + $0x25] sm:$0x2]  }
  0x52   :  { %966 = vrot.lane.b32.xlu1 %v1495_v40, %s1594_s6  ;;  %v1067_v15 = vsel %vm77_vm5, %v1521_v5, %v1063_v11  ;;  %v1534_v24 = vld [vmem:[%s2852_s0 + $0xb1] sm:$0x20]   ;;  %v1540_v30 = vld [vmem:[%s2852_s0 + $0x44] sm:$0x4]   ;;  %v1111_v32 = vsel %vm73_vm4, %v1533_v20, %v1107_v28  ;;  %v1134_v34 = vsel %vm61_vm0, %v1539_v29, %v1538_v26  ;;  %s1207_s20 = smov 3  ;;  %v1088_v41 = vsel %vm61_vm0, %v1527_v17, %v1526_v16  ;;  %s1165_s22 = smov 3 }
  0x53   :  { %v1071_v22 = vsel %vm81_vm6, %v1522_v8, %v1067_v15  ;;  %v1535_v25 = vld [vmem:[%s2852_s0 + $0xd0] sm:$0x40]   ;;  %v1541_v31 = vld [vmem:[%s2852_s0 + $0x63] sm:$0x8]   ;;  %v1115_v37 = vsel %vm77_vm5, %v1534_v24, %v1111_v32  ;;  %v1138_v38 = vsel %vm65_vm2, %v1540_v30, %v1134_v34  ;;  %v1549_v44 = vld [vmem:[%s2852_s0 + $0x10b] ss:$-240 sm:%s2454_s10]  }
  0x54   :  { %1001 = vrot.lane.b32.xlu0 %v1000_v0, %s1595_s16  ;;  %v1075_v27 = vsel %vm85_vm7, %v1523_v9, %v1071_v22  ;;  %v1536_v33 = vld [vmem:[%s2852_s0 + $0xef] sm:$0x80]   ;;  %v1542_v35 = vld [vmem:[%s2852_s0 + $0x82] sm:$0x10]   ;;  %v1119_v42 = vsel %vm81_vm6, %v1535_v25, %v1115_v37  ;;  %v1142_v43 = vsel %vm69_vm3, %v1541_v31, %v1138_v38  ;;  %v1550_v45 = vld [vmem:[%s2852_s0 + $0x39] sm:$0x4]  }
  0x55   :  { %v1543_v36 = vld [vmem:[%s2852_s0 + $0xa1] sm:$0x20]   ;;  %v1123_v46 = vsel %vm85_vm7, %v1536_v33, %v1119_v42  ;;  %v1146_v47 = vsel %vm73_vm4, %v1542_v35, %v1142_v43  ;;  %v1178_v48 = vsel %vm65_vm2, %v1550_v45, %v1549_v44  ;;  %v1551_v49 = vld [vmem:[%s2852_s0 + $0x58] sm:$0x8]   ;;  %v1559_v59 = vld [vmem:[%s2852_s0 + $0x29] sm:$0x4]  }
  0x56   :  { %1010 = vrot.lane.b32.xlu1 %v1507_v60, %s1595_s16  ;;  %v1544_v39 = vld [vmem:[%s2852_s0 + $0xc0] sm:$0x40]   ;;  %v1552_v50 = vld [vmem:[%s2852_s0 + $0x77] sm:$0x10]   ;;  %v1150_v52 = vsel %vm77_vm5, %v1543_v36, %v1146_v47  ;;  %v1182_v53 = vsel %vm69_vm3, %v1551_v49, %v1178_v48  ;;  %v1560_v60 = vld [vmem:[%s2852_s0 + $0x48] sm:$0x8]  }
  0x57   :  { %v1545_v40 = vld [vmem:[%s2852_s0 + $0xdf] sm:$0x80]   ;;  %v1553_v51 = vld [vmem:[%s2852_s0 + $0x96] sm:$0x20]   ;;  %v1154_v56 = vsel %vm81_vm6, %v1544_v39, %v1150_v52  ;;  %v1186_v58 = vsel %vm73_vm4, %v1552_v50, %v1182_v53  ;;  %v1561_v61 = vld [vmem:[%s2852_s0 + $0x67] sm:$0x10]  }
  0x58   :  { %1045 = vrot.lane.b32.xlu0 %v1044_v21, %s1596_s15  ;;  %v1554_v54 = vld [vmem:[%s2852_s0 + $0xb5] sm:$0x40]   ;;  %v1547_v57 = vld [vmem:[%s2852_s0 + $0x116] ss:$-16 sm:%s1165_s22]   ;;  %v1158_v62 = vsel %vm85_vm7, %v1545_v40, %v1154_v56  ;;  %v1190_v63 = vsel %vm77_vm5, %v1553_v51, %v1186_v58  ;;  %vm6_vm9 = vcmask 1043458   ;;  %s25_s25 = smov 3 }
  0x59   :  { %v1558_v55 = vld [vmem:[%s2852_s0 + $0xfb] ss:$-240 sm:%s1207_s20]   ;;  %s2576_s20 = smov 3  ;;  %v1194_v3 = vsel %vm81_vm6, %v1554_v54, %v1190_v63  ;;  %s28_s26 = smov 12  ;;  %vm10_vm10 = vcmask 1045508   ;;  %vm14_vm11 = vcmask 1047558  }
  0x5a   :  { %1076 = vrot.lane.b32.xlu1 %v1075_v27, %s1596_s15  ;;  %v1555_v0 = vld [vmem:[%s2852_s0 + $0xd4] sm:$0x80]   ;;  %v1212_v1 = vsel %vm65_vm2, %v1559_v59, %v1558_v55  ;;  %v1562_v2 = vld [vmem:[%s2852_s0 + $0x86] sm:$0x20]   ;;  %s33_s27 = smov 48  ;;  %s38_s28 = smov 192 }
  0x5b   :  { %v1216_v4 = vsel %vm69_vm3, %v1560_v60, %v1212_v1  ;;  %v1563_v5 = vld [vmem:[%s2852_s0 + $0xa5] sm:$0x40]   ;;  %v1251_v8 = vld [vmem:[%s2852_s0 + $0x80] ss:$16 sm:%s25_s25]   ;;  %s2_s4 = smov 3  ;;  %s4_s6 = smov 12  ;;  %v1198_v11 = vsel %vm85_vm7, %v1555_v0, %v1194_v3 }
  0x5c   :  { %1089 = vrot.lane.b32.xlu0 %v1088_v41, %s1596_s15  ;;  %s1597_s15 = smov 16   ;;  %v1564_v6 = vld [vmem:[%s2852_s0 + $0xc4] sm:$0x80]   ;;  %v1220_v7 = vsel %vm73_vm4, %v1561_v61, %v1216_v4  ;;  %v1252_v10 = vld [vmem:[%s2852_s0 + $0x80] ss:$16 sm:%s28_s26]   ;;  %vm16_vm12 = vcmask 195584  }
  0x5d   :  { %v1224_v9 = vsel %vm77_vm5, %v1562_v2, %v1220_v7  ;;  %v31_v13 = vsel %vm6_vm9, %v1252_v10, %v1251_v8  ;;  %v1253_v14 = vld [vmem:[%s2852_s0 + $0x80] ss:$16 sm:%s33_s27]   ;;  %s8_s2 = smov 48  ;;  %s12_s9 = smov 192  ;;  %v1567_v19 = vld [vmem:[%s2852_s0 + $0xeb] ss:$48 sm:%s2576_s20]  }
  0x5e   :  { %1124 = vrot.lane.b32.xlu1 %v1123_v46, %s1597_s15  ;;  %v1228_v12 = vsel %vm81_vm6, %v1563_v5, %v1224_v9  ;;  %v36_v16 = vsel %vm10_vm10, %v1253_v14, %v31_v13  ;;  %v1254_v17 = vld [vmem:[%s2852_s0 + $0x80] ss:$16 sm:%s38_s28]   ;;  %s52_s21 = smov 3  ;;  %s1598_s22 = smov 8   ;;  %vm124_vm13 = vcmask 1048512   ;;  %vm280_vm14 = vcmask 1048448  }
  0x5f   :  { %v1232_v15 = vsel %vm85_vm7, %v1564_v6, %v1228_v12  ;;  %v3_v18 = vld [vmem:[%s2852_s0] ss:$16 sm:%s2_s4]   ;;  %v41_v20 = vsel %vm14_vm11, %v1254_v17, %v36_v16  ;;  %vm400_vm15 = vcmask 1048384   ;;  %vm444_vm0 = vcmask 982784  }
  0x60   :  { %1159 = vrot.lane.b32.xlu0 %v1158_v62, %s1597_s15  ;;  %v5_v21 = vld [vmem:[%s2852_s0] ss:$16 sm:%s4_s6]   ;;  %1255 = vst.msk [vmem:[%s2853_s1 + $0x4] ss:$24 sm:$0x3] %vm16_vm12, %v41_v20   ;;  %vm601_vm2 = vcmask 851584  }
  0x61   :  { %v9_v22 = vld [vmem:[%s2852_s0] ss:$16 sm:%s8_s2]   ;;  %1256 = vst.msk [vmem:[%s2853_s1 - $0x2b] ss:$24 sm:$0xc] %vm16_vm12, %v41_v20   ;;  %v7_v23 = vsel %vm6_vm9, %v5_v21, %v3_v18  ;;  %vm645_vm3 = vcmask 785984  }
  0x62   :  { %1167 = vrot.lane.b32.xlu1 %v1547_v57, %s1597_s15  ;;  %1257 = vst.msk [vmem:[%s2853_s1 - $0x5a] ss:$24 sm:$0x30] %vm16_vm12, %v41_v20   ;;  %1258 = vst.msk [vmem:[%s2853_s1 - $0x89] ss:$24 sm:$0xc0] %vm16_vm12, %v41_v20   ;;  %v11_v25 = vsel %vm10_vm10, %v9_v22, %v7_v23 }
  0x63   :  { %v13_v24 = vld [vmem:[%s2852_s0] ss:$16 sm:%s12_s9]   ;;  %vm724_vm4 = vcmask 720384   ;;  %vm802_vm5 = vcmask 654784   ;;  %vm846_vm6 = vcmask 589184   ;;  %vm925_vm7 = vcmask 523584  }
  0x64   :  { %1199 = vrot.lane.b32.xlu0 %v1198_v11, %s1598_s22  ;;  %v1259_v26 = vld [vmem:[%s2852_s0 + $0x100] ss:$16 sm:%s52_s21]   ;;  %v15_v27 = vsel %vm14_vm11, %v13_v24, %v11_v25  ;;  %vm1047_vm9 = vcmask 392384   ;;  %vm1126_vm10 = vcmask 326784   ;;  %vm1201_vm11 = vcmask 261184  }
  0x65   :  { %1260 = vst.msk [vmem:[%s2853_s1 + $0x30] ss:$24 sm:$0x3] %vm16_vm12, %v1259_v26   ;;  %17 = vst.msk [vmem:[%s2853_s1] ss:$24 sm:$0x3] %vm16_vm12, %v15_v27  }
  0x66   :  { %1233 = vrot.lane.b32.xlu1 %v1232_v15, %s1598_s22  ;;  %1248 = vst.msk [vmem:[%s2853_s1 - $0x2f] ss:$24 sm:$0xc] %vm16_vm12, %v15_v27   ;;  %1249 = vst.msk [vmem:[%s2853_s1 - $0x5e] ss:$24 sm:$0x30] %vm16_vm12, %v15_v27  }
  0x67   :  { %1250 = vst.msk [vmem:[%s2853_s1 - $0x8d] ss:$24 sm:$0xc0] %vm16_vm12, %v15_v27  }
  0x68   :  { %1243 = vrot.lane.b32.xlu0 %v1567_v19, %s1598_s22 }
  0x78   :  { %v207_v28 = vpop.permute.xlu0 %206  }
  0x79   :  { %1299 = vst.msk [vmem:[%s2853_s1 + $0x50] ss:$-24 sm:$0x3] %vm89_vm8, %v207_v28  }
  0x7a   :  { %1300 = vst.msk [vmem:[%s2853_s1 + $0x1e] sm:$0x3] %vm124_vm13, %v207_v28  }
  0x7e   :  { %v189_v29 = vpop.permute.xlu1 %188  }
  0x7f   :  { %1294 = vst.msk [vmem:[%s2853_s1 + $0x48] ss:$-24 sm:$0x7] %vm124_vm13, %v189_v29   ;;  %1295 = vst.msk [vmem:[%s2853_s1 + $0x16] sm:$0xf8] %vm124_vm13, %v189_v29  }
  0x82   :  { %v242_v31 = vpop.permute.xlu1 %241  }
  0x83   :  { %1308 = vst.msk [vmem:[%s2853_s1 + $0x40] ss:$-24 sm:$0x3] %vm204_vm1, %v242_v31   ;;  %1309 = vst.msk [vmem:[%s2853_s1 + $0x27] sm:$0xfc] %vm204_vm1, %v242_v31  }
  0x86   :  { %v88_v30 = vpop.permute.xlu0 %87  }
  0x87   :  { %1269 = vst.msk [vmem:[%s2853_s1 + $0x20] sm:$0xff] %vm89_vm8, %v88_v30  }
  0x88   :  { %v157_v33 = vpop.permute.xlu1 %156  }
  0x89   :  { %1286 = vst.msk [vmem:[%s2853_s1 + $0x8] sm:$0xff] %vm89_vm8, %v157_v33   ;;  %vm1003_vm8 = vcmask 457984  }
  0x8a   :  { %v123_v32 = vpop.permute.xlu0 %122  }
  0x8b   :  { %125 = vst.msk [vmem:[%s2853_s1] sm:$0xff] %vm124_vm13, %v123_v32  }
  0x8c   :  { %v311_v35 = vpop.permute.xlu1 %310  }
  0x8d   :  { %1326 = vst.msk [vmem:[%s2853_s1 + $0x2f] ss:$-31 sm:$0x3] %vm204_vm1, %v311_v35   ;;  %1327 = vst.msk [vmem:[%s2853_s1 + $0xf] sm:$0xfc] %vm204_vm1, %v311_v35  }
  0x8e   :  { %v279_v34 = vpop.permute.xlu0 %278  }
  0x8f   :  { %1318 = vst.msk [vmem:[%s2853_s1 + $0x20] sm:$0xff] %vm280_vm14, %v279_v34  }
  0x92   :  { %v348_v36 = vpop.permute.xlu0 %347  }
  0x93   :  { %1336 = vst.msk [vmem:[%s2853_s1 + $0x8] sm:$0xff] %vm280_vm14, %v348_v36  }
  0x94   :  { %v361_v37 = vpop.permute.xlu1 %360  }
  0x95   :  { %1339 = vst.msk [vmem:[%s2853_s1 + $0x17] ss:$65 sm:$0x3] %vm204_vm1, %v361_v37   ;;  %vm523_vm1 = vcmask 917184  }
  0x96   :  { %1340 = vst.msk [vmem:[%s2853_s1 + $0x50] ss:$-24 sm:$0x3] %vm280_vm14, %v361_v37   ;;  %v399_v38 = vpop.permute.xlu0 %398  }
  0x97   :  { %1349 = vst.msk [vmem:[%s2853_s1 + $0x40] ss:$-48 sm:$0x3] %vm400_vm15, %v399_v38   ;;  %1350 = vst.msk [vmem:[%s2853_s1 + $0xf] sm:$0xfc] %vm400_vm15, %v399_v38  }
  0x98   :  { %v408_v39 = vpop.permute.xlu1 %407  }
  0x99   :  { %1352 = vst.msk [vmem:[%s2853_s1 + $0x17] sm:$0x1] %vm400_vm15, %v408_v39  }
  0x9a   :  { %v443_v40 = vpop.permute.xlu0 %442  }
  0x9b   :  { %445 = vst.msk [vmem:[%s2853_s1] sm:$0xff] %vm444_vm0, %v443_v40  }
  0x9c   :  { %v474_v41 = vpop.permute.xlu1 %473  }
  0x9d   :  { %1368 = vst.msk [vmem:[%s2853_s1 + $0x48] ss:$-24 sm:$0x7] %vm444_vm0, %v474_v41   ;;  %1369 = vst.msk [vmem:[%s2853_s1 + $0x16] sm:$0xf8] %vm444_vm0, %v474_v41  }
  0x9e   :  { %v487_v42 = vpop.permute.xlu0 %486  }
  0x9f   :  { %1372 = vst.msk [vmem:[%s2853_s1 + $0x1e] sm:$0x3] %vm444_vm0, %v487_v42  }
  0xa0   :  { %v522_v43 = vpop.permute.xlu1 %521  }
  0xa1   :  { %1381 = vst.msk [vmem:[%s2853_s1 + $0x20] sm:$0xff] %vm523_vm1, %v522_v43  }
  0xa2   :  { %v557_v44 = vpop.permute.xlu0 %556  }
  0xa3   :  { %1390 = vst.msk [vmem:[%s2853_s1 + $0x8] sm:$0xff] %vm523_vm1, %v557_v44  }
  0xa4   :  { %v565_v45 = vpop.permute.xlu1 %564  }
  0xa5   :  { %1392 = vst.msk [vmem:[%s2853_s1 + $0x50] ss:$-24 sm:$0x3] %vm523_vm1, %v565_v45  }
  0xa6   :  { %v600_v46 = vpop.permute.xlu0 %599  }
  0xa7   :  { %1401 = vst.msk [vmem:[%s2853_s1 + $0x40] ss:$-48 sm:$0x3] %vm601_vm2, %v600_v46   ;;  %1402 = vst.msk [vmem:[%s2853_s1 + $0xf] sm:$0xfc] %vm601_vm2, %v600_v46  }
  0xa8   :  { %v609_v47 = vpop.permute.xlu1 %608  }
  0xa9   :  { %1404 = vst.msk [vmem:[%s2853_s1 + $0x17] sm:$0x1] %vm601_vm2, %v609_v47  }
  0xaa   :  { %v644_v48 = vpop.permute.xlu0 %643  }
  0xab   :  { %646 = vst.msk [vmem:[%s2853_s1] sm:$0xff] %vm645_vm3, %v644_v48  }
  0xac   :  { %v675_v49 = vpop.permute.xlu1 %674  }
  0xad   :  { %1420 = vst.msk [vmem:[%s2853_s1 + $0x48] ss:$-24 sm:$0x7] %vm645_vm3, %v675_v49   ;;  %1421 = vst.msk [vmem:[%s2853_s1 + $0x16] sm:$0xf8] %vm645_vm3, %v675_v49  }
  0xae   :  { %v688_v50 = vpop.permute.xlu0 %687  }
  0xaf   :  { %1424 = vst.msk [vmem:[%s2853_s1 + $0x1e] sm:$0x3] %vm645_vm3, %v688_v50  }
  0xb0   :  { %v723_v51 = vpop.permute.xlu1 %722  }
  0xb1   :  { %1433 = vst.msk [vmem:[%s2853_s1 + $0x20] sm:$0xff] %vm724_vm4, %v723_v51  }
  0xb2   :  { %v758_v52 = vpop.permute.xlu0 %757  }
  0xb3   :  { %1442 = vst.msk [vmem:[%s2853_s1 + $0x8] sm:$0xff] %vm724_vm4, %v758_v52  }
  0xb4   :  { %v766_v53 = vpop.permute.xlu1 %765  }
  0xb5   :  { %1444 = vst.msk [vmem:[%s2853_s1 + $0x50] ss:$-24 sm:$0x3] %vm724_vm4, %v766_v53  }
  0xb6   :  { %v801_v54 = vpop.permute.xlu0 %800  }
  0xb7   :  { %1453 = vst.msk [vmem:[%s2853_s1 + $0x40] ss:$-48 sm:$0x3] %vm802_vm5, %v801_v54   ;;  %1454 = vst.msk [vmem:[%s2853_s1 + $0xf] sm:$0xfc] %vm802_vm5, %v801_v54  }
  0xb8   :  { %v810_v55 = vpop.permute.xlu1 %809  }
  0xb9   :  { %1456 = vst.msk [vmem:[%s2853_s1 + $0x17] sm:$0x1] %vm802_vm5, %v810_v55  }
  0xba   :  { %v845_v56 = vpop.permute.xlu0 %844  }
  0xbb   :  { %847 = vst.msk [vmem:[%s2853_s1] sm:$0xff] %vm846_vm6, %v845_v56  }
  0xbc   :  { %v876_v57 = vpop.permute.xlu1 %875  }
  0xbd   :  { %1472 = vst.msk [vmem:[%s2853_s1 + $0x48] ss:$-24 sm:$0x7] %vm846_vm6, %v876_v57   ;;  %1473 = vst.msk [vmem:[%s2853_s1 + $0x16] sm:$0xf8] %vm846_vm6, %v876_v57  }
  0xbe   :  { %v889_v58 = vpop.permute.xlu0 %888  }
  0xbf   :  { %1476 = vst.msk [vmem:[%s2853_s1 + $0x1e] sm:$0x3] %vm846_vm6, %v889_v58  }
  0xc0   :  { %v924_v59 = vpop.permute.xlu1 %923  }
  0xc1   :  { %1485 = vst.msk [vmem:[%s2853_s1 + $0x20] sm:$0xff] %vm925_vm7, %v924_v59  }
  0xc2   :  { %v959_v60 = vpop.permute.xlu0 %958  }
  0xc3   :  { %1494 = vst.msk [vmem:[%s2853_s1 + $0x8] sm:$0xff] %vm925_vm7, %v959_v60  }
  0xc4   :  { %v967_v61 = vpop.permute.xlu1 %966  }
  0xc5   :  { %1496 = vst.msk [vmem:[%s2853_s1 + $0x50] ss:$-24 sm:$0x3] %vm925_vm7, %v967_v61  }
  0xc6   :  { %v1002_v62 = vpop.permute.xlu0 %1001  }
  0xc7   :  { %1505 = vst.msk [vmem:[%s2853_s1 + $0x40] ss:$-48 sm:$0x3] %vm1003_vm8, %v1002_v62   ;;  %1506 = vst.msk [vmem:[%s2853_s1 + $0xf] sm:$0xfc] %vm1003_vm8, %v1002_v62  }
  0xc8   :  { %v1011_v63 = vpop.permute.xlu1 %1010  }
  0xc9   :  { %1508 = vst.msk [vmem:[%s2853_s1 + $0x17] sm:$0x1] %vm1003_vm8, %v1011_v63  }
  0xca   :  { %v1046_v0 = vpop.permute.xlu0 %1045  }
  0xcb   :  { %1048 = vst.msk [vmem:[%s2853_s1] sm:$0xff] %vm1047_vm9, %v1046_v0  }
  0xcc   :  { %v1077_v1 = vpop.permute.xlu1 %1076  }
  0xcd   :  { %1524 = vst.msk [vmem:[%s2853_s1 + $0x48] ss:$-24 sm:$0x7] %vm1047_vm9, %v1077_v1   ;;  %1525 = vst.msk [vmem:[%s2853_s1 + $0x16] sm:$0xf8] %vm1047_vm9, %v1077_v1  }
  0xce   :  { %v1090_v2 = vpop.permute.xlu0 %1089  }
  0xcf   :  { %1528 = vst.msk [vmem:[%s2853_s1 + $0x1e] sm:$0x3] %vm1047_vm9, %v1090_v2  }
  0xd0   :  { %v1125_v3 = vpop.permute.xlu1 %1124  }
  0xd1   :  { %1537 = vst.msk [vmem:[%s2853_s1 + $0x20] sm:$0xff] %vm1126_vm10, %v1125_v3  }
  0xd2   :  { %v1160_v4 = vpop.permute.xlu0 %1159  }
  0xd3   :  { %1546 = vst.msk [vmem:[%s2853_s1 + $0x8] sm:$0xff] %vm1126_vm10, %v1160_v4  }
  0xd4   :  { %v1168_v5 = vpop.permute.xlu1 %1167  }
  0xd5   :  { %1548 = vst.msk [vmem:[%s2853_s1 + $0x50] ss:$-24 sm:$0x3] %vm1126_vm10, %v1168_v5  }
  0xd6   :  { %v1200_v6 = vpop.permute.xlu0 %1199  }
  0xd7   :  { %1556 = vst.msk [vmem:[%s2853_s1 + $0x40] ss:$-24 sm:$0x3] %vm1201_vm11, %v1200_v6   ;;  %1557 = vst.msk [vmem:[%s2853_s1 + $0x27] sm:$0xfc] %vm1201_vm11, %v1200_v6  }
  0xd8   :  { %v1234_v7 = vpop.permute.xlu1 %1233  }
  0xd9   :  { %1565 = vst.msk [vmem:[%s2853_s1 + $0x2f] ss:$-31 sm:$0x3] %vm1201_vm11, %v1234_v7   ;;  %1566 = vst.msk [vmem:[%s2853_s1 + $0xf] sm:$0xfc] %vm1201_vm11, %v1234_v7  }
  0xda   :  { %v1244_v8 = vpop.permute.xlu0 %1243  }
  0xdb   :  { %1568 = vst.msk [vmem:[%s2853_s1 + $0x17] ss:$65 sm:$0x3] %vm1201_vm11, %v1244_v8  }

// kernel: relu_dwconv2d.1
= control target key start
LH: loop header
LB: loop body
LE: loop exit
PB: predicated region body
PF: predicated region fallthrough
CT: control target
= control target key end

     0   :  { %v64_v0 = vlaneseq  ;;  %s2367_s5 = smov 24   ;;  %vm299_vm0 = vcmask 1040384   ;;  %vm123_vm1 = vcmask 261120   ;;  %vm142_vm2 = vcmask 257024   ;;  %s5157_s0 = inlined_call_operand.vmem [shape: f32[2,2,28,672], index: 0, kind: input, shape index: {}]   ;;  %s5158_s1 = inlined_call_operand.vmem [shape: f32[9,672], index: 1, kind: input, shape index: {}]   ;;  %s5159_s2 = inlined_call_operand.vmem [shape: f32[28,672], index: 2, kind: output, shape index: {}]  }
   0x1   :  { %v2162_v1 = vld [vmem:[%s5157_s0 + $0x250] sm:$0xff]  ;;  %v2160_v3 = vld [vmem:[%s5157_s0 + $0x240] sm:$0xff]  ;;  %v2163_v9 = vld [vmem:[%s5157_s0 + $0x258] sm:$0xff]  ;;  %vm459_vm3 = vcmask 1047745   ;;  %vm390_vm4 = vcmask 195584   ;;  %vm465_vm5 = vcmask 261121  }
   0x2   :  { %v193_v2 = vld [vmem:[%s5158_s1] ss:$8 sm:$0xf]  ;;  %v65_v4 = vshrl.u32 %v64_v0, 7  ;;  %v2395_v6 = vmax.f32 %v2162_v1, 0.0  ;;  %v2397_v8 = vmax.f32 %v2160_v3, 0.0 }
   0x3   :  { %v194_v5 = vld [vmem:[%s5158_s1] ss:$8 sm:$0x30]  ;;  %v2414_v15 = vmax.f32 %v2163_v9, 0.0  ;;  %v2422_v17 = vld [vmem:[%s5157_s0 + $0x278] sm:$0xff]  ;;  %v2446_v26 = vld [vmem:[%s5157_s0 + $0x270] sm:$0xff] }
   0x4   :  { %v195_v7 = vor.u32 %v194_v5, %v193_v2  ;;  %v2161_v10 = vld [vmem:[%s5157_s0 + $0x248] sm:$0xff]  ;;  %v2408_v12 = vsub.s32 2, %v65_v4  ;;  %v2410_v13 = vsub.s32 0, %v65_v4  ;;  %v2412_v14 = vsub.s32 3, %v65_v4  ;;  %v2164_v16 = vld [vmem:[%s5157_s0 + $0x260] sm:$0xff]  ;;  %v2496_v49 = vld [vmem:[%s5157_s0 + $0x298] sm:$0xff] }
   0x5   :  { %v2165_v11 = vld [vmem:[%s5157_s0 + $0x268] sm:$0xff]  ;;  %v2424_v18 = vsub.s32 1, %v65_v4  ;;  %v2426_v19 = vmax.f32 %v2161_v10, 0.0  ;;  %v2428_v20 = vsub.s32 5, %v65_v4  ;;  %v2441_v25 = vsub.s32 4, %v65_v4  ;;  %v2477_v40 = vld [vmem:[%s5157_s0 + $0x280] sm:$0xff] }
   0x6   :  { %5262 = vst [vmem:[#allocation2_spill] sm:$0xff] %v2408_v12  ;;  %5263 = vst [vmem:[#allocation3_spill] sm:$0xff] %v2410_v13  ;;  %v2430_v21 = vmax.f32 %v2165_v11, 0.0  ;;  %v2433_v22 = vrot.slane %v195_v7, %v2408_v12  ;;  %v2436_v23 = vrot.slane %v195_v7, %v2410_v13  ;;  %v2439_v24 = vrot.slane %v195_v7, %v2412_v14  ;;  %v2472_v39 = vld [vmem:[%s5157_s0 + $0x288] sm:$0xff]  ;;  %v2501_v50 = vld [vmem:[%s5157_s0 + $0x290] sm:$0xff] }
   0x7   :  { %5264 = vst [vmem:[#allocation4_spill] sm:$0xff] %v2412_v14  ;;  %5265 = vst [vmem:[#allocation5_spill] sm:$0xff] %v2424_v18  ;;  %v2449_v27 = vrot.slane %v195_v7, %v2424_v18  ;;  %v2452_v28 = vrot.slane %v195_v7, %v2428_v20  ;;  %v2454_v29 = vmax.f32 %v2164_v16, 0.0  ;;  %v5171_v30 = vmax.f32 %v2422_v17, 0.0  ;;  %v2516_v59 = vld [vmem:[%s5157_s0 + $0x2a8] sm:$0xff]  ;;  %v2521_v60 = vld [vmem:[%s5157_s0 + $0x2a0] sm:$0xff] }
   0x8   :  { %5266 = vst [vmem:[#allocation6_spill] sm:$0xff] %v2428_v20  ;;  %5267 = vst [vmem:[#allocation7_spill] sm:$0xff] %v2441_v25  ;;  %v229_v31 = vmul.f32 %v2433_v22, %v2395_v6  ;;  %v227_v32 = vmul.f32 %v2436_v23, %v2397_v8  ;;  %v230_v33 = vmul.f32 %v2439_v24, %v2414_v15  ;;  %v5170_v36 = vmax.f32 %v2446_v26, 0.0  ;;  %v2540_v5 = vld [vmem:[%s5157_s0 + $0x2b8] sm:$0xff] }
   0x9   :  { %v2464_v34 = vrot.slane %v195_v7, %v2441_v25  ;;  %v228_v35 = vmul.f32 %v2449_v27, %v2426_v19  ;;  %v232_v41 = vmul.f32 %v2452_v28, %v2430_v21  ;;  %v234_v45 = vmul.f32 %v2449_v27, %v5171_v30  ;;  %5268 = vst [vmem:[#allocation8_spill] sm:$0xff] %v2540_v5  ;;  %v2545_v7 = vld [vmem:[%s5157_s0 + $0x2b0] sm:$0xff]  ;;  %v2235_v30 = vld [vmem:[%s5158_s1 + $0x2] ss:$8 sm:$0x30] }
   0xa   :  { %v302_v37 = vrot.slane %v229_v31, 7  ;;  %v300_v38 = vrot.slane %v227_v32, 7  ;;  %v303_v42 = vrot.slane %v230_v33, 7  ;;  %v233_v46 = vmul.f32 %v2436_v23, %v5170_v36  ;;  %5269 = vst [vmem:[#allocation9_spill] sm:$0xff] %v2545_v7 }
   0xb   :  { %v301_v43 = vrot.slane %v228_v35, 7  ;;  %v231_v44 = vmul.f32 %v2464_v34, %v2454_v29  ;;  %v5169_v47 = vmax.f32 %v2472_v39, 0.0  ;;  %v5168_v48 = vmax.f32 %v2477_v40, 0.0  ;;  %v2234_v36 = vld [vmem:[%s5158_s1 + $0x2] ss:$8 sm:$0xf] }
   0xc   :  { %346 = vrot.lane.b32.xlu1 %v302_v37, %s2367_s5  ;;  %342 = vrot.lane.b32.xlu0 %v300_v38, %s2367_s5  ;;  %v305_v51 = vrot.slane %v232_v41, 7  ;;  %v308_v53 = vrot.slane %v234_v45, 7  ;;  %v5167_v54 = vmax.f32 %v2496_v49, 0.0  ;;  %v306_v55 = vrot.slane %v233_v46, 7  ;;  %v2572_v41 = vld [vmem:[%s5157_s0 + $0x2c0] sm:$0xff] }
   0xd   :  { %v304_v52 = vrot.slane %v231_v44, 7  ;;  %v236_v56 = vmul.f32 %v2439_v24, %v5169_v47  ;;  %v235_v57 = vmul.f32 %v2433_v22, %v5168_v48  ;;  %v5166_v58 = vmax.f32 %v2501_v50, 0.0  ;;  %5271 = vst [vmem:[#allocation11_spill] sm:$0xff] %v2572_v41 }
   0xe   :  { %v309_v61 = vsel %vm299_vm0, %v301_v43, %v308_v53  ;;  %v2529_v62 = vmul.f32 %v2452_v28, %v5167_v54  ;;  %v5165_v63 = vmax.f32 %v2516_v59, 0.0  ;;  %v5164_v0 = vmax.f32 %v2521_v60, 0.0 }
   0xf   :  { %v307_v1 = vsel %vm299_vm0, %v300_v38, %v306_v55  ;;  %v312_v2 = vrot.slane %v236_v56, 7  ;;  %v310_v3 = vrot.slane %v235_v57, 7  ;;  %v237_v4 = vmul.f32 %v2464_v34, %v5166_v58  ;;  %v2567_v38 = vld [vmem:[%s5157_s0 + $0x2c8] sm:$0xff]  ;;  %v2179_v57 = vld [vmem:[%s5157_s0 + $0x2d8] sm:$0x7] }
  0x10   :  { %348 = vrot.lane.b32.xlu1 %v303_v42, %s2367_s5  ;;  %344 = vrot.lane.b32.xlu0 %v301_v43, %s2367_s5  ;;  %v316_v9 = vrot.slane %v2529_v62, 7  ;;  %v2553_v10 = vmul.f32 %v2449_v27, %v5165_v63  ;;  %v2558_v11 = vmul.f32 %v2436_v23, %v5164_v0  ;;  %v5163_v16 = vmax.f32 %v2540_v5, 0.0  ;;  %5270 = vst [vmem:[#allocation10_spill] sm:$0xff] %v2567_v38  ;;  %v2250_v63 = vld [vmem:[%s5157_s0 + $0x130] sm:$0xff] }
  0x11   :  { %v313_v31 = vsel %vm299_vm0, %v303_v42, %v312_v2  ;;  %v311_v32 = vsel %vm299_vm0, %v302_v37, %v310_v3  ;;  %v314_v33 = vrot.slane %v237_v4, 7  ;;  %v5162_v35 = vmax.f32 %v2545_v7, 0.0 }
  0x12   :  { %v317_v42 = vsel %vm299_vm0, %v305_v51, %v316_v9  ;;  %v320_v37 = vrot.slane %v2553_v10, 7  ;;  %v318_v43 = vrot.slane %v2558_v11, 7  ;;  %v2582_v44 = vmul.f32 %v2439_v24, %v5163_v16 }
  0x13   :  { %v315_v45 = vsel %vm299_vm0, %v304_v52, %v314_v33  ;;  %v2588_v46 = vmul.f32 %v2433_v22, %v5162_v35  ;;  %v5161_v56 = vmax.f32 %v2567_v38, 0.0  ;;  %v188_v4 = vmax.f32 %v2179_v57, 0.0 }
  0x14   :  { %352 = vrot.lane.b32.xlu1 %v305_v51, %s2367_s5  ;;  %350 = vrot.lane.b32.xlu0 %v304_v52, %s2367_s5  ;;  %v5160_v51 = vmax.f32 %v2572_v41, 0.0  ;;  %v321_v52 = vsel %vm299_vm0, %v308_v53, %v320_v37  ;;  %v319_v62 = vsel %vm299_vm0, %v306_v55, %v318_v43  ;;  %v2181_v53 = vld [vmem:[%s5157_s0 + $0x2e8] sm:$0x7]  ;;  %v2180_v55 = vld [vmem:[%s5157_s0 + $0x2e0] sm:$0x7]  ;;  %vm467_vm6 = vcmask 1047744  }
  0x15   :  { %v322_v10 = vrot.slane %v2588_v46, 7  ;;  %v2607_v11 = vmul.f32 %v2452_v28, %v5161_v56  ;;  %v189_v46 = vmax.f32 %v2180_v55, 0.0  ;;  %v2200_v41 = vld [vmem:[%s5157_s0 + $0x200] sm:$0xff]  ;;  %vm480_vm7 = vcmask 1043648  }
  0x17   :  { %v323_v57 = vsel %vm299_vm0, %v310_v3, %v322_v10  ;;  %v2159_v3 = vld [vmem:[%s5158_s1 + $0x4] ss:$8 sm:$0x30] }
  0x18   :  { %356 = vrot.lane.b32.xlu1 %v309_v61, %s2367_s5  ;;  %354 = vrot.lane.b32.xlu0 %v307_v1, %s2367_s5  ;;  %v2178_v61 = vld [vmem:[%s5157_s0 + $0x2d0] sm:$0x7]  ;;  %v324_v1 = vrot.slane %v2582_v44, 7  ;;  %v246_v44 = vmul.f32 %v2449_v27, %v188_v4  ;;  %v2158_v27 = vld [vmem:[%s5158_s1 + $0x4] ss:$8 sm:$0xf]  ;;  %v247_v4 = vmul.f32 %v2433_v22, %v189_v46 }
  0x19   :  { %v2646_v35 = vor.u32 %v2159_v3, %v2158_v27  ;;  %v2261_v46 = vld [vmem:[%s5158_s1 + $0x3] ss:$8 sm:$0x30] }
  0x1c   :  { %360 = vrot.lane.b32.xlu1 %v313_v31, %s2367_s5  ;;  %358 = vrot.lane.b32.xlu0 %v311_v32, %s2367_s5  ;;  %v2612_v31 = vmul.f32 %v2464_v34, %v5160_v51  ;;  %v187_v32 = vmax.f32 %v2178_v61, 0.0  ;;  %v328_v61 = vrot.slane %v2607_v11, 7 }
  0x1e   :  { %v326_v51 = vrot.slane %v2612_v31, 7  ;;  %v245_v56 = vmul.f32 %v2436_v23, %v187_v32  ;;  %v332_v23 = vrot.slane %v246_v44, 7  ;;  %v329_v31 = vsel %vm299_vm0, %v316_v9, %v328_v61 }
  0x1f   :  { %v334_v44 = vrot.slane %v247_v4, 7  ;;  %v2683_v4 = vrot.slane %v2646_v35, %v2412_v14 }
  0x20   :  { %364 = vrot.lane.b32.xlu1 %v317_v42, %s2367_s5  ;;  %362 = vrot.lane.b32.xlu0 %v315_v45, %s2367_s5  ;;  %v325_v42 = vsel %vm299_vm0, %v312_v2, %v324_v1  ;;  %v190_v45 = vmax.f32 %v2181_v53, 0.0  ;;  %v2182_v2 = vld [vmem:[%s5157_s0 + $0x2f0] sm:$0x7]  ;;  %v327_v32 = vsel %vm299_vm0, %v314_v33, %v326_v51  ;;  %v330_v53 = vrot.slane %v245_v56, 7 }
  0x21   :  { %v191_v55 = vmax.f32 %v2182_v2, 0.0  ;;  %v2260_v33 = vld [vmem:[%s5158_s1 + $0x3] ss:$8 sm:$0xf]  ;;  %v335_v27 = vsel %vm299_vm0, %v322_v10, %v334_v44 }
  0x22   :  { %v331_v56 = vsel %vm299_vm0, %v318_v43, %v330_v53  ;;  %v2237_v43 = vld [vmem:[%s5157_s0 + $0xc8] sm:$0xff] }
  0x24   :  { %368 = vrot.lane.b32.xlu1 %v321_v52, %s2367_s5  ;;  %366 = vrot.lane.b32.xlu0 %v319_v62, %s2367_s5  ;;  %v2183_v52 = vld [vmem:[%s5157_s0 + $0x2f8] sm:$0x7]  ;;  %v248_v62 = vmul.f32 %v2439_v24, %v190_v45  ;;  %v333_v24 = vsel %vm299_vm0, %v320_v37, %v332_v23  ;;  %v249_v45 = vmul.f32 %v2464_v34, %v191_v55  ;;  %v2236_v23 = vld [vmem:[%s5157_s0 + $0xc0] sm:$0xff] }
  0x25   :  { %v192_v11 = vmax.f32 %v2183_v52, 0.0  ;;  %v1078_v52 = vor.u32 %v2261_v46, %v2260_v33  ;;  %v14_v34 = vld [vmem:[%s5157_s0 + $0x18] sm:$0xff]  ;;  %v1051_v53 = vmax.f32 %v2236_v23, 0.0  ;;  %v2717_v33 = vrot.slane %v2646_v35, %v2408_v12 }
  0x26   :  { %v336_v22 = vrot.slane %v248_v62, 7  ;;  %v338_v3 = vrot.slane %v249_v45, 7 }
  0x27   :  { %v250_v9 = vmul.f32 %v2452_v28, %v192_v11  ;;  %v1052_v11 = vmax.f32 %v2237_v43, 0.0  ;;  %v2698_v55 = vrot.slane %v1078_v52, %v2410_v13  ;;  %v2720_v45 = vrot.slane %v1078_v52, %v2412_v14 }
  0x28   :  { %372 = vrot.lane.b32.xlu1 %v325_v42, %s2367_s5  ;;  %370 = vrot.lane.b32.xlu0 %v323_v57, %s2367_s5  ;;  %v11_v42 = vld [vmem:[%s5157_s0] sm:$0xff]  ;;  %v2665_v57 = vrot.slane %v2646_v35, %v2410_v13  ;;  %v337_v2 = vsel %vm299_vm0, %v324_v1, %v336_v22  ;;  %v38_v1 = vmax.f32 %v14_v34, 0.0  ;;  %v339_v22 = vsel %vm299_vm0, %v326_v51, %v338_v3 }
  0x29   :  { %v35_v37 = vmax.f32 %v11_v42, 0.0  ;;  %v340_v28 = vrot.slane %v250_v9, 7  ;;  %v12_v42 = vld [vmem:[%s5157_s0 + $0x8] sm:$0xff]  ;;  %v2713_v9 = vrot.slane %v2646_v35, %v2424_v18  ;;  %v2730_v34 = vrot.slane %v1078_v52, %v2408_v12 }
  0x2a   :  { %v97_v44 = vmul.f32 %v2683_v4, %v38_v1  ;;  %v36_v51 = vmax.f32 %v12_v42, 0.0  ;;  %v2761_v42 = vrot.slane %v2646_v35, %v2428_v20 }
  0x2b   :  { %v94_v62 = vmul.f32 %v2665_v57, %v35_v37  ;;  %v341_v10 = vsel %vm299_vm0, %v328_v61, %v340_v28  ;;  %v2238_v61 = vld [vmem:[%s5157_s0 + $0xd0] sm:$0xff]  ;;  %v1110_v28 = vmul.f32 %v2698_v55, %v1051_v53 }
  0x2c   :  { %376 = vrot.lane.b32.xlu1 %v329_v31, %s2367_s5  ;;  %374 = vrot.lane.b32.xlu0 %v327_v32, %s2367_s5  ;;  %v2239_v31 = vld [vmem:[%s5157_s0 + $0xd8] sm:$0xff]  ;;  %v2695_v32 = vrot.slane %v1078_v52, %v2424_v18  ;;  %121 = vst [vmem:[%s5159_s2 + $0x18] sm:$0xff] %v97_v44  ;;  %v1053_v43 = vmax.f32 %v2238_v61, 0.0  ;;  %v95_v3 = vmul.f32 %v2713_v9, %v36_v51 }
  0x2d   :  { %118 = vst [vmem:[%s5159_s2] sm:$0xff] %v94_v62  ;;  %v15_v62 = vld [vmem:[%s5157_s0 + $0x20] sm:$0xff]  ;;  %v2768_v61 = vrot.slane %v1078_v52, %v2441_v25  ;;  %v2243_v51 = vld [vmem:[%s5157_s0 + $0xf8] sm:$0xff] }
  0x2e   :  { %v1111_v37 = vmul.f32 %v2695_v32, %v1052_v11  ;;  %v2745_v11 = vrot.slane %v2646_v35, %v2441_v25  ;;  %119 = vst [vmem:[%s5159_s2 + $0x8] sm:$0xff] %v95_v3  ;;  %v39_v44 = vmax.f32 %v15_v62, 0.0  ;;  %v2242_v35 = vld [vmem:[%s5157_s0 + $0xf0] sm:$0xff]  ;;  %v2245_v3 = vld [vmem:[%s5157_s0 + $0x108] sm:$0xff] }
  0x30   :  { %380 = vrot.lane.b32.xlu1 %v333_v24, %s2367_s5  ;;  %378 = vrot.lane.b32.xlu0 %v331_v56, %s2367_s5  ;;  %v13_v24 = vld [vmem:[%s5157_s0 + $0x10] sm:$0xff]  ;;  %v1054_v56 = vmax.f32 %v2239_v31, 0.0  ;;  %v16_v31 = vld [vmem:[%s5157_s0 + $0x28] sm:$0xff] }
  0x31   :  { %v37_v46 = vmax.f32 %v13_v24, 0.0 }
  0x32   :  { %v1113_v24 = vmul.f32 %v2720_v45, %v1054_v56  ;;  %v17_v56 = vld [vmem:[%s5157_s0 + $0x30] sm:$0xff] }
  0x33   :  { %v96_v23 = vmul.f32 %v2717_v33, %v37_v46  ;;  %v40_v46 = vmax.f32 %v16_v31, 0.0  ;;  %v41_v62 = vmax.f32 %v17_v56, 0.0  ;;  %v2208_v31 = vld [vmem:[%s5158_s1 + $0x1] ss:$8 sm:$0xf] }
  0x34   :  { %384 = vrot.lane.b32.xlu1 %v337_v2, %s2367_s5  ;;  %382 = vrot.lane.b32.xlu0 %v335_v27, %s2367_s5  ;;  %v2241_v2 = vld [vmem:[%s5157_s0 + $0xe8] sm:$0xff]  ;;  %v2240_v27 = vld [vmem:[%s5157_s0 + $0xe0] sm:$0xff] }
  0x35   :  { %v1056_v1 = vmax.f32 %v2241_v2, 0.0  ;;  %v1055_v53 = vmax.f32 %v2240_v27, 0.0  ;;  %120 = vst [vmem:[%s5159_s2 + $0x10] sm:$0xff] %v96_v23  ;;  %v1058_v2 = vmax.f32 %v2243_v51, 0.0  ;;  %v1057_v27 = vmax.f32 %v2242_v35, 0.0  ;;  %v2244_v23 = vld [vmem:[%s5157_s0 + $0x100] sm:$0xff] }
  0x36   :  { %v1059_v51 = vmax.f32 %v2244_v23, 0.0  ;;  %v2247_v35 = vld [vmem:[%s5157_s0 + $0x118] sm:$0xff] }
  0x38   :  { %388 = vrot.lane.b32.xlu1 %v341_v10, %s2367_s5  ;;  %386 = vrot.lane.b32.xlu0 %v339_v22, %s2367_s5  ;;  %v2751_v10 = vrot.slane %v1078_v52, %v2428_v20  ;;  %v1112_v22 = vmul.f32 %v2730_v34, %v1053_v43  ;;  %v99_v52 = vmul.f32 %v2761_v42, %v40_v46  ;;  %v2191_v46 = vld [vmem:[%s5157_s0 + $0x1b8] sm:$0xff] }
  0x39   :  { %v1114_v43 = vmul.f32 %v2768_v61, %v1055_v53  ;;  %v2805_v53 = vmul.f32 %v2665_v57, %v41_v62  ;;  %v1118_v23 = vmul.f32 %v2730_v34, %v1059_v51 }
  0x3a   :  { %124 = vst.msk [vmem:[%s5159_s2 + $0x28] sm:$0xff] %vm123_vm1, %v99_v52  ;;  %v22_v52 = vld [vmem:[%s5157_s0 + $0x58] sm:$0xff] }
  0x3b   :  { %5272 = vst [vmem:[#allocation12_spill] sm:$0xff] %v2805_v53  ;;  %125 = vst [vmem:[%s5159_s2 + $0x30] sm:$0xff] %v2805_v53 }
  0x3c   :  { %1184 = vrot.lane.b32.xlu1 %v1111_v37, %s2367_s5  ;;  %1182 = vrot.lane.b32.xlu0 %v1110_v28, %s2367_s5  ;;  %v98_v37 = vmul.f32 %v2745_v11, %v39_v44  ;;  %v1115_v28 = vmul.f32 %v2751_v10, %v1056_v1  ;;  %v2209_v1 = vld [vmem:[%s5158_s1 + $0x1] ss:$8 sm:$0x30]  ;;  %v1060_v44 = vmax.f32 %v2245_v3, 0.0 }
  0x3d   :  { %v2820_v56 = vor.u32 %v2209_v1, %v2208_v31  ;;  %v46_v31 = vmax.f32 %v22_v52, 0.0  ;;  %v2197_v1 = vld [vmem:[%s5157_s0 + $0x1e8] sm:$0xff]  ;;  %v2251_v52 = vld [vmem:[%s5157_s0 + $0x138] sm:$0xff] }
  0x3e   :  { %122 = vst [vmem:[%s5159_s2 + $0x20] sm:$0xff] %v98_v37  ;;  %v2246_v37 = vld [vmem:[%s5157_s0 + $0x110] sm:$0xff]  ;;  %v1119_v3 = vmul.f32 %v2720_v45, %v1060_v44  ;;  %v525_v0 = vmax.f32 %v2197_v1, 0.0  ;;  %v1066_v1 = vmax.f32 %v2251_v52, 0.0  ;;  %v2255_v52 = vld [vmem:[%s5157_s0 + $0x158] sm:$0xf] }
  0x3f   :  { %v1061_v62 = vmax.f32 %v2246_v37, 0.0  ;;  %v105_v51 = vmul.f32 %v2761_v42, %v46_v31  ;;  %v1070_v7 = vmax.f32 %v2255_v52, 0.0  ;;  %v528_v52 = vmax.f32 %v2200_v41, 0.0  ;;  %v2978_v41 = vld [vmem:[%s5157_s0 + $0x170] sm:$0xf] }
  0x40   :  { %1188 = vrot.lane.b32.xlu1 %v1113_v24, %s2367_s5  ;;  %1186 = vrot.lane.b32.xlu0 %v1112_v22, %s2367_s5  ;;  %v1117_v24 = vmul.f32 %v2695_v32, %v1058_v2  ;;  %v1116_v22 = vmul.f32 %v2698_v55, %v1057_v27  ;;  %v2834_v2 = vrot.slane %v2820_v56, %v2424_v18  ;;  %v519_v27 = vmax.f32 %v2191_v46, 0.0  ;;  %v23_v46 = vld [vmem:[%s5157_s0 + $0x60] sm:$0xff] }
  0x41   :  { %130 = vst.msk [vmem:[%s5159_s2 + $0x58] sm:$0xff] %vm123_vm1, %v105_v51  ;;  %v1065_v51 = vmax.f32 %v2250_v63, 0.0 }
  0x42   :  { %5273 = vst [vmem:[#allocation13_spill] sm:$0xff] %v2834_v2  ;;  %v2861_v16 = vmul.f32 %v2834_v2, %v519_v27  ;;  %v2253_v27 = vld [vmem:[%s5157_s0 + $0x148] sm:$0xff] }
  0x43   :  { %v1068_v38 = vmax.f32 %v2253_v27, 0.0 }
  0x44   :  { %1192 = vrot.lane.b32.xlu1 %v1115_v28, %s2367_s5  ;;  %1190 = vrot.lane.b32.xlu0 %v1114_v43, %s2367_s5  ;;  %v1062_v28 = vmax.f32 %v2247_v35, 0.0  ;;  %v2249_v43 = vld [vmem:[%s5157_s0 + $0x128] sm:$0xff]  ;;  %v2248_v35 = vld [vmem:[%s5157_s0 + $0x120] sm:$0xff]  ;;  %5274 = vst [vmem:[#allocation14_spill] sm:$0xff] %v2861_v16 }
  0x45   :  { %v1064_v44 = vmax.f32 %v2249_v43, 0.0  ;;  %v1120_v43 = vmul.f32 %v2768_v61, %v1061_v62  ;;  %v1063_v31 = vmax.f32 %v2248_v35, 0.0  ;;  %v2882_v35 = vrot.slane %v2820_v56, %v2412_v14 }
  0x46   :  { %v1121_v37 = vmul.f32 %v2751_v10, %v1062_v28 }
  0x47   :  { %v1123_v62 = vmul.f32 %v2695_v32, %v1064_v44  ;;  %5276 = vst [vmem:[#allocation16_spill] sm:$0xff] %v2882_v35  ;;  %v2199_v44 = vld [vmem:[%s5157_s0 + $0x1f8] sm:$0xff]  ;;  %v1122_v63 = vmul.f32 %v2698_v55, %v1063_v31  ;;  %v5280_v31 = vrot.slane %v2861_v16, 7  ;;  %v1124_v16 = vmul.f32 %v2730_v34, %v1065_v51 }
  0x48   :  { %1196 = vrot.lane.b32.xlu1 %v1117_v24, %s2367_s5  ;;  %1194 = vrot.lane.b32.xlu0 %v1116_v22, %s2367_s5  ;;  %v2192_v24 = vld [vmem:[%s5157_s0 + $0x1c0] sm:$0xff]  ;;  %v2193_v22 = vld [vmem:[%s5157_s0 + $0x1c8] sm:$0xff]  ;;  %v2960_v51 = vor.u32 %v2235_v30, %v2234_v36  ;;  %v1127_v30 = vmul.f32 %v2751_v10, %v1068_v38 }
  0x49   :  { %v520_v28 = vmax.f32 %v2192_v24, 0.0  ;;  %v521_v58 = vmax.f32 %v2193_v22, 0.0  ;;  %v2886_v24 = vrot.slane %v2820_v56, %v2408_v12  ;;  %v2194_v22 = vld [vmem:[%s5157_s0 + $0x1d0] sm:$0xff]  ;;  %v2313_v38 = vld [vmem:[%s5158_s1 + $0x6] ss:$8 sm:$0x30] }
  0x4b   :  { %5277 = vst [vmem:[#allocation17_spill] sm:$0xff] %v2886_v24  ;;  %v2918_v54 = vmul.f32 %v2886_v24, %v520_v28 }
  0x4c   :  { %1200 = vrot.lane.b32.xlu1 %v1119_v3, %s2367_s5  ;;  %1198 = vrot.lane.b32.xlu0 %v1118_v23, %s2367_s5  ;;  %v2877_v3 = vmul.f32 %v2834_v2, %v525_v0  ;;  %v47_v23 = vmax.f32 %v23_v46, 0.0  ;;  %v2198_v0 = vld [vmem:[%s5157_s0 + $0x1f0] sm:$0xff]  ;;  %v2252_v46 = vld [vmem:[%s5157_s0 + $0x140] sm:$0xff] }
  0x4d   :  { %5279 = vst [vmem:[#allocation19_spill] sm:$0xff] %v2918_v54  ;;  %v526_v28 = vmax.f32 %v2198_v0, 0.0  ;;  %v2256_v0 = vld [vmem:[%s5157_s0 + $0x160] sm:$0xf] }
  0x4e   :  { %5275 = vst [vmem:[#allocation15_spill] sm:$0xff] %v2877_v3  ;;  %v5178_v48 = vrot.slane %v2877_v3, 7  ;;  %v2906_v47 = vmul.f32 %v2665_v57, %v47_v23  ;;  %v2921_v23 = vmul.f32 %v2882_v35, %v521_v58  ;;  %v527_v58 = vmax.f32 %v2199_v44, 0.0 }
  0x4f   :  { %v1067_v3 = vmax.f32 %v2252_v46, 0.0  ;;  %v2950_v44 = vrot.slane %v2820_v56, %v2441_v25  ;;  %v2312_v46 = vld [vmem:[%s5158_s1 + $0x6] ss:$8 sm:$0xf] }
  0x50   :  { %5278 = vst [vmem:[#allocation18_spill] sm:$0xff] %v2906_v47  ;;  %1204 = vrot.lane.b32.xlu1 %v1121_v37, %s2367_s5  ;;  %1202 = vrot.lane.b32.xlu0 %v1120_v43, %s2367_s5  ;;  %v2254_v37 = vld [vmem:[%s5157_s0 + $0x150] sm:$0xf]  ;;  %v522_v43 = vmax.f32 %v2194_v22, 0.0  ;;  %v2931_v53 = vsel %vm299_vm0, %v5280_v31, %v5178_v48  ;;  %131 = vst [vmem:[%s5159_s2 + $0x60] sm:$0xff] %v2906_v47  ;;  %v1125_v22 = vmul.f32 %v2720_v45, %v1066_v1 }
  0x51   :  { %5281 = vst [vmem:[#allocation20_spill] sm:$0xff] %v2931_v53  ;;  %v2257_v31 = vld [vmem:[%s5157_s0 + $0x168] sm:$0xf]  ;;  %5282 = vst [vmem:[#allocation21_spill] sm:$0xff] %v2950_v44  ;;  %v2953_v48 = vmul.f32 %v2886_v24, %v526_v28  ;;  %v2956_v27 = vmul.f32 %v2882_v35, %v527_v58  ;;  %v1069_v1 = vmax.f32 %v2254_v37, 0.0  ;;  %v1071_v37 = vmax.f32 %v2256_v0, 0.0 }
  0x52   :  { %v2966_v53 = vld [vmem:[%s5157_s0 + $0x178] sm:$0xf]  ;;  %v2970_v58 = vmul.f32 %v2950_v44, %v522_v43  ;;  %v1072_v36 = vmax.f32 %v2257_v31, 0.0  ;;  %v28_v28 = vld [vmem:[%s5157_s0 + $0x88] sm:$0xff]  ;;  %v1126_v43 = vmul.f32 %v2768_v61, %v1067_v3  ;;  %v5286_v31 = vrot.slane %v2918_v54, 7 }
  0x53   :  { %5283 = vst [vmem:[#allocation22_spill] sm:$0xff] %v2953_v48  ;;  %5284 = vst [vmem:[#allocation23_spill] sm:$0xff] %v2956_v27  ;;  %v5288_v47 = vrot.slane %v2921_v23, 7  ;;  %v3005_v5 = vmul.f32 %v2950_v44, %v528_v52  ;;  %v1128_v54 = vmul.f32 %v2698_v55, %v1069_v1  ;;  %v30_v52 = vld [vmem:[%s5157_s0 + $0x98] sm:$0xf] }
  0x54   :  { %1208 = vrot.lane.b32.xlu1 %v1123_v62, %s2367_s5  ;;  %1206 = vrot.lane.b32.xlu0 %v1122_v63, %s2367_s5  ;;  %5285 = vst [vmem:[#allocation24_spill] sm:$0xff] %v2970_v58  ;;  %v5184_v62 = vrot.slane %v2953_v48, 7  ;;  %v5183_v63 = vrot.slane %v2956_v27, 7  ;;  %v1129_v48 = vmul.f32 %v2695_v32, %v1070_v7  ;;  %v52_v32 = vmax.f32 %v28_v28, 0.0  ;;  %v31_v55 = vld [vmem:[%s5157_s0 + $0xa0] sm:$0xf] }
  0x55   :  { %5290 = vst [vmem:[#allocation27_spill] sm:$0xff] %v3005_v5  ;;  %v1131_v1 = vmul.f32 %v2720_v45, %v1072_v36  ;;  %v1073_v27 = vmax.f32 %v2978_v41, 0.0  ;;  %v3039_v7 = vrot.slane %v2960_v51, %v2408_v12  ;;  %v5291_v28 = vrot.slane %v2970_v58, 7  ;;  %v33_v36 = vld [vmem:[%s5157_s0 + $0xb0] sm:$0xf] }
  0x56   :  { %v2995_v0 = vsel %vm299_vm0, %v5286_v31, %v5184_v62  ;;  %v3002_v3 = vsel %vm299_vm0, %v5288_v47, %v5183_v63  ;;  %v3013_v31 = vrot.slane %v2960_v51, %v2412_v14  ;;  %v29_v47 = vld [vmem:[%s5157_s0 + $0x90] sm:$0xf]  ;;  %v1130_v63 = vmul.f32 %v2730_v34, %v1071_v37  ;;  %v34_v37 = vld [vmem:[%s5157_s0 + $0xb8] sm:$0xf] }
  0x57   :  { %5287 = vst [vmem:[#allocation25_spill] sm:$0xff] %v2995_v0  ;;  %5289 = vst [vmem:[#allocation26_spill] sm:$0xff] %v3002_v3  ;;  %v1074_v62 = vmax.f32 %v2966_v53, 0.0  ;;  %v32_v3 = vld [vmem:[%s5157_s0 + $0xa8] sm:$0xf]  ;;  %v111_v34 = vmul.f32 %v2761_v42, %v52_v32  ;;  %v53_v53 = vmax.f32 %v29_v47, 0.0  ;;  %v3057_v41 = vor.u32 %v2313_v38, %v2312_v46 }
  0x58   :  { %1212 = vrot.lane.b32.xlu1 %v1125_v22, %s2367_s5  ;;  %1210 = vrot.lane.b32.xlu0 %v1124_v16, %s2367_s5  ;;  %v3023_v22 = vrot.slane %v2960_v51, %v2424_v18  ;;  %v5186_v16 = vrot.slane %v3005_v5, 7  ;;  %v54_v32 = vmax.f32 %v30_v52, 0.0  ;;  %v55_v47 = vmax.f32 %v31_v55, 0.0  ;;  %v3086_v0 = vld [vmem:[%s5157_s0 + $0x280] sm:$0xff] }
  0x59   :  { %v3070_v5 = vmul.f32 %v3013_v31, %v2414_v15  ;;  %136 = vst.msk [vmem:[%s5159_s2 + $0x88] sm:$0xff] %vm123_vm1, %v111_v34  ;;  %v112_v46 = vmul.f32 %v2665_v57, %v53_v53  ;;  %v57_v55 = vmax.f32 %v33_v36, 0.0  ;;  %5295 = vst [vmem:[#allocation31_spill] sm:$0xff] %v3086_v0  ;;  %v3090_v58 = vmul.f32 %v3039_v7, %v2395_v6  ;;  %v3100_v34 = vld [vmem:[%s5157_s0 + $0x288] sm:$0xff]  ;;  %v3105_v53 = vld [vmem:[%s5157_s0 + $0x290] sm:$0xff] }
  0x5a   :  { %v3046_v45 = vsel %vm299_vm0, %v5291_v28, %v5186_v16  ;;  %v3061_v28 = vrot.slane %v2960_v51, %v2441_v25  ;;  %v3066_v16 = vld [vmem:[%s5157_s0 + $0x278] sm:$0xff]  ;;  %v113_v38 = vmul.f32 %v2713_v9, %v54_v32  ;;  %v114_v52 = vmul.f32 %v2717_v33, %v55_v47  ;;  %5296 = vst [vmem:[#allocation32_spill] sm:$0xff] %v3100_v34 }
  0x5b   :  { %5292 = vst [vmem:[#allocation28_spill] sm:$0xff] %v3046_v45  ;;  %5294 = vst [vmem:[#allocation30_spill] sm:$0xff] %v3066_v16  ;;  %v58_v45 = vmax.f32 %v34_v37, 0.0  ;;  %v116_v37 = vmul.f32 %v2745_v11, %v57_v55 }
  0x5c   :  { %1216 = vrot.lane.b32.xlu1 %v1127_v30, %s2367_s5  ;;  %1214 = vrot.lane.b32.xlu0 %v1126_v43, %s2367_s5  ;;  %5293 = vst [vmem:[#allocation29_spill] sm:$0xff] %v3061_v28  ;;  %v3074_v30 = vmul.f32 %v3023_v22, %v2426_v19  ;;  %v56_v43 = vmax.f32 %v32_v3, 0.0  ;;  %137 = vst [vmem:[%s5159_s2 + $0x90] sm:$0xf] %v112_v46  ;;  %v5192_v3 = vmax.f32 %v3066_v16, 0.0  ;;  %v5189_v46 = vmax.f32 %v3086_v0, 0.0 }
  0x5d   :  { %5297 = vst [vmem:[#allocation33_spill] sm:$0xff] %v3105_v53  ;;  %v3111_v36 = vmul.f32 %v3061_v28, %v2454_v29  ;;  %138 = vst [vmem:[%s5159_s2 + $0x98] sm:$0xf] %v113_v38  ;;  %v117_v32 = vmul.f32 %v2761_v42, %v58_v45  ;;  %v3135_v42 = vrot.slane %v3057_v41, %v2424_v18  ;;  %v2188_v16 = vld [vmem:[%s5157_s0 + $0x1a0] sm:$0xff] }
  0x5e   :  { %v115_v57 = vmul.f32 %v2683_v4, %v56_v43  ;;  %139 = vst [vmem:[%s5159_s2 + $0xa0] sm:$0xf] %v114_v52  ;;  %v3129_v47 = vmul.f32 %v3023_v22, %v5192_v3  ;;  %v1132_v43 = vmul.f32 %v2768_v61, %v1073_v27  ;;  %141 = vst [vmem:[%s5159_s2 + $0xb0] sm:$0xf] %v116_v37  ;;  %v5200_v27 = vrot.slane %v3070_v5, 7 }
  0x5f   :  { %5298 = vst [vmem:[#allocation34_spill] sm:$0xff] %v3111_v36  ;;  %143 = vst.msk [vmem:[%s5159_s2 + $0xb8] sm:$0xf] %vm142_vm2, %v117_v32  ;;  %v3148_v61 = vrot.slane %v3057_v41, %v2410_v13  ;;  %v3155_v38 = vmul.f32 %v3039_v7, %v5189_v46  ;;  %v5197_v52 = vrot.slane %v3090_v58, 7  ;;  %v5199_v55 = vrot.slane %v3111_v36, 7 }
  0x60   :  { %1220 = vrot.lane.b32.xlu1 %v1129_v48, %s2367_s5  ;;  %1218 = vrot.lane.b32.xlu0 %v1128_v54, %s2367_s5  ;;  %v1133_v48 = vmul.f32 %v2751_v10, %v1074_v62  ;;  %v5194_v54 = vrot.slane %v3074_v30, 7  ;;  %140 = vst [vmem:[%s5159_s2 + $0xa8] sm:$0xf] %v115_v57  ;;  %5299 = vst [vmem:[#allocation35_spill] sm:$0xff] %v3129_v47  ;;  %v5190_v10 = vmax.f32 %v3100_v34, 0.0  ;;  %v5191_v62 = vmax.f32 %v3105_v53, 0.0 }
  0x61   :  { %v5193_v45 = vrot.slane %v3129_v47, 7  ;;  %5300 = vst [vmem:[#allocation36_spill] sm:$0xff] %v3155_v38  ;;  %v3187_v3 = vrot.slane %v3057_v41, %v2412_v14  ;;  %v5304_v34 = vmax.f32 %v2446_v26, 0.0  ;;  %v5306_v26 = vmax.f32 %v2477_v40, 0.0 }
  0x62   :  { %v3164_v57 = vmul.f32 %v3013_v31, %v5190_v10  ;;  %v3169_v37 = vmul.f32 %v3061_v28, %v5191_v62  ;;  %v1585_v10 = vmul.f32 %v3135_v42, %v2426_v19  ;;  %v1584_v62 = vmul.f32 %v3148_v61, %v2397_v8 }
  0x63   :  { %v3293_v40 = vrot.slane %v2820_v56, %v2428_v20 }
  0x64   :  { %1224 = vrot.lane.b32.xlu1 %v1131_v1, %s2367_s5  ;;  %1222 = vrot.lane.b32.xlu0 %v1130_v63, %s2367_s5  ;;  %5301 = vst [vmem:[#allocation37_spill] sm:$0xff] %v3164_v57  ;;  %5302 = vst [vmem:[#allocation38_spill] sm:$0xff] %v3169_v37  ;;  %v3176_v63 = vsel %vm299_vm0, %v5194_v54, %v5193_v45  ;;  %v5195_v1 = vrot.slane %v3155_v38, 7  ;;  %v5196_v32 = vrot.slane %v3164_v57, 7  ;;  %v5198_v46 = vrot.slane %v3169_v37, 7 }
  0x65   :  { %v3191_v45 = vrot.slane %v3057_v41, %v2408_v12  ;;  %5307 = vst [vmem:[#allocation39_spill] sm:$0xff] %v3293_v40 }
  0x66   :  { %v3200_v19 = vsel %vm299_vm0, %v5197_v52, %v5195_v1  ;;  %v3207_v54 = vsel %vm299_vm0, %v5200_v27, %v5196_v32  ;;  %v1587_v1 = vmul.f32 %v3187_v3, %v2414_v15  ;;  %v3228_v52 = vrot.slane %v3057_v41, %v2441_v25  ;;  %v2184_v15 = vld [vmem:[%s5157_s0 + $0x180] sm:$0xff] }
  0x67   :  { %v1586_v32 = vmul.f32 %v3191_v45, %v2395_v6  ;;  %v2187_v6 = vld [vmem:[%s5157_s0 + $0x198] sm:$0xff]  ;;  %v5303_v27 = vmax.f32 %v2422_v17, 0.0  ;;  %v5305_v17 = vmax.f32 %v2472_v39, 0.0 }
  0x68   :  { %1228 = vrot.lane.b32.xlu1 %v1133_v48, %s2367_s5  ;;  %1226 = vrot.lane.b32.xlu0 %v1132_v43, %s2367_s5  ;;  %v3214_v48 = vsel %vm299_vm0, %v5199_v55, %v5198_v46  ;;  %v3218_v43 = vrot.slane %v3057_v41, %v2428_v20  ;;  %v2185_v41 = vld [vmem:[%s5157_s0 + $0x188] sm:$0xff]  ;;  %v3257_v55 = vrot.slane %v2960_v51, %v2410_v13  ;;  %v515_v0 = vmax.f32 %v2187_v6, 0.0 }
  0x69   :  { %v1591_v53 = vmul.f32 %v3135_v42, %v5303_v27  ;;  %v513_v25 = vmax.f32 %v2185_v41, 0.0  ;;  %v1593_v27 = vmul.f32 %v3187_v3, %v5305_v17  ;;  %v20_v17 = vld [vmem:[%s5157_s0 + $0x48] sm:$0xff] }
  0x6a   :  { %v1589_v46 = vmul.f32 %v3218_v43, %v2430_v21  ;;  %v3284_v41 = vmul.f32 %v3257_v55, %v2397_v8  ;;  %v3289_v39 = vmul.f32 %v2882_v35, %v515_v0  ;;  %v5310_v0 = vmax.f32 %v2496_v49, 0.0  ;;  %v19_v49 = vld [vmem:[%s5157_s0 + $0x40] sm:$0xff] }
  0x6b   :  { %v3300_v8 = vmul.f32 %v2834_v2, %v513_v25  ;;  %v44_v35 = vmax.f32 %v20_v17, 0.0  ;;  %v254_v17 = vld [vmem:[%s5159_s2 + $0x18] sm:$0xfe] }
  0x6c   :  { %1658 = vrot.lane.b32.xlu1 %v1585_v10, %s2367_s5  ;;  %1656 = vrot.lane.b32.xlu0 %v1584_v62, %s2367_s5  ;;  %v1588_v10 = vmul.f32 %v3228_v52, %v2454_v29  ;;  %v2186_v62 = vld [vmem:[%s5157_s0 + $0x190] sm:$0xff] }
  0x6d   :  { %v2190_v29 = vld [vmem:[%s5157_s0 + $0x1b0] sm:$0xff]  ;;  %v514_v14 = vmax.f32 %v2186_v62, 0.0  ;;  %v516_v62 = vmax.f32 %v2188_v16, 0.0 }
  0x6f   :  { %v3303_v16 = vmul.f32 %v2886_v24, %v514_v14  ;;  %v5311_v14 = vmax.f32 %v2501_v50, 0.0  ;;  %v251_v50 = vld [vmem:[%s5159_s2] sm:$0xfe]  ;;  %v5321_v24 = vld [vmem:[#allocation11_spill] sm:$0xff] }
  0x70   :  { %1662 = vrot.lane.b32.xlu1 %v1587_v1, %s2367_s5  ;;  %1660 = vrot.lane.b32.xlu0 %v1586_v32, %s2367_s5  ;;  %v512_v1 = vmax.f32 %v2184_v15, 0.0  ;;  %v3253_v32 = vrot.slane %v2820_v56, %v2410_v13  ;;  %v1590_v15 = vmul.f32 %v3148_v61, %v5304_v34  ;;  %v1592_v34 = vmul.f32 %v3191_v45, %v5306_v26  ;;  %v18_v56 = vld [vmem:[%s5157_s0 + $0x38] sm:$0xff] }
  0x71   :  { %v5322_v37 = vmax.f32 %v5321_v24, 0.0  ;;  %v253_v24 = vld [vmem:[%s5159_s2 + $0x10] sm:$0xfe] }
  0x72   :  { %v3280_v6 = vmul.f32 %v3253_v32, %v512_v1  ;;  %v3297_v1 = vrot.slane %v2960_v51, %v2428_v20  ;;  %v5315_v20 = vld [vmem:[#allocation8_spill] sm:$0xff]  ;;  %v2307_v51 = vld [vmem:[%s5157_s0 + $0x2d8] sm:$0xf] }
  0x73   :  { %v3388_v2 = vmul.f32 %v3228_v52, %v5322_v37 }
  0x74   :  { %1666 = vrot.lane.b32.xlu1 %v1589_v46, %s2367_s5  ;;  %1664 = vrot.lane.b32.xlu0 %v1588_v10, %s2367_s5  ;;  %v2189_v46 = vld [vmem:[%s5157_s0 + $0x1a8] sm:$0xff]  ;;  %v518_v10 = vmax.f32 %v2190_v29, 0.0  ;;  %5308 = vst [vmem:[#allocation40_spill] sm:$0xff] %v3297_v1  ;;  %v3342_v25 = vmul.f32 %v3297_v1, %v2430_v21  ;;  %v5316_v21 = vmax.f32 %v5315_v20, 0.0  ;;  %v5327_v1 = vrot.slane %v3300_v8, 7 }
  0x75   :  { %v517_v29 = vmax.f32 %v2189_v46, 0.0  ;;  %v1594_v46 = vmul.f32 %v3228_v52, %v5311_v14 }
  0x76   :  { %5313 = vst [vmem:[#allocation42_spill] sm:$0xff] %v3342_v25  ;;  %v3356_v13 = vmul.f32 %v3187_v3, %v5316_v21  ;;  %v5325_v25 = vld [vmem:[#allocation14_spill] sm:$0xff] }
  0x77   :  { %v3338_v14 = vmul.f32 %v3293_v40, %v517_v29  ;;  %v5314_v29 = vmax.f32 %v2521_v60, 0.0  ;;  %v5319_v60 = vld [vmem:[#allocation10_spill] sm:$0xff]  ;;  %v5326_v36 = vrot.slane %v5325_v25, 7 }
  0x78   :  { %1670 = vrot.lane.b32.xlu1 %v1591_v53, %s2367_s5  ;;  %1668 = vrot.lane.b32.xlu0 %v1590_v15, %s2367_s5  ;;  %v3306_v53 = vmul.f32 %v3253_v32, %v518_v10  ;;  %v1595_v15 = vmul.f32 %v3218_v43, %v5310_v0  ;;  %v3320_v10 = vmul.f32 %v2950_v44, %v516_v62  ;;  %v5312_v62 = vmax.f32 %v2516_v59, 0.0 }
  0x79   :  { %v42_v59 = vmax.f32 %v18_v56, 0.0  ;;  %v1596_v18 = vmul.f32 %v3148_v61, %v5314_v29  ;;  %v43_v44 = vmax.f32 %v19_v49, 0.0  ;;  %v2306_v56 = vld [vmem:[%s5157_s0 + $0x2d0] sm:$0xf]  ;;  %v5317_v29 = vld [vmem:[#allocation9_spill] sm:$0xff]  ;;  %v3420_v47 = vsel %vm299_vm0, %v5327_v1, %v5326_v36 }
  0x7a   :  { %5309 = vst [vmem:[#allocation41_spill] sm:$0xff] %v3306_v53  ;;  %v1597_v0 = vmul.f32 %v3135_v42, %v5312_v62  ;;  %v5318_v26 = vmax.f32 %v5317_v29, 0.0  ;;  %v21_v49 = vld [vmem:[%s5157_s0 + $0x50] sm:$0xff]  ;;  %v5323_v37 = vrot.slane %v3306_v53, 7  ;;  %v2309_v36 = vld [vmem:[%s5157_s0 + $0x2e8] sm:$0xf] }
  0x7b   :  { %v3413_v29 = vmul.f32 %v2713_v9, %v42_v59  ;;  %v3423_v53 = vmul.f32 %v2717_v33, %v43_v44  ;;  %v45_v59 = vmax.f32 %v21_v49, 0.0  ;;  %v2308_v44 = vld [vmem:[%s5157_s0 + $0x2e0] sm:$0xf] }
  0x7c   :  { %1674 = vrot.lane.b32.xlu1 %v1593_v27, %s2367_s5  ;;  %1672 = vrot.lane.b32.xlu0 %v1592_v34, %s2367_s5  ;;  %v2195_v27 = vld [vmem:[%s5157_s0 + $0x1d8] sm:$0xff]  ;;  %v3368_v20 = vmul.f32 %v3191_v45, %v5318_v26  ;;  %v5320_v26 = vmax.f32 %v5319_v60, 0.0  ;;  %v5324_v60 = vrot.slane %v3280_v6, 7 }
  0x7d   :  { %v523_v21 = vmax.f32 %v2195_v27, 0.0 }
  0x7e   :  { %v347_v12 = vpop.permute.xlu1 %346  ;;  %v343_v62 = vpop.permute.xlu0 %342  ;;  %v3383_v27 = vmul.f32 %v3218_v43, %v5320_v26  ;;  %v3410_v26 = vsel %vm299_vm0, %v5324_v60, %v5323_v37  ;;  %v3426_v37 = vmul.f32 %v2683_v4, %v44_v35  ;;  %v2196_v35 = vld [vmem:[%s5157_s0 + $0x1e0] sm:$0xff] }
  0x7f   :  { %v435_v34 = vadd.f32 %v343_v62, %v251_v50  ;;  %v1544_v50 = vmax.f32 %v2307_v51, 0.0  ;;  %v3432_v25 = vmul.f32 %v3293_v40, %v523_v21 }
  0x80   :  { %1678 = vrot.lane.b32.xlu1 %v1595_v15, %s2367_s5  ;;  %1676 = vrot.lane.b32.xlu0 %v1594_v46, %s2367_s5  ;;  %v3393_v15 = vld [vmem:[%s5157_s0 + $0x270] sm:$0xff]  ;;  %v252_v46 = vld [vmem:[%s5159_s2 + $0x8] sm:$0xfe] }
  0x81   :  { %460 = vst.msk [vmem:[%s5159_s2] sm:$0xfe] %vm459_vm3, %v435_v34  ;;  %v1543_v34 = vmax.f32 %v2306_v56, 0.0  ;;  %v3475_v40 = vmul.f32 %v3135_v42, %v1544_v50  ;;  %v1546_v50 = vmax.f32 %v2309_v36, 0.0 }
  0x82   :  { %v349_v57 = vpop.permute.xlu1 %348  ;;  %v345_v38 = vpop.permute.xlu0 %344 }
  0x83   :  { %v393_v51 = vsel %vm390_vm4, %v347_v12, %v349_v57  ;;  %v391_v56 = vsel %vm390_vm4, %v343_v62, %v345_v38  ;;  %v392_v60 = vsel %vm390_vm4, %v345_v38, %v347_v12  ;;  %v2202_v12 = vld [vmem:[%s5157_s0 + $0x210] sm:$0x7]  ;;  %v3451_v38 = vld [vmem:[%s5157_s0 + $0x68] sm:$0xff]  ;;  %v3478_v28 = vmul.f32 %v3148_v61, %v1543_v34 }
  0x84   :  { %v438_v1 = vadd.f32 %v393_v51, %v254_v17  ;;  %v436_v49 = vadd.f32 %v391_v56, %v252_v46  ;;  %v437_v62 = vadd.f32 %v392_v60, %v253_v24  ;;  %1682 = vrot.lane.b32.xlu1 %v1597_v0, %s2367_s5  ;;  %1680 = vrot.lane.b32.xlu0 %v1596_v18, %s2367_s5  ;;  %v255_v17 = vld [vmem:[%s5159_s2 + $0x20] sm:$0xfe]  ;;  %v256_v0 = vld [vmem:[%s5159_s2 + $0x28] sm:$0xfe]  ;;  %v5330_v24 = vrot.slane %v3303_v16, 7 }
  0x85   :  { %v5328_v18 = vld [vmem:[#allocation19_spill] sm:$0xff]  ;;  %v5331_v56 = vrot.slane %v2921_v23, 7  ;;  %v5332_v60 = vrot.slane %v3289_v39, 7  ;;  %v3493_v61 = vmul.f32 %v2745_v11, %v45_v59  ;;  %v1545_v34 = vmax.f32 %v2308_v44, 0.0 }
  0x86   :  { %v5329_v46 = vrot.slane %v5328_v18, 7  ;;  %v2311_v18 = vld [vmem:[%s5157_s0 + $0x2f8] sm:$0xf]  ;;  %463 = vst [vmem:[%s5159_s2 + $0x18] sm:$0xfe] %v438_v1  ;;  %v353_v23 = vpop.permute.xlu1 %352  ;;  %v351_v42 = vpop.permute.xlu0 %350 }
  0x87   :  { %v3472_v21 = vsel %vm299_vm0, %v5332_v60, %v5331_v56  ;;  %461 = vst [vmem:[%s5159_s2 + $0x8] sm:$0xfe] %v436_v49  ;;  %462 = vst [vmem:[%s5159_s2 + $0x10] sm:$0xfe] %v437_v62  ;;  %v2310_v1 = vld [vmem:[%s5157_s0 + $0x2f0] sm:$0xf]  ;;  %v395_v62 = vsel %vm390_vm4, %v351_v42, %v353_v23 }
  0x88   :  { %v3465_v51 = vsel %vm299_vm0, %v5330_v24, %v5329_v46  ;;  %v524_v46 = vmax.f32 %v2196_v35, 0.0  ;;  %v25_v49 = vld [vmem:[%s5157_s0 + $0x70] sm:$0xff]  ;;  %v394_v24 = vsel %vm390_vm4, %v349_v57, %v351_v42  ;;  %v5235_v56 = vrot.slane %v3432_v25, 7  ;;  %v595_v59 = vld [vmem:[%s5159_s2] sm:$0xfe]  ;;  %1686 = vrot.lane.b32.xlu1 %v3356_v13, %s2367_s5  ;;  %1684 = vrot.lane.b32.xlu0 %v3368_v20, %s2367_s5 }
  0x89   :  { %v530_v60 = vmax.f32 %v2202_v12, 0.0  ;;  %v439_v36 = vadd.f32 %v394_v24, %v255_v17  ;;  %v440_v44 = vadd.f32 %v395_v62, %v256_v0  ;;  %v48_v35 = vmax.f32 %v3451_v38, 0.0  ;;  %v26_v57 = vld [vmem:[%s5157_s0 + $0x78] sm:$0xff]  ;;  %v2223_v20 = vld [vmem:[%s5157_s0 + $0x2a8] sm:$0xff] }
  0x8a   :  { %v5333_v12 = vmax.f32 %v3393_v15, 0.0  ;;  %v5334_v17 = vrot.slane %v3280_v6, 7  ;;  %v1548_v42 = vmax.f32 %v2311_v18, 0.0  ;;  %v1547_v24 = vmax.f32 %v2310_v1, 0.0  ;;  %v357_v38 = vpop.permute.xlu1 %356  ;;  %v355_v62 = vpop.permute.xlu0 %354  ;;  %v5335_v6 = vld [vmem:[#allocation24_spill] sm:$0xff] }
  0x8b   :  { %v49_v13 = vmax.f32 %v25_v49, 0.0  ;;  %464 = vst [vmem:[%s5159_s2 + $0x20] sm:$0xfe] %v439_v36  ;;  %466 = vst.msk [vmem:[%s5159_s2 + $0x28] sm:$0xfe] %vm465_vm5, %v440_v44  ;;  %v5337_v18 = vrot.slane %v3320_v10, 7  ;;  %v3540_v49 = vmul.f32 %v3187_v3, %v1546_v50  ;;  %v3546_v36 = vmul.f32 %v3253_v32, %v524_v46 }
  0x8c   :  { %v3518_v23 = vmul.f32 %v3257_v55, %v5333_v12  ;;  %v709_v0 = vadd.f32 %v5334_v17, %v595_v59  ;;  %v5336_v59 = vrot.slane %v5335_v6, 7  ;;  %v3543_v12 = vmul.f32 %v3191_v45, %v1545_v34  ;;  %v5338_v17 = vld [vmem:[#allocation12_spill] sm:$0xff]  ;;  %1690 = vrot.lane.b32.xlu1 %v3383_v27, %s2367_s5  ;;  %1688 = vrot.lane.b32.xlu0 %v3388_v2, %s2367_s5  ;;  %v3568_v34 = vld [vmem:[%s5157_s0 + $0x218] sm:$0x7] }
  0x8d   :  { %v396_v44 = vsel %vm390_vm4, %v355_v62, %v357_v38  ;;  %v441_v6 = vadd.f32 %v355_v62, %v5338_v17  ;;  %v50_v45 = vmax.f32 %v26_v57, 0.0  ;;  %v3571_v46 = vmul.f32 %v3253_v32, %v530_v60  ;;  %v598_v27 = vld [vmem:[%s5159_s2 + $0x18] sm:$0xfe] }
  0x8e   :  { %v3537_v1 = vsel %vm299_vm0, %v5337_v18, %v5336_v59  ;;  %733 = vst [vmem:[%s5159_s2] sm:$0xfe] %v709_v0  ;;  %v5339_v59 = vrot.slane %v3338_v14, 7  ;;  %v442_v50 = vadd.f32 %v396_v44, %v3413_v29  ;;  %v794_v62 = vmax.f32 %v2223_v20, 0.0  ;;  %v2224_v29 = vld [vmem:[%s5157_s0 + $0x2b0] sm:$0xff]  ;;  %v596_v2 = vld [vmem:[%s5159_s2 + $0x8] sm:$0xfe] }
  0x8f   :  { %v597_v32 = vld [vmem:[%s5159_s2 + $0x10] sm:$0xfe]  ;;  %468 = vst.msk [vmem:[%s5159_s2 + $0x30] sm:$0xff] %vm467_vm6, %v441_v6  ;;  %v3591_v60 = vmul.f32 %v2713_v9, %v48_v35  ;;  %v3594_v57 = vmul.f32 %v3218_v43, %v1548_v42  ;;  %v3597_v20 = vmul.f32 %v3228_v52, %v1547_v24  ;;  %v3600_v18 = vmul.f32 %v2717_v33, %v49_v13  ;;  %v361_v35 = vpop.permute.xlu1 %360  ;;  %v359_v43 = vpop.permute.xlu0 %358  ;;  %v3612_v52 = vld [vmem:[%s5157_s0 + $0x2a0] sm:$0xff]  ;;  %v2225_v33 = vld [vmem:[%s5157_s0 + $0x2b8] sm:$0xff] }
  0x90   :  { %v3558_v3 = vsel %vm299_vm0, %v5339_v59, %v5235_v56  ;;  %v5340_v44 = vrot.slane %v3289_v39, 7  ;;  %v5341_v59 = vrot.slane %v3300_v8, 7  ;;  %v5342_v6 = vrot.slane %v3303_v16, 7  ;;  %1694 = vrot.lane.b32.xlu1 %v3475_v40, %s2367_s5  ;;  %1692 = vrot.lane.b32.xlu0 %v3478_v28, %s2367_s5 }
  0x91   :  { %v716_v9 = vadd.f32 %v3420_v47, %v442_v50  ;;  %v397_v39 = vsel %vm390_vm4, %v357_v38, %v359_v43  ;;  %v398_v8 = vsel %vm390_vm4, %v359_v43, %v361_v35  ;;  %v3620_v16 = vmul.f32 %v2683_v4, %v50_v45  ;;  %v262_v4 = vld [vmem:[%s5159_s2 + $0x58] sm:$0xff] }
  0x92   :  { %v712_v17 = vadd.f32 %v5340_v44, %v598_v27  ;;  %v710_v56 = vadd.f32 %v5341_v59, %v596_v2  ;;  %v711_v0 = vadd.f32 %v5342_v6, %v597_v32  ;;  %v795_v42 = vmax.f32 %v2224_v29, 0.0  ;;  %v600_v40 = vld [vmem:[%s5159_s2 + $0x28] sm:$0xfe] }
  0x93   :  { %v443_v47 = vadd.f32 %v397_v39, %v3423_v53  ;;  %v444_v24 = vadd.f32 %v398_v8, %v3426_v37  ;;  %v3642_v13 = vadd.f32 %v3176_v63, %v716_v9  ;;  %v599_v53 = vld [vmem:[%s5159_s2 + $0x20] sm:$0xfe]  ;;  %v5343_v37 = vrot.slane %v3518_v23, 7  ;;  %v365_v59 = vpop.permute.xlu1 %364  ;;  %v363_v6 = vpop.permute.xlu0 %362 }
  0x94   :  { %736 = vst [vmem:[%s5159_s2 + $0x18] sm:$0xfe] %v712_v17  ;;  %734 = vst [vmem:[%s5159_s2 + $0x8] sm:$0xfe] %v710_v56  ;;  %v531_v56 = vmax.f32 %v3568_v34, 0.0  ;;  %v5344_v28 = vrot.slane %v3284_v41, 7  ;;  %v3657_v50 = vmul.f32 %v3023_v22, %v794_v62  ;;  %1698 = vrot.lane.b32.xlu1 %v3540_v49, %s2367_s5  ;;  %1696 = vrot.lane.b32.xlu0 %v3543_v12, %s2367_s5 }
  0x95   :  { %735 = vst [vmem:[%s5159_s2 + $0x10] sm:$0xfe] %v711_v0  ;;  %v793_v45 = vmax.f32 %v3612_v52, 0.0  ;;  %v796_v63 = vmax.f32 %v2225_v33, 0.0  ;;  %v864_v0 = vld [vmem:[%s5159_s2] sm:$0xfe]  ;;  %v717_v44 = vadd.f32 %v3465_v51, %v443_v47  ;;  %v718_v17 = vadd.f32 %v3472_v21, %v444_v24 }
  0x96   :  { %v919_v38 = vsel %vm299_vm0, %v5344_v28, %v5343_v37  ;;  %v5345_v29 = vrot.slane %v3320_v10, 7  ;;  %v5346_v2 = vrot.slane %v3338_v14, 7  ;;  %v2226_v62 = vld [vmem:[%s5157_s0 + $0x2c0] sm:$0xff]  ;;  %v5347_v9 = vmov %v5344_v28  ;;  %v3681_v21 = vld [vmem:[%s5157_s0 + $0x298] sm:$0xff]  ;;  %v601_v41 = vld [vmem:[%s5159_s2 + $0x30] sm:$0xff] }
  0x97   :  { %v978_v43 = vadd.f32 %v5347_v9, %v864_v0  ;;  %v399_v52 = vsel %vm390_vm4, %v361_v35, %v363_v6  ;;  %v400_v10 = vsel %vm390_vm4, %v363_v6, %v365_v59  ;;  %v27_v14 = vld [vmem:[%s5157_s0 + $0x80] sm:$0xff]  ;;  %5348 = vst [vmem:[#allocation8_spill] sm:$0xff] %v3681_v21  ;;  %v3684_v51 = vmul.f32 %v3039_v7, %v795_v42  ;;  %v369_v12 = vpop.permute.xlu1 %368  ;;  %v367_v24 = vpop.permute.xlu0 %366  ;;  %v5381_v34 = vld [vmem:[#allocation28_spill] sm:$0xff] }
  0x98   :  { %v713_v27 = vadd.f32 %v5345_v29, %v599_v53  ;;  %v714_v32 = vadd.f32 %v5346_v2, %v600_v40  ;;  %v445_v35 = vadd.f32 %v399_v52, %v3493_v61  ;;  %v446_v33 = vadd.f32 %v400_v10, %v262_v4  ;;  %1702 = vrot.lane.b32.xlu1 %v3594_v57, %s2367_s5  ;;  %v5358_v52 = vld [vmem:[#allocation35_spill] sm:$0xff] }
  0x99   :  { %v661_v39 = vrot.slane %v3546_v36, 7  ;;  %v3703_v8 = vadd.f32 %v3200_v19, %v717_v44  ;;  %1002 = vst [vmem:[%s5159_s2] sm:$0xfe] %v978_v43  ;;  %v715_v42 = vadd.f32 %v3410_v26, %v601_v41  ;;  %v3710_v61 = vadd.f32 %v3207_v54, %v718_v17  ;;  %v2201_v26 = vld [vmem:[%s5157_s0 + $0x208] sm:$0xff]  ;;  %1700 = vrot.lane.b32.xlu0 %v3597_v20, %s2367_s5 }
  0x9a   :  { %737 = vst [vmem:[%s5159_s2 + $0x20] sm:$0xfe] %v713_v27  ;;  %738 = vst.msk [vmem:[%s5159_s2 + $0x28] sm:$0xfe] %vm465_vm5, %v714_v32  ;;  %v3713_v47 = vmul.f32 %v3013_v31, %v796_v63  ;;  %v797_v49 = vmax.f32 %v2226_v62, 0.0  ;;  %v719_v19 = vadd.f32 %v3537_v1, %v445_v35  ;;  %v51_v4 = vmax.f32 %v27_v14, 0.0 }
  0x9b   :  { %5349 = vst [vmem:[#allocation9_spill] sm:$0xff] %v3703_v8  ;;  %5350 = vst [vmem:[#allocation10_spill] sm:$0xff] %v3710_v61  ;;  %v5236_v54 = vmax.f32 %v3681_v21, 0.0  ;;  %v932_v53 = vrot.slane %v3657_v50, 7  ;;  %v867_v40 = vld [vmem:[%s5159_s2 + $0x18] sm:$0xfe]  ;;  %v401_v28 = vsel %vm390_vm4, %v367_v24, %v369_v12  ;;  %v3736_v29 = vadd.f32 %v919_v38, %v715_v42  ;;  %v373_v38 = vpop.permute.xlu1 %372 }
  0x9c   :  { %473 = vst.msk [vmem:[%s5159_s2 + $0x58] sm:$0xff] %vm123_vm1, %v446_v33  ;;  %v865_v37 = vld [vmem:[%s5159_s2 + $0x8] sm:$0xfe]  ;;  %v866_v1 = vld [vmem:[%s5159_s2 + $0x10] sm:$0xfe]  ;;  %v5351_v63 = vld [vmem:[#allocation18_spill] sm:$0xff]  ;;  %v3739_v27 = vmul.f32 %v3257_v55, %v793_v45  ;;  %v448_v62 = vadd.f32 %v401_v28, %v3591_v60  ;;  %v371_v45 = vpop.permute.xlu0 %370  ;;  %v110_v43 = vmul.f32 %v2745_v11, %v51_v4 }
  0x9d   :  { %v447_v0 = vadd.f32 %v367_v24, %v5351_v63  ;;  %v5352_v2 = vrot.slane %v3070_v5, 7  ;;  %v5353_v44 = vrot.slane %v3074_v30, 7  ;;  %v5354_v59 = vrot.slane %v3090_v58, 7  ;;  %1008 = vst [vmem:[%s5159_s2 + $0x30] sm:$0xff] %v3736_v29  ;;  %v5356_v60 = vld [vmem:[#allocation29_spill] sm:$0xff]  ;;  %v5360_v11 = vld [vmem:[#allocation40_spill] sm:$0xff] }
  0x9e   :  { %v3761_v5 = vadd.f32 %v3214_v48, %v719_v19  ;;  %v934_v58 = vrot.slane %v3684_v51, 7  ;;  %v936_v30 = vrot.slane %v3713_v47, 7  ;;  %v3766_v57 = vmul.f32 %v5356_v60, %v797_v49  ;;  %v5357_v48 = vld [vmem:[#allocation20_spill] sm:$0xff]  ;;  %v5361_v24 = vld [vmem:[#allocation34_spill] sm:$0xff]  ;;  %v2341_v21 = vld [vmem:[%s5157_s0 + $0x248] sm:$0xff] }
  0x9f   :  { %v981_v32 = vadd.f32 %v5352_v2, %v867_v40  ;;  %v979_v17 = vadd.f32 %v5353_v44, %v865_v37  ;;  %v980_v6 = vadd.f32 %v5354_v59, %v866_v1  ;;  %474 = vst.msk [vmem:[%s5159_s2 + $0x60] sm:$0xff] %vm467_vm6, %v447_v0  ;;  %v722_v20 = vadd.f32 %v5357_v48, %v448_v62  ;;  %v5363_v40 = vld [vmem:[#allocation42_spill] sm:$0xff]  ;;  %v268_v0 = vld [vmem:[%s5159_s2 + $0x88] sm:$0xff]  ;;  %v5370_v48 = vld [vmem:[#allocation41_spill] sm:$0xff] }
  0xa0   :  { %5355 = vst [vmem:[#allocation11_spill] sm:$0xff] %v3761_v5  ;;  %v529_v9 = vmax.f32 %v2201_v26, 0.0  ;;  %v5359_v10 = vrot.slane %v5358_v52, 7  ;;  %v402_v33 = vsel %vm390_vm4, %v369_v12, %v371_v45  ;;  %v403_v42 = vsel %vm390_vm4, %v371_v45, %v373_v38  ;;  %v5372_v52 = vld [vmem:[#allocation25_spill] sm:$0xff]  ;;  %v5397_v47 = vld [vmem:[#allocation6_spill] sm:$0xff] }
  0xa1   :  { %1005 = vst [vmem:[%s5159_s2 + $0x18] sm:$0xfe] %v981_v32  ;;  %1003 = vst [vmem:[%s5159_s2 + $0x8] sm:$0xfe] %v979_v17  ;;  %v868_v41 = vld [vmem:[%s5159_s2 + $0x20] sm:$0xfe]  ;;  %v3795_v49 = vmul.f32 %v5360_v11, %v5236_v54  ;;  %v449_v28 = vadd.f32 %v402_v33, %v3600_v18  ;;  %v450_v63 = vadd.f32 %v403_v42, %v3620_v16  ;;  %v375_v33 = vpop.permute.xlu0 %374 }
  0xa2   :  { %1004 = vst [vmem:[%s5159_s2 + $0x10] sm:$0xfe] %v980_v6  ;;  %v933_v14 = vsel %vm299_vm0, %v5359_v10, %v932_v53  ;;  %v869_v35 = vld [vmem:[%s5159_s2 + $0x28] sm:$0xfe]  ;;  %v930_v19 = vrot.slane %v3739_v27, 7  ;;  %v5362_v26 = vrot.slane %v5361_v24, 7 }
  0xa3   :  { %v5364_v37 = vrot.slane %v5363_v40, 7  ;;  %v606_v12 = vld [vmem:[%s5159_s2 + $0x58] sm:$0xff]  ;;  %v3810_v2 = vadd.f32 %v933_v14, %v722_v20  ;;  %v5366_v32 = vld [vmem:[#allocation36_spill] sm:$0xff]  ;;  %v938_v6 = vrot.slane %v3766_v57, 7  ;;  %v5371_v20 = vrot.slane %v5370_v48, 7  ;;  %v5373_v14 = vld [vmem:[#allocation26_spill] sm:$0xff] }
  0xa4   :  { %v982_v4 = vadd.f32 %v5362_v26, %v868_v41  ;;  %v5367_v44 = vrot.slane %v5366_v32, 7  ;;  %v5368_v18 = vld [vmem:[#allocation37_spill] sm:$0xff]  ;;  %v720_v62 = vadd.f32 %v3558_v3, %v606_v12  ;;  %v723_v10 = vadd.f32 %v5372_v52, %v449_v28  ;;  %v2204_v42 = vld [vmem:[%s5157_s0 + $0x220] sm:$0x7]  ;;  %v2205_v3 = vld [vmem:[%s5157_s0 + $0x228] sm:$0x7] }
  0xa5   :  { %v983_v1 = vadd.f32 %v5364_v37, %v869_v35  ;;  %5365 = vst [vmem:[#allocation14_spill] sm:$0xff] %v3810_v2  ;;  %v5369_v16 = vrot.slane %v5368_v18, 7  ;;  %v662_v45 = vsel %vm299_vm0, %v5371_v20, %v661_v39  ;;  %v724_v41 = vadd.f32 %v5373_v14, %v450_v63  ;;  %v377_v35 = vpop.permute.xlu1 %376  ;;  %v5374_v24 = vld [vmem:[#allocation39_spill] sm:$0xff]  ;;  %v379_v52 = vpop.permute.xlu0 %378  ;;  %v2206_v14 = vld [vmem:[%s5157_s0 + $0x230] sm:$0x7] }
  0xa6   :  { %v935_v17 = vsel %vm299_vm0, %v5367_v44, %v934_v58  ;;  %1006 = vst [vmem:[%s5159_s2 + $0x20] sm:$0xfe] %v982_v4  ;;  %v3845_v26 = vmul.f32 %v5374_v24, %v529_v9  ;;  %v404_v4 = vsel %vm390_vm4, %v373_v38, %v375_v33  ;;  %v405_v37 = vsel %vm390_vm4, %v375_v33, %v377_v35  ;;  %v607_v9 = vld [vmem:[%s5159_s2 + $0x60] sm:$0xff]  ;;  %v269_v38 = vld [vmem:[%s5159_s2 + $0x90] sm:$0xf]  ;;  %v5378_v44 = vld [vmem:[#allocation13_spill] sm:$0xff] }
  0xa7   :  { %v937_v59 = vsel %vm299_vm0, %v5369_v16, %v936_v30  ;;  %1007 = vst.msk [vmem:[%s5159_s2 + $0x28] sm:$0xfe] %vm465_vm5, %v983_v1  ;;  %v5375_v1 = vrot.slane %v3518_v23, 7  ;;  %v451_v63 = vadd.f32 %v404_v4, %v110_v43  ;;  %v452_v12 = vadd.f32 %v405_v37, %v268_v0  ;;  %v5379_v0 = vld [vmem:[#allocation38_spill] sm:$0xff] }
  0xa8   :  { %744 = vst.msk [vmem:[%s5159_s2 + $0x58] sm:$0xff] %vm123_vm1, %v720_v62  ;;  %v3864_v32 = vadd.f32 %v935_v17, %v723_v10  ;;  %v3866_v23 = vadd.f32 %v937_v59, %v724_v41  ;;  %v590_v18 = vmul.f32 %v5378_v44, %v531_v56  ;;  %v721_v16 = vadd.f32 %v662_v45, %v607_v9  ;;  %v270_v62 = vld [vmem:[%s5159_s2 + $0x98] sm:$0xf]  ;;  %v2227_v10 = vld [vmem:[%s5157_s0 + $0x2c8] sm:$0xff] }
  0xa9   :  { %v931_v28 = vsel %vm299_vm0, %v5375_v1, %v930_v19  ;;  %v928_v43 = vrot.slane %v3795_v49, 7  ;;  %v5380_v48 = vrot.slane %v5379_v0, 7  ;;  %v532_v20 = vmax.f32 %v2204_v42, 0.0  ;;  %479 = vst.msk [vmem:[%s5159_s2 + $0x88] sm:$0xff] %vm123_vm1, %v452_v12  ;;  %v381_v45 = vpop.permute.xlu1 %380  ;;  %v2207_v41 = vld [vmem:[%s5157_s0 + $0x238] sm:$0x7] }
  0xaa   :  { %5376 = vst [vmem:[#allocation19_spill] sm:$0xff] %v3864_v32  ;;  %5377 = vst [vmem:[#allocation24_spill] sm:$0xff] %v3866_v23  ;;  %v533_v59 = vmax.f32 %v2205_v3, 0.0  ;;  %v725_v56 = vadd.f32 %v5381_v34, %v451_v63  ;;  %v671_v35 = vrot.slane %v3845_v26, 7  ;;  %v406_v33 = vsel %vm390_vm4, %v379_v52, %v381_v45  ;;  %v2228_v1 = vld [vmem:[%s5157_s0 + $0x2d0] sm:$0x7] }
  0xab   :  { %v939_v17 = vsel %vm299_vm0, %v5380_v48, %v938_v6  ;;  %v453_v42 = vadd.f32 %v379_v52, %v269_v38  ;;  %v3896_v3 = vadd.f32 %v931_v28, %v721_v16  ;;  %v673_v4 = vrot.slane %v3571_v46, 7  ;;  %v2229_v9 = vld [vmem:[%s5157_s0 + $0x2d8] sm:$0x7]  ;;  %v271_v46 = vld [vmem:[%s5159_s2 + $0xa0] sm:$0xf]  ;;  %v5385_v0 = vld [vmem:[#allocation16_spill] sm:$0xff] }
  0xac   :  { %v454_v37 = vadd.f32 %v406_v33, %v270_v62  ;;  %v3905_v63 = vadd.f32 %v939_v17, %v725_v56  ;;  %v675_v12 = vrot.slane %v590_v18, 7  ;;  %v272_v28 = vld [vmem:[%s5159_s2 + $0xa8] sm:$0xf]  ;;  %v5383_v38 = vrot.slane %v5363_v40, 7  ;;  %v5384_v16 = vld [vmem:[#allocation17_spill] sm:$0xff]  ;;  %v383_v40 = vpop.permute.xlu0 %382 }
  0xad   :  { %481 = vst.msk [vmem:[%s5159_s2 + $0x90] sm:$0xf] %vm480_vm7, %v453_v42  ;;  %1014 = vst [vmem:[%s5159_s2 + $0x60] sm:$0xff] %v3896_v3  ;;  %v798_v18 = vmax.f32 %v2227_v10, 0.0  ;;  %v591_v62 = vmul.f32 %v5384_v16, %v532_v20  ;;  %v592_v48 = vmul.f32 %v5385_v0, %v533_v59  ;;  %v534_v17 = vmax.f32 %v2206_v14, 0.0  ;;  %v385_v56 = vpop.permute.xlu1 %384 }
  0xae   :  { %5382 = vst [vmem:[#allocation12_spill] sm:$0xff] %v3905_v63  ;;  %v929_v44 = vsel %vm299_vm0, %v5383_v38, %v928_v43  ;;  %v535_v34 = vmax.f32 %v2207_v41, 0.0  ;;  %482 = vst [vmem:[%s5159_s2 + $0x98] sm:$0xf] %v454_v37  ;;  %v5386_v52 = vrot.slane %v3432_v25, 7  ;;  %v407_v10 = vsel %vm390_vm4, %v381_v45, %v383_v40  ;;  %v5387_v45 = vld [vmem:[#allocation15_spill] sm:$0xff] }
  0xaf   :  { %v408_v20 = vsel %vm390_vm4, %v383_v40, %v385_v56  ;;  %v875_v59 = vld [vmem:[%s5159_s2 + $0x58] sm:$0xff]  ;;  %v799_v14 = vmax.f32 %v2228_v1, 0.0  ;;  %v455_v41 = vadd.f32 %v407_v10, %v271_v46  ;;  %v800_v38 = vmax.f32 %v2229_v9, 0.0  ;;  %v2230_v16 = vld [vmem:[%s5157_s0 + $0x2e0] sm:$0x7]  ;;  %v1139_v50 = vld [vmem:[%s5159_s2 + $0x28] sm:$0xff] }
  0xb0   :  { %v672_v33 = vsel %vm299_vm0, %v5386_v52, %v671_v35  ;;  %v456_v42 = vadd.f32 %v408_v20, %v272_v28  ;;  %v989_v37 = vadd.f32 %v929_v44, %v875_v59  ;;  %v674_v25 = vsel %vm299_vm0, %v661_v39, %v673_v4  ;;  %v612_v1 = vld [vmem:[%s5159_s2 + $0x88] sm:$0xff]  ;;  %v273_v9 = vld [vmem:[%s5159_s2 + $0xb0] sm:$0xf]  ;;  %v274_v46 = vld [vmem:[%s5159_s2 + $0xb8] sm:$0xf]  ;;  %v387_v10 = vpop.permute.xlu0 %386 }
  0xb1   :  { %v5388_v0 = vrot.slane %v5387_v45, 7  ;;  %v3960_v36 = vmul.f32 %v5360_v11, %v798_v18  ;;  %v677_v39 = vrot.slane %v591_v62, 7  ;;  %v679_v4 = vrot.slane %v592_v48, 7  ;;  %v5389_v28 = vld [vmem:[#allocation21_spill] sm:$0xff]  ;;  %483 = vst [vmem:[%s5159_s2 + $0xa0] sm:$0xf] %v455_v41  ;;  %v389_v52 = vpop.permute.xlu1 %388 }
  0xb2   :  { %v593_v44 = vmul.f32 %v5389_v28, %v534_v17  ;;  %484 = vst [vmem:[%s5159_s2 + $0xa8] sm:$0xf] %v456_v42  ;;  %1013 = vst.msk [vmem:[%s5159_s2 + $0x58] sm:$0xff] %vm123_vm1, %v989_v37  ;;  %v2231_v18 = vld [vmem:[%s5157_s0 + $0x2e8] sm:$0x7]  ;;  %v594_v62 = vmul.f32 %v5374_v24, %v535_v34  ;;  %v409_v48 = vsel %vm390_vm4, %v385_v56, %v387_v10  ;;  %v2262_v41 = vld [vmem:[%s5157_s0 + $0xc0] sm:$0xff] }
  0xb3   :  { %v676_v40 = vsel %vm299_vm0, %v5388_v0, %v675_v12  ;;  %v726_v12 = vadd.f32 %v672_v33, %v612_v1  ;;  %v410_v17 = vsel %vm390_vm4, %v387_v10, %v389_v52  ;;  %v2286_v33 = vld [vmem:[%s5158_s1 + $0x5] ss:$8 sm:$0xf]  ;;  %v858_v59 = vmul.f32 %v3257_v55, %v799_v14 }
  0xb4   :  { %v2287_v20 = vld [vmem:[%s5158_s1 + $0x5] ss:$8 sm:$0x30]  ;;  %v613_v24 = vld [vmem:[%s5159_s2 + $0x90] sm:$0xf]  ;;  %v457_v34 = vadd.f32 %v409_v48, %v273_v9  ;;  %v458_v56 = vadd.f32 %v410_v17, %v274_v46  ;;  %v859_v42 = vmul.f32 %v3023_v22, %v800_v38  ;;  %v801_v37 = vmax.f32 %v2230_v16, 0.0  ;;  %v4016_v38 = vpop.permute.xlu0 %1182 }
  0xb5   :  { %750 = vst.msk [vmem:[%s5159_s2 + $0x88] sm:$0xff] %vm123_vm1, %v726_v12  ;;  %v614_v55 = vld [vmem:[%s5159_s2 + $0x98] sm:$0xf]  ;;  %v727_v14 = vadd.f32 %v674_v25, %v613_v24  ;;  %v802_v45 = vmax.f32 %v2231_v18, 0.0  ;;  %v940_v0 = vrot.slane %v3960_v36, 7  ;;  %v5390_v1 = vld [vmem:[#allocation22_spill] sm:$0xff]  ;;  %v4014_v22 = vpop.permute.xlu1 %1184  ;;  %v4021_v25 = vor.u32 %v2287_v20, %v2286_v33 }
  0xb6   :  { %v5391_v28 = vrot.slane %v5390_v1, 7  ;;  %v5392_v46 = vld [vmem:[#allocation23_spill] sm:$0xff]  ;;  %v728_v10 = vadd.f32 %v676_v40, %v614_v55  ;;  %485 = vst [vmem:[%s5159_s2 + $0xb0] sm:$0xf] %v457_v34  ;;  %486 = vst.msk [vmem:[%s5159_s2 + $0xb8] sm:$0xf] %vm142_vm2, %v458_v56 }
  0xb7   :  { %v5393_v12 = vrot.slane %v5392_v46, 7  ;;  %v1134_v16 = vld [vmem:[%s5159_s2] sm:$0xff]  ;;  %v2232_v40 = vld [vmem:[%s5157_s0 + $0x2f0] sm:$0x7]  ;;  %v683_v18 = vrot.slane %v594_v62, 7  ;;  %v1346_v17 = vmax.f32 %v2262_v41, 0.0  ;;  %v861_v41 = vmul.f32 %v3013_v31, %v802_v45 }
  0xb8   :  { %v678_v9 = vsel %vm299_vm0, %v5391_v28, %v677_v39  ;;  %v2233_v39 = vld [vmem:[%s5157_s0 + $0x2f8] sm:$0x7]  ;;  %751 = vst [vmem:[%s5159_s2 + $0x90] sm:$0xf] %v727_v14  ;;  %v1274_v48 = vadd.f32 %v4016_v38, %v1134_v16  ;;  %752 = vst [vmem:[%s5159_s2 + $0x98] sm:$0xf] %v728_v10  ;;  %v4059_v1 = vpop.permute.xlu0 %1186 }
  0xb9   :  { %v680_v52 = vsel %vm299_vm0, %v5393_v12, %v679_v4  ;;  %v681_v4 = vrot.slane %v593_v44, 7  ;;  %v5394_v33 = vld [vmem:[#allocation3_spill] sm:$0xff]  ;;  %v942_v24 = vrot.slane %v858_v59, 7  ;;  %v944_v34 = vrot.slane %v859_v42, 7  ;;  %v615_v62 = vld [vmem:[%s5159_s2 + $0xa0] sm:$0xf]  ;;  %v4057_v14 = vpop.permute.xlu1 %1188 }
  0xba   :  { %v4038_v20 = vrot.slane %v4021_v25, %v5394_v33  ;;  %v860_v44 = vmul.f32 %v3039_v7, %v801_v37  ;;  %v616_v56 = vld [vmem:[%s5159_s2 + $0xa8] sm:$0xf]  ;;  %1298 = vst.msk [vmem:[%s5159_s2] sm:$0xff] %vm467_vm6, %v1274_v48  ;;  %v803_v55 = vmax.f32 %v2232_v40, 0.0  ;;  %v804_v59 = vmax.f32 %v2233_v39, 0.0 }
  0xbb   :  { %v941_v7 = vsel %vm299_vm0, %v928_v43, %v940_v0  ;;  %v729_v42 = vadd.f32 %v678_v9, %v615_v62  ;;  %v730_v37 = vadd.f32 %v680_v52, %v616_v56  ;;  %v5395_v28 = vld [vmem:[#allocation27_spill] sm:$0xff]  ;;  %v684_v31 = vsel %vm299_vm0, %v671_v35, %v683_v18 }
  0xbc   :  { %v5396_v46 = vrot.slane %v5395_v28, 7  ;;  %v881_v49 = vld [vmem:[%s5159_s2 + $0x88] sm:$0xff]  ;;  %v1405_v43 = vmul.f32 %v4038_v20, %v1346_v17  ;;  %v943_v26 = vsel %vm299_vm0, %v930_v19, %v942_v24  ;;  %v946_v45 = vrot.slane %v860_v44, 7  ;;  %v4091_v18 = vpop.permute.xlu0 %1190 }
  0xbd   :  { %753 = vst [vmem:[%s5159_s2 + $0xa0] sm:$0xf] %v729_v42  ;;  %754 = vst [vmem:[%s5159_s2 + $0xa8] sm:$0xf] %v730_v37  ;;  %v995_v35 = vadd.f32 %v941_v7, %v881_v49  ;;  %v617_v9 = vld [vmem:[%s5159_s2 + $0xb0] sm:$0xf]  ;;  %v945_v10 = vsel %vm299_vm0, %v932_v53, %v944_v34  ;;  %v862_v40 = vmul.f32 %v5356_v60, %v803_v55 }
  0xbe   :  { %v682_v12 = vsel %vm299_vm0, %v5396_v46, %v681_v4  ;;  %v618_v52 = vld [vmem:[%s5159_s2 + $0xb8] sm:$0xf]  ;;  %v948_v16 = vrot.slane %v861_v41, 7  ;;  %v863_v27 = vmul.f32 %v5360_v11, %v804_v59  ;;  %v1193_v4 = vpop.permute.xlu1 %1192  ;;  %v2267_v17 = vld [vmem:[%s5157_s0 + $0xe8] sm:$0xff]  ;;  %v947_v62 = vsel %vm299_vm0, %v934_v58, %v946_v45  ;;  %v2268_v58 = vld [vmem:[%s5157_s0 + $0xf0] sm:$0xff] }
  0xbf   :  { %v731_v19 = vadd.f32 %v682_v12, %v617_v9  ;;  %v732_v39 = vadd.f32 %v684_v31, %v618_v52  ;;  %v882_v48 = vld [vmem:[%s5159_s2 + $0x90] sm:$0xf]  ;;  %1019 = vst.msk [vmem:[%s5159_s2 + $0x88] sm:$0xff] %vm123_vm1, %v995_v35  ;;  %v1234_v53 = vsel %vm390_vm4, %v4091_v18, %v1193_v4  ;;  %v883_v60 = vld [vmem:[%s5159_s2 + $0x98] sm:$0xf]  ;;  %v950_v55 = vrot.slane %v862_v40, 7 }
  0xc0   :  { %v996_v11 = vadd.f32 %v943_v26, %v882_v48  ;;  %v1279_v24 = vadd.f32 %v1234_v53, %v1139_v50  ;;  %v997_v44 = vadd.f32 %v945_v10, %v883_v60  ;;  %v949_v41 = vsel %vm299_vm0, %v936_v30, %v948_v16  ;;  %v4141_v7 = vpop.permute.xlu0 %1194  ;;  %v2274_v35 = vld [vmem:[%s5157_s0 + $0x120] sm:$0xff]  ;;  %v2281_v16 = vld [vmem:[%s5157_s0 + $0x158] sm:$0xf]  ;;  %v2283_v4 = vld [vmem:[%s5157_s0 + $0x168] sm:$0xf] }
  0xc1   :  { %755 = vst [vmem:[%s5159_s2 + $0xb0] sm:$0xf] %v731_v19  ;;  %756 = vst.msk [vmem:[%s5159_s2 + $0xb8] sm:$0xf] %vm142_vm2, %v732_v39  ;;  %v1429_v34 = vld [vmem:[%s5159_s2] sm:$0xff]  ;;  %v952_v59 = vrot.slane %v863_v27, 7  ;;  %v4148_v30 = vrot.slane %v4021_v25, %v5397_v47  ;;  %v1280_v37 = vadd.f32 %v4141_v7, %v3736_v29  ;;  %v951_v29 = vsel %vm299_vm0, %v938_v6, %v950_v55 }
  0xc2   :  { %v4124_v56 = vadd.f32 %v1429_v34, %v1405_v43  ;;  %1020 = vst [vmem:[%s5159_s2 + $0x90] sm:$0xf] %v996_v11  ;;  %1303 = vst.msk [vmem:[%s5159_s2 + $0x28] sm:$0xff] %vm123_vm1, %v1279_v24  ;;  %v4136_v51 = vpop.permute.xlu1 %1196  ;;  %v1351_v42 = vmax.f32 %v2267_v17, 0.0  ;;  %v1352_v49 = vmax.f32 %v2268_v58, 0.0  ;;  %v2263_v50 = vld [vmem:[%s5157_s0 + $0xc8] sm:$0xff] }
  0xc3   :  { %1021 = vst [vmem:[%s5159_s2 + $0x98] sm:$0xf] %v997_v44  ;;  %1304 = vst.msk [vmem:[%s5159_s2 + $0x30] sm:$0xff] %vm467_vm6, %v1280_v37  ;;  %v953_v43 = vsel %vm299_vm0, %v940_v0, %v952_v59  ;;  %v2280_v0 = vld [vmem:[%s5157_s0 + $0x150] sm:$0xf]  ;;  %v2265_v60 = vld [vmem:[%s5157_s0 + $0xd8] sm:$0xff] }
  0xc4   :  { %1477 = vst [vmem:[%s5159_s2] sm:$0xff] %v4124_v56  ;;  %v884_v28 = vld [vmem:[%s5159_s2 + $0xa0] sm:$0xf]  ;;  %v885_v46 = vld [vmem:[%s5159_s2 + $0xa8] sm:$0xf]  ;;  %v4174_v45 = vpop.permute.xlu0 %1198  ;;  %v1410_v57 = vmul.f32 %v4148_v30, %v1351_v42  ;;  %v1411_v10 = vmul.f32 %v4038_v20, %v1352_v49  ;;  %v2284_v48 = vld [vmem:[%s5157_s0 + $0x170] sm:$0xf] }
  0xc5   :  { %v998_v12 = vadd.f32 %v947_v62, %v884_v28  ;;  %v999_v31 = vadd.f32 %v949_v41, %v885_v46  ;;  %v2282_v40 = vld [vmem:[%s5157_s0 + $0x160] sm:$0xf]  ;;  %v2264_v53 = vld [vmem:[%s5157_s0 + $0xd0] sm:$0xff]  ;;  %v1364_v17 = vmax.f32 %v2280_v0, 0.0  ;;  %v1145_v24 = vld [vmem:[%s5159_s2 + $0x58] sm:$0xff]  ;;  %v1358_v44 = vmax.f32 %v2274_v35, 0.0 }
  0xc6   :  { %v4172_v26 = vpop.permute.xlu1 %1200  ;;  %v2285_v62 = vld [vmem:[%s5157_s0 + $0x178] sm:$0xf]  ;;  %v1365_v58 = vmax.f32 %v2281_v16, 0.0  ;;  %v1366_v28 = vmax.f32 %v2282_v40, 0.0  ;;  %v5402_v49 = vld [vmem:[#allocation2_spill] sm:$0xff]  ;;  %v5405_v35 = vld [vmem:[#allocation4_spill] sm:$0xff] }
  0xc7   :  { %1022 = vst [vmem:[%s5159_s2 + $0xa0] sm:$0xf] %v998_v12  ;;  %1023 = vst [vmem:[%s5159_s2 + $0xa8] sm:$0xf] %v999_v31  ;;  %v2273_v41 = vld [vmem:[%s5157_s0 + $0x118] sm:$0xff]  ;;  %v1367_v31 = vmax.f32 %v2283_v4, 0.0 }
  0xc8   :  { %v886_v6 = vld [vmem:[%s5159_s2 + $0xb0] sm:$0xf]  ;;  %v887_v36 = vld [vmem:[%s5159_s2 + $0xb8] sm:$0xf]  ;;  %v4205_v39 = vpop.permute.xlu0 %1202 }
  0xc9   :  { %v1000_v9 = vadd.f32 %v951_v29, %v886_v6  ;;  %v1001_v52 = vadd.f32 %v953_v43, %v887_v36  ;;  %v1434_v27 = vld [vmem:[%s5159_s2 + $0x28] sm:$0xff]  ;;  %5398 = vst [vmem:[#allocation18_spill] sm:$0xff] %v4205_v39  ;;  %v5399_v42 = vld [vmem:[#allocation5_spill] sm:$0xff]  ;;  %v4258_v29 = vrot.slane %v4021_v25, %v5402_v49  ;;  %v1368_v43 = vmax.f32 %v2284_v48, 0.0 }
  0xca   :  { %v1205_v19 = vpop.permute.xlu1 %1204  ;;  %v1458_v11 = vadd.f32 %v1434_v27, %v1410_v57  ;;  %v1435_v55 = vld [vmem:[%s5159_s2 + $0x30] sm:$0xff]  ;;  %v4245_v37 = vrot.slane %v4021_v25, %v5399_v42  ;;  %v2266_v57 = vld [vmem:[%s5157_s0 + $0xe0] sm:$0xff]  ;;  %v2269_v40 = vld [vmem:[%s5157_s0 + $0xf8] sm:$0xff]  ;;  %v1347_v48 = vmax.f32 %v2263_v50, 0.0 }
  0xcb   :  { %1024 = vst [vmem:[%s5159_s2 + $0xb0] sm:$0xf] %v1000_v9  ;;  %1025 = vst.msk [vmem:[%s5159_s2 + $0xb8] sm:$0xf] %vm142_vm2, %v1001_v52  ;;  %v1239_v34 = vsel %vm390_vm4, %v4205_v39, %v1205_v19  ;;  %v4254_v12 = vadd.f32 %v1435_v55, %v1411_v10  ;;  %v4276_v9 = vrot.slane %v4021_v25, %v5405_v35  ;;  %v1369_v52 = vmax.f32 %v2285_v62, 0.0  ;;  %v5407_v10 = vld [vmem:[#allocation7_spill] sm:$0xff] }
  0xcc   :  { %v1285_v59 = vadd.f32 %v1239_v34, %v1145_v24  ;;  %5400 = vst [vmem:[#allocation29_spill] sm:$0xff] %v4245_v37  ;;  %1482 = vst.msk [vmem:[%s5159_s2 + $0x28] sm:$0xff] %vm123_vm1, %v1458_v11  ;;  %v2338_v46 = vld [vmem:[%s5158_s1 + $0x7] ss:$8 sm:$0xf]  ;;  %v4272_v0 = vpop.permute.xlu0 %1206  ;;  %v4280_v16 = vrot.slane %v4021_v25, %v5407_v10  ;;  %v1357_v19 = vmax.f32 %v2273_v41, 0.0  ;;  %v4298_v34 = vmul.f32 %v4038_v20, %v1364_v17 }
  0xcd   :  { %5401 = vst [vmem:[#allocation20_spill] sm:$0xff] %v4254_v12  ;;  %v2339_v6 = vld [vmem:[%s5158_s1 + $0x7] ss:$8 sm:$0x30]  ;;  %5404 = vst [vmem:[#allocation40_spill] sm:$0xff] %v4272_v0  ;;  %v1286_v4 = vadd.f32 %v4272_v0, %v3896_v3  ;;  %v1348_v25 = vmax.f32 %v2264_v53, 0.0  ;;  %v1417_v62 = vmul.f32 %v4038_v20, %v1358_v44  ;;  %v4302_v41 = vmul.f32 %v4245_v37, %v1365_v58 }
  0xce   :  { %1309 = vst.msk [vmem:[%s5159_s2 + $0x58] sm:$0xff] %vm123_vm1, %v1285_v59  ;;  %v4270_v36 = vpop.permute.xlu1 %1208  ;;  %5406 = vst [vmem:[#allocation34_spill] sm:$0xff] %v4276_v9  ;;  %v2364_v27 = vld [vmem:[%s5158_s1 + $0x30] ss:$8 sm:$0xf]  ;;  %v1349_v11 = vmax.f32 %v2265_v60, 0.0  ;;  %v4307_v3 = vor.u32 %v2339_v6, %v2338_v46  ;;  %v4314_v50 = vmul.f32 %v4258_v29, %v1366_v28  ;;  %v4317_v53 = vmul.f32 %v4276_v9, %v1367_v31 }
  0xcf   :  { %5403 = vst [vmem:[#allocation35_spill] sm:$0xff] %v4270_v36  ;;  %1483 = vst [vmem:[%s5159_s2 + $0x30] sm:$0xff] %v4254_v12  ;;  %v2365_v24 = vld [vmem:[%s5158_s1 + $0x30] ss:$8 sm:$0x30]  ;;  %v2314_v55 = vld [vmem:[%s5157_s0 + $0x180] sm:$0xff]  ;;  %v4320_v20 = vmul.f32 %v4280_v16, %v1368_v43  ;;  %v4333_v28 = vmul.f32 %v4148_v30, %v1369_v52  ;;  %v1416_v6 = vmul.f32 %v4148_v30, %v1357_v19 }
  0xd0   :  { %1310 = vst.msk [vmem:[%s5159_s2 + $0x60] sm:$0xff] %vm467_vm6, %v1286_v4  ;;  %v1350_v60 = vmax.f32 %v2266_v57, 0.0  ;;  %v2315_v17 = vld [vmem:[%s5157_s0 + $0x188] sm:$0xff]  ;;  %v2320_v44 = vld [vmem:[%s5157_s0 + $0x1b0] sm:$0xff]  ;;  %v4330_v58 = vpop.permute.xlu0 %1210  ;;  %v1353_v46 = vmax.f32 %v2269_v40, 0.0  ;;  %v2321_v31 = vld [vmem:[%s5157_s0 + $0x1b8] sm:$0xff]  ;;  %v4341_v57 = vor.u32 %v2365_v24, %v2364_v27  ;;  %v4345_v4 = vmul.f32 %v4245_v37, %v1347_v48 }
  0xd1   :  { %5409 = vst [vmem:[#allocation36_spill] sm:$0xff] %v4330_v58  ;;  %v2340_v43 = vld [vmem:[%s5157_s0 + $0x240] sm:$0xff]  ;;  %v4348_v54 = vmul.f32 %v4258_v29, %v1348_v25  ;;  %v4351_v52 = vmul.f32 %v4276_v9, %v1349_v11  ;;  %v1820_v40 = vmax.f32 %v2314_v55, 0.0  ;;  %v1821_v63 = vmax.f32 %v2315_v17, 0.0  ;;  %v2271_v25 = vld [vmem:[%s5157_s0 + $0x108] sm:$0xff]  ;;  %v2316_v11 = vld [vmem:[%s5157_s0 + $0x190] sm:$0xff] }
  0xd2   :  { %v4328_v59 = vpop.permute.xlu1 %1212  ;;  %v1826_v23 = vmax.f32 %v2320_v44, 0.0  ;;  %v4358_v27 = vrot.slane %v4307_v3, %v5394_v33  ;;  %v4362_v19 = vrot.slane %v4307_v3, %v5399_v42  ;;  %v2270_v48 = vld [vmem:[%s5157_s0 + $0x100] sm:$0xff]  ;;  %v4374_v24 = vmul.f32 %v4280_v16, %v1350_v60 }
  0xd3   :  { %5408 = vst [vmem:[#allocation42_spill] sm:$0xff] %v4328_v59  ;;  %v1827_v55 = vmax.f32 %v2321_v31, 0.0  ;;  %v1999_v17 = vmax.f32 %v2340_v43, 0.0  ;;  %v4378_v44 = vrot.slane %v4341_v57, %v5394_v33  ;;  %v4386_v2 = vmul.f32 %v4245_v37, %v1353_v46  ;;  %v2317_v33 = vld [vmem:[%s5157_s0 + $0x198] sm:$0xff]  ;;  %v1151_v43 = vld [vmem:[%s5159_s2 + $0x88] sm:$0xff] }
  0xd4   :  { %5410 = vst [vmem:[#allocation37_spill] sm:$0xff] %v4358_v27  ;;  %5411 = vst [vmem:[#allocation41_spill] sm:$0xff] %v4362_v19  ;;  %v4383_v58 = vpop.permute.xlu0 %1214  ;;  %v2000_v0 = vmax.f32 %v2341_v21, 0.0  ;;  %v4390_v60 = vrot.slane %v4341_v57, %v5399_v42  ;;  %v1354_v5 = vmax.f32 %v2270_v48, 0.0  ;;  %v1355_v46 = vmax.f32 %v2271_v25, 0.0  ;;  %v2279_v21 = vld [vmem:[%s5157_s0 + $0x148] sm:$0xff] }
  0xd5   :  { %5412 = vst [vmem:[#allocation25_spill] sm:$0xff] %v4378_v44  ;;  %v1440_v32 = vld [vmem:[%s5159_s2 + $0x58] sm:$0xff]  ;;  %5413 = vst [vmem:[#allocation26_spill] sm:$0xff] %v4383_v58  ;;  %v1822_v37 = vmax.f32 %v2316_v11, 0.0  ;;  %v2322_v48 = vld [vmem:[%s5157_s0 + $0x1c0] sm:$0xff] }
  0xd6   :  { %v1217_v59 = vpop.permute.xlu1 %1216  ;;  %5414 = vst [vmem:[#allocation39_spill] sm:$0xff] %v4390_v60  ;;  %v1464_v31 = vadd.f32 %v1440_v32, %v1416_v6  ;;  %v4407_v32 = vmul.f32 %v4358_v27, %v1820_v40  ;;  %v4410_v6 = vmul.f32 %v4362_v19, %v1821_v63  ;;  %v4428_v63 = vmul.f32 %v4378_v44, %v1999_v17 }
  0xd7   :  { %v1244_v36 = vsel %vm390_vm4, %v4383_v58, %v1217_v59  ;;  %v1441_v42 = vld [vmem:[%s5159_s2 + $0x60] sm:$0xff]  ;;  %v4413_v59 = vmul.f32 %v4358_v27, %v1826_v23  ;;  %v2323_v23 = vld [vmem:[%s5157_s0 + $0x1c8] sm:$0xff]  ;;  %v1823_v40 = vmax.f32 %v2317_v33, 0.0  ;;  %v4445_v17 = vrot.slane %v4307_v3, %v5402_v49 }
  0xd8   :  { %v1291_v12 = vadd.f32 %v1244_v36, %v1151_v43  ;;  %1488 = vst.msk [vmem:[%s5159_s2 + $0x58] sm:$0xff] %vm123_vm1, %v1464_v31  ;;  %v4422_v25 = vadd.f32 %v1441_v42, %v1417_v62  ;;  %v4425_v36 = vmul.f32 %v4362_v19, %v1827_v55  ;;  %5418 = vst [vmem:[#allocation17_spill] sm:$0xff] %v4428_v63  ;;  %v1219_v31 = vpop.permute.xlu0 %1218  ;;  %v1152_v62 = vld [vmem:[%s5159_s2 + $0x90] sm:$0xf]  ;;  %v2343_v43 = vld [vmem:[%s5157_s0 + $0x258] sm:$0xff]  ;;  %v1363_v42 = vmax.f32 %v2279_v21, 0.0 }
  0xd9   :  { %5415 = vst [vmem:[#allocation13_spill] sm:$0xff] %v4413_v59  ;;  %v4441_v55 = vmul.f32 %v4390_v60, %v2000_v0  ;;  %5419 = vst [vmem:[#allocation16_spill] sm:$0xff] %v4445_v17  ;;  %v4449_v33 = vrot.slane %v4307_v3, %v5405_v35  ;;  %v1153_v0 = vld [vmem:[%s5159_s2 + $0x98] sm:$0xf]  ;;  %v1292_v58 = vadd.f32 %v1219_v31, %v1152_v62  ;;  %v5421_v59 = vmax.f32 %v3393_v15, 0.0  ;;  %v5423_v21 = vld [vmem:[#allocation30_spill] sm:$0xff] }
  0xda   :  { %5416 = vst [vmem:[#allocation38_spill] sm:$0xff] %v4422_v25  ;;  %5417 = vst [vmem:[#allocation28_spill] sm:$0xff] %v4425_v36  ;;  %v1221_v11 = vpop.permute.xlu1 %1220  ;;  %v1828_v36 = vmax.f32 %v2322_v48, 0.0  ;;  %v5424_v39 = vmax.f32 %v5423_v21, 0.0  ;;  %v1829_v8 = vmax.f32 %v2323_v23, 0.0  ;;  %v4499_v48 = vmul.f32 %v4276_v9, %v1355_v46  ;;  %v2318_v23 = vld [vmem:[%s5157_s0 + $0x1a0] sm:$0xff] }
  0xdb   :  { %1315 = vst.msk [vmem:[%s5159_s2 + $0x88] sm:$0xff] %vm123_vm1, %v1291_v12  ;;  %5420 = vst [vmem:[#allocation15_spill] sm:$0xff] %v4449_v33  ;;  %v2342_v12 = vld [vmem:[%s5157_s0 + $0x250] sm:$0xff]  ;;  %v1245_v27 = vsel %vm390_vm4, %v1219_v31, %v1221_v11  ;;  %v4468_v19 = vmul.f32 %v4378_v44, %v5421_v59  ;;  %v2002_v31 = vmax.f32 %v2343_v43, 0.0  ;;  %v4484_v59 = vrot.slane %v4341_v57, %v5402_v49  ;;  %v1154_v46 = vld [vmem:[%s5159_s2 + $0xa0] sm:$0xf] }
  0xdc   :  { %1489 = vst [vmem:[%s5159_s2 + $0x60] sm:$0xff] %v4422_v25  ;;  %v1293_v63 = vadd.f32 %v1245_v27, %v1153_v0  ;;  %v4473_v61 = vmul.f32 %v4390_v60, %v5424_v39  ;;  %v4476_v25 = vmul.f32 %v4258_v29, %v1354_v5  ;;  %1316 = vst.msk [vmem:[%s5159_s2 + $0x90] sm:$0xf] %vm480_vm7, %v1292_v58  ;;  %v2001_v15 = vmax.f32 %v2342_v12, 0.0  ;;  %v4493_v5 = vld [vmem:[%s5157_s0 + $0x110] sm:$0xff]  ;;  %v1223_v58 = vpop.permute.xlu0 %1222  ;;  %v2319_v21 = vld [vmem:[%s5157_s0 + $0x1a8] sm:$0xff] }
  0xdd   :  { %5422 = vst [vmem:[#allocation21_spill] sm:$0xff] %v4468_v19  ;;  %5425 = vst [vmem:[#allocation22_spill] sm:$0xff] %v4484_v59  ;;  %v4488_v27 = vrot.slane %v4341_v57, %v5405_v35  ;;  %v4502_v49 = vmul.f32 %v4445_v17, %v1822_v37  ;;  %v4505_v35 = vmul.f32 %v4449_v33, %v1823_v40  ;;  %v1155_v37 = vld [vmem:[%s5159_s2 + $0xa8] sm:$0xf] }
  0xde   :  { %1317 = vst [vmem:[%s5159_s2 + $0x98] sm:$0xf] %v1293_v63  ;;  %v1225_v39 = vpop.permute.xlu1 %1224  ;;  %v1422_v62 = vmul.f32 %v4148_v30, %v1363_v42  ;;  %v1230_v63 = vsel %vm390_vm4, %v4016_v38, %v4014_v22  ;;  %v1246_v40 = vsel %vm390_vm4, %v1221_v11, %v1223_v58  ;;  %v4523_v43 = vmul.f32 %v4445_v17, %v1828_v36  ;;  %v1135_v11 = vld [vmem:[%s5159_s2 + $0x8] sm:$0xff] }
  0xdf   :  { %v1247_v12 = vsel %vm390_vm4, %v1223_v58, %v1225_v39  ;;  %v1294_v30 = vadd.f32 %v1246_v40, %v1154_v46  ;;  %v4526_v0 = vmul.f32 %v4449_v33, %v1829_v8  ;;  %v1356_v38 = vmax.f32 %v4493_v5, 0.0  ;;  %v5426_v46 = vld [vmem:[#allocation31_spill] sm:$0xff]  ;;  %v2324_v5 = vld [vmem:[%s5157_s0 + $0x1d0] sm:$0xff] }
  0xe0   :  { %v1295_v42 = vadd.f32 %v1247_v12, %v1155_v37  ;;  %v4536_v58 = vmul.f32 %v4484_v59, %v2001_v15  ;;  %v4539_v36 = vmul.f32 %v4488_v27, %v2002_v31  ;;  %v5427_v37 = vmax.f32 %v5426_v46, 0.0  ;;  %v1227_v46 = vpop.permute.xlu0 %1226 }
  0xe1   :  { %v1824_v40 = vmax.f32 %v2318_v23, 0.0  ;;  %v1275_v44 = vadd.f32 %v1230_v63, %v1135_v11  ;;  %v1231_v15 = vsel %vm390_vm4, %v4014_v22, %v4059_v1  ;;  %v1232_v31 = vsel %vm390_vm4, %v4059_v1, %v4057_v14  ;;  %1318 = vst [vmem:[%s5159_s2 + $0xa0] sm:$0xf] %v1294_v30  ;;  %v1156_v63 = vld [vmem:[%s5159_s2 + $0xb0] sm:$0xf]  ;;  %v2325_v30 = vld [vmem:[%s5157_s0 + $0x1d8] sm:$0xff] }
  0xe2   :  { %v4544_v8 = vmul.f32 %v4484_v59, %v5427_v37  ;;  %v1446_v12 = vld [vmem:[%s5159_s2 + $0x88] sm:$0xff]  ;;  %1319 = vst [vmem:[%s5159_s2 + $0xa8] sm:$0xf] %v1295_v42  ;;  %v1229_v23 = vpop.permute.xlu1 %1228  ;;  %v1157_v22 = vld [vmem:[%s5159_s2 + $0xb8] sm:$0xf]  ;;  %v1248_v1 = vsel %vm390_vm4, %v1225_v39, %v1227_v46  ;;  %v1825_v42 = vmax.f32 %v2319_v21, 0.0  ;;  %v4590_v21 = vrot.slane %v4307_v3, %v5397_v47 }
  0xe3   :  { %v1470_v37 = vadd.f32 %v1446_v12, %v1422_v62  ;;  %v1249_v11 = vsel %vm390_vm4, %v1227_v46, %v1229_v23  ;;  %v4577_v62 = vrot.slane %v4307_v3, %v5407_v10  ;;  %v1136_v12 = vld [vmem:[%s5159_s2 + $0x10] sm:$0xff]  ;;  %v1137_v59 = vld [vmem:[%s5159_s2 + $0x18] sm:$0xff]  ;;  %v1296_v23 = vadd.f32 %v1248_v1, %v1156_v63  ;;  %v2344_v3 = vld [vmem:[%s5157_s0 + $0x260] sm:$0xff] }
  0xe4   :  { %v1447_v39 = vld [vmem:[%s5159_s2 + $0x90] sm:$0xf]  ;;  %v1297_v46 = vadd.f32 %v1249_v11, %v1157_v22  ;;  %v1830_v33 = vmax.f32 %v2324_v5, 0.0  ;;  %v1276_v17 = vadd.f32 %v1231_v15, %v1136_v12  ;;  %v1277_v60 = vadd.f32 %v1232_v31, %v1137_v59  ;;  %v1657_v31 = vpop.permute.xlu0 %1656  ;;  %v1138_v11 = vld [vmem:[%s5159_s2 + $0x20] sm:$0xff] }
  0xe5   :  { %1494 = vst.msk [vmem:[%s5159_s2 + $0x88] sm:$0xff] %vm123_vm1, %v1470_v37  ;;  %v1448_v19 = vld [vmem:[%s5159_s2 + $0x98] sm:$0xf]  ;;  %v1471_v9 = vadd.f32 %v1447_v39, %v4298_v34  ;;  %v5428_v63 = vld [vmem:[#allocation32_spill] sm:$0xff]  ;;  %v1233_v15 = vsel %vm390_vm4, %v4057_v14, %v4091_v18  ;;  %1320 = vst [vmem:[%s5159_s2 + $0xb0] sm:$0xf] %v1296_v23  ;;  %v1454_v37 = vadd.f32 %v4345_v4, %v1275_v44 }
  0xe6   :  { %v5429_v22 = vmax.f32 %v5428_v63, 0.0  ;;  %v1472_v59 = vadd.f32 %v1448_v19, %v4302_v41  ;;  %1321 = vst.msk [vmem:[%s5159_s2 + $0xb8] sm:$0xf] %vm142_vm2, %v1297_v46  ;;  %v1659_v34 = vpop.permute.xlu1 %1658  ;;  %v4621_v1 = vmul.f32 %v4280_v16, %v1356_v38  ;;  %v1748_v18 = vadd.f32 %v1657_v31, %v4124_v56  ;;  %v4646_v56 = vld [vmem:[%s5157_s0 + $0x268] sm:$0xff] }
  0xe7   :  { %1495 = vst [vmem:[%s5159_s2 + $0x90] sm:$0xf] %v1471_v9  ;;  %v1704_v14 = vsel %vm390_vm4, %v1657_v31, %v1659_v34  ;;  %v1831_v41 = vmax.f32 %v2325_v30, 0.0  ;;  %v4629_v19 = vmul.f32 %v4577_v62, %v1824_v40  ;;  %v4638_v44 = vmul.f32 %v4590_v21, %v1825_v42 }
  0xe8   :  { %v4603_v5 = vmul.f32 %v4488_v27, %v5429_v22  ;;  %1496 = vst [vmem:[%s5159_s2 + $0x98] sm:$0xf] %v1472_v59  ;;  %v1749_v4 = vadd.f32 %v1704_v14, %v1454_v37  ;;  %v4641_v9 = vmul.f32 %v4577_v62, %v1830_v33  ;;  %v2003_v38 = vmax.f32 %v2344_v3, 0.0  ;;  %v1449_v30 = vld [vmem:[%s5159_s2 + $0xa0] sm:$0xf]  ;;  %1772 = vst.msk [vmem:[%s5159_s2] sm:$0xff] %vm467_vm6, %v1748_v18  ;;  %v1661_v3 = vpop.permute.xlu0 %1660 }
  0xe9   :  { %v1278_v40 = vadd.f32 %v1233_v15, %v1138_v11  ;;  %v1450_v12 = vld [vmem:[%s5159_s2 + $0xa8] sm:$0xf]  ;;  %v1455_v33 = vadd.f32 %v4348_v54, %v1276_v17  ;;  %v1456_v42 = vadd.f32 %v4351_v52, %v1277_v60  ;;  %v4662_v39 = vrot.slane %v4341_v57, %v5407_v10 }
  0xea   :  { %v1235_v23 = vsel %vm390_vm4, %v4141_v7, %v4136_v51  ;;  %v1473_v46 = vadd.f32 %v1449_v30, %v4314_v50  ;;  %v1474_v63 = vadd.f32 %v1450_v12, %v4317_v53  ;;  %v1663_v22 = vpop.permute.xlu1 %1662  ;;  %v1928_v15 = vadd.f32 %v4410_v6, %v1749_v4  ;;  %v4673_v54 = vld [vmem:[%s5157_s0 + $0x128] sm:$0xff] }
  0xeb   :  { %v1705_v10 = vsel %vm390_vm4, %v1659_v34, %v1661_v3  ;;  %v1706_v52 = vsel %vm390_vm4, %v1661_v3, %v1663_v22  ;;  %v4678_v60 = vmul.f32 %v4590_v21, %v1831_v41  ;;  %v2004_v7 = vmax.f32 %v4646_v56, 0.0  ;;  %v5431_v3 = vld [vmem:[#allocation10_spill] sm:$0xff] }
  0xec   :  { %1497 = vst [vmem:[%s5159_s2 + $0xa0] sm:$0xf] %v1473_v46  ;;  %1498 = vst [vmem:[%s5159_s2 + $0xa8] sm:$0xf] %v1474_v63  ;;  %v1750_v50 = vadd.f32 %v1705_v10, %v1455_v33  ;;  %v1751_v53 = vadd.f32 %v1706_v52, %v1456_v42  ;;  %v2107_v6 = vadd.f32 %v4441_v55, %v1928_v15  ;;  %v1451_v34 = vld [vmem:[%s5159_s2 + $0xb0] sm:$0xf] }
  0xed   :  { %v4690_v17 = vrot.slane %v4341_v57, %v5397_v47  ;;  %v1281_v59 = vadd.f32 %v1235_v23, %v3642_v13  ;;  %v1452_v31 = vld [vmem:[%s5159_s2 + $0xb8] sm:$0xf]  ;;  %v1457_v37 = vadd.f32 %v4374_v24, %v1278_v40  ;;  %v2062_v14 = vmul.f32 %v4662_v39, %v2003_v38  ;;  %v1665_v13 = vpop.permute.xlu0 %1664  ;;  %v4712_v24 = vld [vmem:[%s5157_s0 + $0x1e0] sm:$0xff]  ;;  %v2276_v46 = vld [vmem:[%s5157_s0 + $0x130] sm:$0xff] }
  0xee   :  { %v1359_v55 = vmax.f32 %v4673_v54, 0.0  ;;  %v1475_v18 = vadd.f32 %v1451_v34, %v4320_v20  ;;  %v1476_v47 = vadd.f32 %v1452_v31, %v4333_v28  ;;  %v1667_v57 = vpop.permute.xlu1 %1666  ;;  %2131 = vst [vmem:[%s5159_s2 + $0x8] sm:$0xff] %v2107_v6  ;;  %v1929_v41 = vadd.f32 %v4502_v49, %v1750_v50  ;;  %v2327_v20 = vld [vmem:[%s5157_s0 + $0x1e8] sm:$0xff]  ;;  %v5430_v63 = vld [vmem:[#allocation9_spill] sm:$0xff]  ;;  %v5432_v54 = vld [vmem:[#allocation18_spill] sm:$0xff] }
  0xef   :  { %v1930_v11 = vadd.f32 %v4505_v35, %v1751_v53  ;;  %v1236_v28 = vsel %vm390_vm4, %v4136_v51, %v4174_v45  ;;  %v1237_v4 = vsel %vm390_vm4, %v4174_v45, %v4172_v26  ;;  %v1613_v49 = vld [vmem:[%s5159_s2 + $0x28] sm:$0xff]  ;;  %v1707_v35 = vsel %vm390_vm4, %v1663_v22, %v1665_v13  ;;  %v1903_v45 = vld [vmem:[%s5159_s2] sm:$0xff]  ;;  %v5433_v50 = vld [vmem:[#allocation20_spill] sm:$0xff] }
  0xf0   :  { %v1708_v56 = vsel %vm390_vm4, %v1665_v13, %v1667_v57  ;;  %1499 = vst [vmem:[%s5159_s2 + $0xb0] sm:$0xf] %v1475_v18  ;;  %1500 = vst.msk [vmem:[%s5159_s2 + $0xb8] sm:$0xf] %vm142_vm2, %v1476_v47  ;;  %v1752_v51 = vadd.f32 %v1707_v35, %v1457_v37  ;;  %v2108_v40 = vadd.f32 %v4536_v58, %v1929_v41  ;;  %v1832_v42 = vmax.f32 %v4712_v24, 0.0  ;;  %v4770_v10 = vld [vmem:[%s5157_s0 + $0x2a8] sm:$0xff] }
  0xf1   :  { %v1753_v38 = vadd.f32 %v1708_v56, %v1613_v49  ;;  %v2109_v30 = vadd.f32 %v4539_v36, %v1930_v11  ;;  %v1460_v12 = vadd.f32 %v4386_v2, %v1281_v59  ;;  %v1927_v33 = vadd.f32 %v1903_v45, %v4407_v32  ;;  %v1669_v32 = vpop.permute.xlu0 %1668  ;;  %v5434_v6 = vld [vmem:[#allocation17_spill] sm:$0xff]  ;;  %v5437_v41 = vld [vmem:[#allocation11_spill] sm:$0xff] }
  0xf2   :  { %v1833_v23 = vmax.f32 %v2327_v20, 0.0  ;;  %v1282_v22 = vadd.f32 %v1236_v28, %v5430_v63  ;;  %v1283_v15 = vadd.f32 %v1237_v4, %v5431_v3  ;;  %v1238_v58 = vsel %vm390_vm4, %v4172_v26, %v5432_v54  ;;  %v1671_v2 = vpop.permute.xlu1 %1670  ;;  %2132 = vst [vmem:[%s5159_s2 + $0x10] sm:$0xff] %v2108_v40  ;;  %v4765_v26 = vld [vmem:[%s5157_s0 + $0x2a0] sm:$0xff]  ;;  %v5435_v31 = vld [vmem:[#allocation33_spill] sm:$0xff]  ;;  %v5439_v4 = vld [vmem:[#allocation28_spill] sm:$0xff] }
  0xf3   :  { %1777 = vst.msk [vmem:[%s5159_s2 + $0x28] sm:$0xff] %vm123_vm1, %v1753_v38  ;;  %2133 = vst [vmem:[%s5159_s2 + $0x18] sm:$0xff] %v2109_v30  ;;  %v1931_v36 = vadd.f32 %v4629_v19, %v1752_v51  ;;  %v1709_v52 = vsel %vm390_vm4, %v1669_v32, %v1671_v2  ;;  %v1754_v53 = vadd.f32 %v1669_v32, %v5433_v50  ;;  %v5436_v37 = vmax.f32 %v5435_v31, 0.0  ;;  %v2277_v57 = vld [vmem:[%s5157_s0 + $0x138] sm:$0xff]  ;;  %v2278_v31 = vld [vmem:[%s5157_s0 + $0x140] sm:$0xff] }
  0xf4   :  { %v2106_v59 = vadd.f32 %v5434_v6, %v1927_v33  ;;  %v4776_v34 = vmul.f32 %v4690_v17, %v2004_v7  ;;  %v1755_v19 = vadd.f32 %v1709_v52, %v1460_v12  ;;  %v1360_v13 = vmax.f32 %v2276_v46, 0.0  ;;  %v5438_v7 = vld [vmem:[#allocation29_spill] sm:$0xff]  ;;  %v5442_v12 = vld [vmem:[#allocation40_spill] sm:$0xff] }
  0xf5   :  { %v4781_v18 = vmul.f32 %v4662_v39, %v5436_v37  ;;  %v2110_v47 = vadd.f32 %v2062_v14, %v1931_v36  ;;  %v1284_v11 = vadd.f32 %v1238_v58, %v5437_v41  ;;  %1778 = vst.msk [vmem:[%s5159_s2 + $0x30] sm:$0xff] %vm467_vm6, %v1754_v53  ;;  %v1418_v20 = vmul.f32 %v5438_v7, %v1359_v55  ;;  %v1673_v56 = vpop.permute.xlu0 %1672  ;;  %v5440_v45 = vld [vmem:[#allocation41_spill] sm:$0xff]  ;;  %v2328_v55 = vld [vmem:[%s5157_s0 + $0x1f0] sm:$0xff]  ;;  %v5443_v53 = vld [vmem:[#allocation14_spill] sm:$0xff] }
  0xf6   :  { %2130 = vst [vmem:[%s5159_s2] sm:$0xff] %v2106_v59  ;;  %v2011_v14 = vmax.f32 %v4765_v26, 0.0  ;;  %v2012_v28 = vmax.f32 %v4770_v10, 0.0  ;;  %v1934_v49 = vadd.f32 %v5439_v4, %v1755_v19  ;;  %v1675_v35 = vpop.permute.xlu1 %1674  ;;  %v1461_v51 = vadd.f32 %v4476_v25, %v1282_v22  ;;  %v2329_v30 = vld [vmem:[%s5157_s0 + $0x1f8] sm:$0xff]  ;;  %v2354_v25 = vld [vmem:[%s5157_s0 + $0x2b0] sm:$0xff] }
  0xf7   :  { %v1462_v38 = vadd.f32 %v4499_v48, %v1283_v15  ;;  %2134 = vst [vmem:[%s5159_s2 + $0x20] sm:$0xff] %v2110_v47  ;;  %v4804_v40 = vmul.f32 %v5440_v45, %v1833_v23  ;;  %v5441_v48 = vld [vmem:[#allocation35_spill] sm:$0xff]  ;;  %v1710_v46 = vsel %vm390_vm4, %v1671_v2, %v1673_v56  ;;  %v1711_v23 = vsel %vm390_vm4, %v1673_v56, %v1675_v35  ;;  %v2355_v19 = vld [vmem:[%s5157_s0 + $0x2b8] sm:$0xff]  ;;  %v5444_v37 = vld [vmem:[#allocation36_spill] sm:$0xff] }
  0xf8   :  { %v1240_v33 = vsel %vm390_vm4, %v5442_v12, %v5441_v48  ;;  %v1361_v63 = vmax.f32 %v2277_v57, 0.0  ;;  %v2113_v22 = vadd.f32 %v4473_v61, %v1934_v49  ;;  %v1756_v3 = vadd.f32 %v1710_v46, %v1461_v51  ;;  %v5445_v57 = vld [vmem:[#allocation42_spill] sm:$0xff]  ;;  %v5446_v56 = vld [vmem:[#allocation13_spill] sm:$0xff]  ;;  %v5449_v12 = vld [vmem:[#allocation24_spill] sm:$0xff] }
  0xf9   :  { %v1757_v15 = vadd.f32 %v1711_v23, %v1462_v38  ;;  %v1419_v54 = vmul.f32 %v4258_v29, %v1360_v13  ;;  %v1463_v58 = vadd.f32 %v4621_v1, %v1284_v11  ;;  %v1834_v36 = vmax.f32 %v2328_v55, 0.0  ;;  %v1677_v59 = vpop.permute.xlu0 %1676 }
  0xfa   :  { %v1908_v32 = vld [vmem:[%s5159_s2 + $0x28] sm:$0xff]  ;;  %v1835_v52 = vmax.f32 %v2329_v30, 0.0  ;;  %v2013_v50 = vmax.f32 %v2354_v25, 0.0  ;;  %v1287_v2 = vadd.f32 %v1240_v33, %v5443_v53  ;;  %2137 = vst [vmem:[%s5159_s2 + $0x38] sm:$0xff] %v2113_v22  ;;  %v1935_v61 = vadd.f32 %v4523_v43, %v1756_v3  ;;  %v1679_v29 = vpop.permute.xlu1 %1678  ;;  %v5450_v22 = vld [vmem:[#allocation26_spill] sm:$0xff] }
  0xfb   :  { %v1936_v6 = vadd.f32 %v4526_v0, %v1757_v15  ;;  %v1932_v1 = vadd.f32 %v1908_v32, %v4638_v44  ;;  %v1241_v47 = vsel %vm390_vm4, %v5441_v48, %v5444_v37  ;;  %v1242_v43 = vsel %vm390_vm4, %v5444_v37, %v5445_v57  ;;  %v1619_v0 = vld [vmem:[%s5159_s2 + $0x58] sm:$0xff]  ;;  %v5448_v25 = vld [vmem:[#allocation19_spill] sm:$0xff]  ;;  %v5452_v53 = vld [vmem:[#allocation38_spill] sm:$0xff] }
  0xfc   :  { %v1712_v44 = vsel %vm390_vm4, %v1675_v35, %v1677_v59  ;;  %v1713_v13 = vsel %vm390_vm4, %v1677_v59, %v1679_v29  ;;  %v1909_v41 = vld [vmem:[%s5159_s2 + $0x30] sm:$0xff]  ;;  %v2114_v11 = vadd.f32 %v4544_v8, %v1935_v61  ;;  %v5447_v35 = vld [vmem:[#allocation34_spill] sm:$0xff]  ;;  %v2014_v55 = vmax.f32 %v2355_v19, 0.0  ;;  %v5451_v15 = vld [vmem:[#allocation21_spill] sm:$0xff] }
  0xfd   :  { %v2115_v7 = vadd.f32 %v4603_v5, %v1936_v6  ;;  %v1758_v4 = vadd.f32 %v1712_v44, %v1463_v58  ;;  %v1759_v49 = vadd.f32 %v1713_v13, %v1619_v0  ;;  %1956 = vst.msk [vmem:[%s5159_s2 + $0x28] sm:$0xff] %vm123_vm1, %v1932_v1  ;;  %v1933_v51 = vadd.f32 %v1909_v41, %v5446_v56  ;;  %v1681_v46 = vpop.permute.xlu0 %1680  ;;  %v5454_v29 = vld [vmem:[#allocation16_spill] sm:$0xff]  ;;  %v2356_v1 = vld [vmem:[%s5157_s0 + $0x2c0] sm:$0xff]  ;;  %v5458_v56 = vld [vmem:[#allocation37_spill] sm:$0xff] }
  0xfe   :  { %v1420_v38 = vmul.f32 %v5447_v35, %v1361_v63  ;;  %v1362_v30 = vmax.f32 %v2278_v31, 0.0  ;;  %v1288_v48 = vadd.f32 %v1241_v47, %v5448_v25  ;;  %v1289_v33 = vadd.f32 %v1242_v43, %v5449_v12  ;;  %2138 = vst [vmem:[%s5159_s2 + $0x40] sm:$0xff] %v2114_v11  ;;  %v1683_v5 = vpop.permute.xlu1 %1682  ;;  %v2330_v63 = vld [vmem:[%s5157_s0 + $0x200] sm:$0xff]  ;;  %v5457_v37 = vld [vmem:[#allocation12_spill] sm:$0xff] }
  0xff   :  { %2139 = vst [vmem:[%s5159_s2 + $0x48] sm:$0xff] %v2115_v7  ;;  %1783 = vst.msk [vmem:[%s5159_s2 + $0x58] sm:$0xff] %vm123_vm1, %v1759_v49  ;;  %v1937_v8 = vadd.f32 %v4641_v9, %v1758_v4  ;;  %v1466_v23 = vadd.f32 %v1418_v20, %v1287_v2  ;;  %v1243_v3 = vsel %vm390_vm4, %v5445_v57, %v5450_v22  ;;  %v5453_v9 = vld [vmem:[#allocation39_spill] sm:$0xff]  ;;  %v5456_v19 = vld [vmem:[#allocation22_spill] sm:$0xff]  ;;  %v2015_v11 = vmax.f32 %v2356_v1, 0.0 }
 0x100   :  { %v2112_v58 = vadd.f32 %v5451_v15, %v1933_v51  ;;  %v1714_v32 = vsel %vm390_vm4, %v1681_v46, %v1683_v5  ;;  %v1760_v61 = vadd.f32 %v1681_v46, %v5452_v53  ;;  %v2071_v20 = vmul.f32 %v5453_v9, %v2012_v28 }
 0x101   :  { %v2116_v6 = vadd.f32 %v4781_v18, %v1937_v8  ;;  %v1761_v2 = vadd.f32 %v1714_v32, %v1466_v23  ;;  %v1893_v59 = vmul.f32 %v5454_v29, %v1834_v36  ;;  %v5455_v18 = vld [vmem:[#allocation15_spill] sm:$0xff]  ;;  %v2072_v28 = vmul.f32 %v5456_v19, %v2013_v50  ;;  %v1685_v0 = vpop.permute.xlu0 %1684 }
 0x102   :  { %2136 = vst [vmem:[%s5159_s2 + $0x30] sm:$0xff] %v2112_v58  ;;  %1784 = vst.msk [vmem:[%s5159_s2 + $0x60] sm:$0xff] %vm467_vm6, %v1760_v61  ;;  %v1894_v10 = vmul.f32 %v5455_v18, %v1835_v52  ;;  %v1421_v31 = vmul.f32 %v4280_v16, %v1362_v30  ;;  %v1836_v36 = vmax.f32 %v2330_v63, 0.0  ;;  %v1290_v47 = vadd.f32 %v1243_v3, %v5457_v37  ;;  %v1687_v43 = vpop.permute.xlu1 %1686  ;;  %v2332_v3 = vld [vmem:[%s5157_s0 + $0x210] sm:$0xf] }
 0x103   :  { %2140 = vst [vmem:[%s5159_s2 + $0x50] sm:$0xff] %v2116_v6  ;;  %v1940_v57 = vadd.f32 %v4804_v40, %v1761_v2  ;;  %v1467_v44 = vadd.f32 %v1419_v54, %v1288_v48  ;;  %v1468_v13 = vadd.f32 %v1420_v38, %v1289_v33  ;;  %v2073_v50 = vmul.f32 %v4488_v27, %v2014_v55  ;;  %v1625_v33 = vld [vmem:[%s5159_s2 + $0x88] sm:$0xff]  ;;  %v1626_v61 = vld [vmem:[%s5159_s2 + $0x90] sm:$0xf]  ;;  %v2333_v6 = vld [vmem:[%s5157_s0 + $0x218] sm:$0xf] }
 0x104   :  { %v2087_v52 = vld [vmem:[%s5159_s2 + $0x28] sm:$0xff]  ;;  %v1715_v16 = vsel %vm390_vm4, %v1683_v5, %v1685_v0  ;;  %v1716_v41 = vsel %vm390_vm4, %v1685_v0, %v1687_v43  ;;  %v1891_v51 = vmul.f32 %v5458_v56, %v1832_v42  ;;  %v1895_v35 = vmul.f32 %v4577_v62, %v1836_v36  ;;  %v5459_v42 = vld [vmem:[#allocation25_spill] sm:$0xff] }
 0x105   :  { %v2111_v7 = vadd.f32 %v2087_v52, %v4776_v34  ;;  %v2119_v4 = vadd.f32 %v2071_v20, %v1940_v57  ;;  %v1762_v49 = vadd.f32 %v1715_v16, %v1467_v44  ;;  %v1763_v40 = vadd.f32 %v1716_v41, %v1468_v13  ;;  %v1689_v25 = vpop.permute.xlu0 %1688  ;;  %v1627_v2 = vld [vmem:[%s5159_s2 + $0x98] sm:$0xf]  ;;  %v2335_v0 = vld [vmem:[%s5157_s0 + $0x228] sm:$0xf]  ;;  %v1628_v16 = vld [vmem:[%s5159_s2 + $0xa0] sm:$0xf] }
 0x106   :  { %v1914_v54 = vld [vmem:[%s5159_s2 + $0x58] sm:$0xff]  ;;  %v1691_v30 = vpop.permute.xlu1 %1690  ;;  %v1469_v24 = vadd.f32 %v1421_v31, %v1290_v47  ;;  %v2070_v48 = vmul.f32 %v5459_v42, %v2011_v14  ;;  %v2074_v12 = vmul.f32 %v4662_v39, %v2015_v11  ;;  %v1717_v8 = vsel %vm390_vm4, %v1687_v43, %v1689_v25  ;;  %v2334_v43 = vld [vmem:[%s5157_s0 + $0x220] sm:$0xf]  ;;  %v1629_v41 = vld [vmem:[%s5159_s2 + $0xa8] sm:$0xf] }
 0x107   :  { %v1938_v38 = vadd.f32 %v1914_v54, %v4678_v60  ;;  %2135 = vst.msk [vmem:[%s5159_s2 + $0x28] sm:$0xff] %vm123_vm1, %v2111_v7  ;;  %2143 = vst [vmem:[%s5159_s2 + $0x68] sm:$0xff] %v2119_v4  ;;  %v1941_v34 = vadd.f32 %v1893_v59, %v1762_v49  ;;  %v1942_v55 = vadd.f32 %v1894_v10, %v1763_v40  ;;  %v2331_v60 = vld [vmem:[%s5157_s0 + $0x208] sm:$0xff]  ;;  %v5460_v10 = vld [vmem:[#allocation8_spill] sm:$0xff]  ;;  %v1838_v47 = vmax.f32 %v2332_v3, 0.0 }
 0x108   :  { %v1718_v5 = vsel %vm390_vm4, %v1689_v25, %v1691_v30  ;;  %v1764_v23 = vadd.f32 %v1717_v8, %v1469_v24  ;;  %v1837_v15 = vmax.f32 %v2331_v60, 0.0  ;;  %v1839_v57 = vmax.f32 %v2333_v6, 0.0  ;;  %v2357_v49 = vld [vmem:[%s5157_s0 + $0x2c8] sm:$0xff]  ;;  %v2337_v24 = vld [vmem:[%s5157_s0 + $0x238] sm:$0xf] }
 0x109   :  { %1962 = vst.msk [vmem:[%s5159_s2 + $0x58] sm:$0xff] %vm123_vm1, %v1938_v38  ;;  %v1915_v26 = vld [vmem:[%s5159_s2 + $0x60] sm:$0xff]  ;;  %v2120_v14 = vadd.f32 %v2072_v28, %v1941_v34  ;;  %v2121_v46 = vadd.f32 %v2073_v50, %v1942_v55  ;;  %v1765_v63 = vadd.f32 %v1718_v5, %v1625_v33  ;;  %v1693_v53 = vpop.permute.xlu0 %1692  ;;  %v5461_v28 = vmax.f32 %v5460_v10, 0.0  ;;  %v2358_v34 = vld [vmem:[%s5157_s0 + $0x2d0] sm:$0xf] }
 0x10a   :  { %v1939_v22 = vadd.f32 %v1915_v26, %v1891_v51  ;;  %v1943_v58 = vadd.f32 %v1895_v35, %v1764_v23  ;;  %v1695_v32 = vpop.permute.xlu1 %1694  ;;  %v1766_v1 = vadd.f32 %v1693_v53, %v1626_v61  ;;  %v1896_v44 = vmul.f32 %v4590_v21, %v1837_v15  ;;  %v1630_v33 = vld [vmem:[%s5159_s2 + $0xb0] sm:$0xf]  ;;  %v1631_v8 = vld [vmem:[%s5159_s2 + $0xb8] sm:$0xf] }
 0x10b   :  { %2144 = vst [vmem:[%s5159_s2 + $0x70] sm:$0xff] %v2120_v14  ;;  %2145 = vst [vmem:[%s5159_s2 + $0x78] sm:$0xff] %v2121_v46  ;;  %v1719_v59 = vsel %vm390_vm4, %v1693_v53, %v1695_v32  ;;  %v2069_v31 = vmul.f32 %v4690_v17, %v5461_v28  ;;  %v1897_v51 = vmul.f32 %v5458_v56, %v1838_v47  ;;  %v1840_v55 = vmax.f32 %v2334_v43, 0.0  ;;  %v2336_v56 = vld [vmem:[%s5157_s0 + $0x230] sm:$0xf] }
 0x10c   :  { %1789 = vst.msk [vmem:[%s5159_s2 + $0x88] sm:$0xff] %vm123_vm1, %v1765_v63  ;;  %v2118_v20 = vadd.f32 %v2070_v48, %v1939_v22  ;;  %v2122_v36 = vadd.f32 %v2074_v12, %v1943_v58  ;;  %v1767_v37 = vadd.f32 %v1719_v59, %v1627_v2  ;;  %v1898_v38 = vmul.f32 %v5440_v45, %v1839_v57  ;;  %v2359_v14 = vld [vmem:[%s5157_s0 + $0x2d8] sm:$0xf] }
 0x10d   :  { %1790 = vst.msk [vmem:[%s5159_s2 + $0x90] sm:$0xf] %vm480_vm7, %v1766_v1  ;;  %v1697_v52 = vpop.permute.xlu0 %1696  ;;  %v1841_v30 = vmax.f32 %v2335_v0, 0.0  ;;  %v2016_v48 = vmax.f32 %v2357_v49, 0.0  ;;  %v1899_v3 = vmul.f32 %v5454_v29, %v1840_v55  ;;  %v1842_v53 = vmax.f32 %v2336_v56, 0.0 }
 0x10e   :  { %2142 = vst [vmem:[%s5159_s2 + $0x60] sm:$0xff] %v2118_v20  ;;  %2146 = vst [vmem:[%s5159_s2 + $0x80] sm:$0xff] %v2122_v36  ;;  %v1699_v13 = vpop.permute.xlu1 %1698  ;;  %v1720_v11 = vsel %vm390_vm4, %v1695_v32, %v1697_v52  ;;  %v2017_v32 = vmax.f32 %v2358_v34, 0.0  ;;  %v1843_v61 = vmax.f32 %v2337_v24, 0.0  ;;  %v2018_v29 = vmax.f32 %v2359_v14, 0.0 }
 0x10f   :  { %1791 = vst [vmem:[%s5159_s2 + $0x98] sm:$0xf] %v1767_v37  ;;  %v1721_v7 = vsel %vm390_vm4, %v1697_v52, %v1699_v13  ;;  %v1768_v40 = vadd.f32 %v1720_v11, %v1628_v16  ;;  %v1900_v15 = vmul.f32 %v5455_v18, %v1841_v30  ;;  %v2360_v18 = vld [vmem:[%s5157_s0 + $0x2e0] sm:$0xf]  ;;  %v2075_v6 = vmul.f32 %v4690_v17, %v2016_v48  ;;  %v2361_v20 = vld [vmem:[%s5157_s0 + $0x2e8] sm:$0xf] }
 0x110   :  { %v2093_v50 = vld [vmem:[%s5159_s2 + $0x58] sm:$0xff]  ;;  %v1769_v54 = vadd.f32 %v1721_v7, %v1629_v41  ;;  %v2076_v28 = vmul.f32 %v5459_v42, %v2017_v32  ;;  %v1902_v36 = vmul.f32 %v4590_v21, %v1843_v61  ;;  %v2077_v47 = vmul.f32 %v5453_v9, %v2018_v29 }
 0x111   :  { %v2117_v4 = vadd.f32 %v2093_v50, %v2069_v31  ;;  %1792 = vst [vmem:[%s5159_s2 + $0xa0] sm:$0xf] %v1768_v40  ;;  %v1701_v60 = vpop.permute.xlu0 %1700  ;;  %v1901_v31 = vmul.f32 %v4577_v62, %v1842_v53  ;;  %v2019_v57 = vmax.f32 %v2360_v18, 0.0  ;;  %v2020_v43 = vmax.f32 %v2361_v20, 0.0  ;;  %v2362_v62 = vld [vmem:[%s5157_s0 + $0x2f0] sm:$0xf] }
 0x112   :  { %1793 = vst [vmem:[%s5159_s2 + $0xa8] sm:$0xf] %v1769_v54  ;;  %v1703_v45 = vpop.permute.xlu1 %1702  ;;  %v1722_v5 = vsel %vm390_vm4, %v1699_v13, %v1701_v60  ;;  %v2363_v21 = vld [vmem:[%s5157_s0 + $0x2f8] sm:$0xf] }
 0x113   :  { %v1920_v35 = vld [vmem:[%s5159_s2 + $0x88] sm:$0xff]  ;;  %2141 = vst.msk [vmem:[%s5159_s2 + $0x58] sm:$0xff] %vm123_vm1, %v2117_v4  ;;  %v1723_v26 = vsel %vm390_vm4, %v1701_v60, %v1703_v45  ;;  %v1770_v63 = vadd.f32 %v1722_v5, %v1630_v33  ;;  %v2078_v41 = vmul.f32 %v5456_v19, %v2019_v57  ;;  %v2079_v11 = vmul.f32 %v4488_v27, %v2020_v43 }
 0x114   :  { %v1944_v25 = vadd.f32 %v1920_v35, %v1896_v44  ;;  %v1921_v12 = vld [vmem:[%s5159_s2 + $0x90] sm:$0xf]  ;;  %v1771_v22 = vadd.f32 %v1723_v26, %v1631_v8  ;;  %v2021_v4 = vmax.f32 %v2362_v62, 0.0  ;;  %v2022_v49 = vmax.f32 %v2363_v21, 0.0 }
 0x115   :  { %v1945_v23 = vadd.f32 %v1921_v12, %v1897_v51  ;;  %1794 = vst [vmem:[%s5159_s2 + $0xb0] sm:$0xf] %v1770_v63 }
 0x116   :  { %1968 = vst.msk [vmem:[%s5159_s2 + $0x88] sm:$0xff] %vm123_vm1, %v1944_v25  ;;  %v1922_v46 = vld [vmem:[%s5159_s2 + $0x98] sm:$0xf]  ;;  %v2080_v51 = vmul.f32 %v4662_v39, %v2021_v4  ;;  %v2081_v35 = vmul.f32 %v4690_v17, %v2022_v49 }
 0x117   :  { %v1946_v58 = vadd.f32 %v1922_v46, %v1898_v38  ;;  %1969 = vst [vmem:[%s5159_s2 + $0x90] sm:$0xf] %v1945_v23  ;;  %1795 = vst.msk [vmem:[%s5159_s2 + $0xb8] sm:$0xf] %vm142_vm2, %v1771_v22 }
 0x118   :  { %v1923_v2 = vld [vmem:[%s5159_s2 + $0xa0] sm:$0xf] }
 0x119   :  { %1970 = vst [vmem:[%s5159_s2 + $0x98] sm:$0xf] %v1946_v58  ;;  %v1924_v59 = vld [vmem:[%s5159_s2 + $0xa8] sm:$0xf]  ;;  %v1947_v1 = vadd.f32 %v1923_v2, %v1899_v3 }
 0x11a   :  { %v1948_v10 = vadd.f32 %v1924_v59, %v1900_v15 }
 0x11b   :  { %1971 = vst [vmem:[%s5159_s2 + $0xa0] sm:$0xf] %v1947_v1 }
 0x11c   :  { %1972 = vst [vmem:[%s5159_s2 + $0xa8] sm:$0xf] %v1948_v10  ;;  %v1925_v42 = vld [vmem:[%s5159_s2 + $0xb0] sm:$0xf] }
 0x11d   :  { %v2099_v37 = vld [vmem:[%s5159_s2 + $0x88] sm:$0xff]  ;;  %v1949_v50 = vadd.f32 %v1925_v42, %v1901_v31 }
 0x11e   :  { %v2123_v0 = vadd.f32 %v2099_v37, %v2075_v6  ;;  %v2100_v9 = vld [vmem:[%s5159_s2 + $0x90] sm:$0xf]  ;;  %v1926_v44 = vld [vmem:[%s5159_s2 + $0xb8] sm:$0xf] }
 0x11f   :  { %v2124_v52 = vadd.f32 %v2100_v9, %v2076_v28  ;;  %v1950_v16 = vadd.f32 %v1926_v44, %v1902_v36  ;;  %1973 = vst [vmem:[%s5159_s2 + $0xb0] sm:$0xf] %v1949_v50 }
 0x120   :  { %2147 = vst.msk [vmem:[%s5159_s2 + $0x88] sm:$0xff] %vm123_vm1, %v2123_v0  ;;  %v2101_v13 = vld [vmem:[%s5159_s2 + $0x98] sm:$0xf] }
 0x121   :  { %v2125_v7 = vadd.f32 %v2101_v13, %v2077_v47  ;;  %2148 = vst [vmem:[%s5159_s2 + $0x90] sm:$0xf] %v2124_v52  ;;  %1974 = vst.msk [vmem:[%s5159_s2 + $0xb8] sm:$0xf] %vm142_vm2, %v1950_v16 }
 0x122   :  { %v2102_v27 = vld [vmem:[%s5159_s2 + $0xa0] sm:$0xf] }
 0x123   :  { %2149 = vst [vmem:[%s5159_s2 + $0x98] sm:$0xf] %v2125_v7  ;;  %v2103_v19 = vld [vmem:[%s5159_s2 + $0xa8] sm:$0xf]  ;;  %v2126_v40 = vadd.f32 %v2102_v27, %v2078_v41 }
 0x124   :  { %v2127_v54 = vadd.f32 %v2103_v19, %v2079_v11 }
 0x125   :  { %2150 = vst [vmem:[%s5159_s2 + $0xa0] sm:$0xf] %v2126_v40 }
 0x126   :  { %2151 = vst [vmem:[%s5159_s2 + $0xa8] sm:$0xf] %v2127_v54  ;;  %v2104_v38 = vld [vmem:[%s5159_s2 + $0xb0] sm:$0xf] }
 0x127   :  { %v2128_v55 = vadd.f32 %v2104_v38, %v2080_v51 }
 0x128   :  { %v2105_v34 = vld [vmem:[%s5159_s2 + $0xb8] sm:$0xf] }
 0x129   :  { %v2129_v39 = vadd.f32 %v2105_v34, %v2081_v35  ;;  %2152 = vst [vmem:[%s5159_s2 + $0xb0] sm:$0xf] %v2128_v55 }
 0x12b   :  { %2153 = vst.msk [vmem:[%s5159_s2 + $0xb8] sm:$0xf] %vm142_vm2, %v2129_v39 }

</bundles_post_ra>
